<compile_context>
chip_gen: v7x
topology: tpu7x:2x2x1
jax: 0.10.0
libtpu: 0.0.40
codegen_flags: <defaults>
</compile_context>

<pallas_src>
import functools

import jax
import jax.numpy as jnp
from jax import lax
from jax.experimental import pallas as pl
from jax.experimental.pallas import tpu as pltpu

_UNROLL_MAX_STRIPS = 4  # fully unroll strip loops when the trip count is small


def rcab_kernel(x_ref, xr_ref, w1_ref, b1_ref, w2t_ref, b2_ref,
                wd_ref, bd_ref, wut_ref, bu_ref,
                out_ref,
                xpad, h1pad, h2_scr, pool_scr,
                *, rows_per_strip):
    # x_ref   : (1, H, W, C)   channels-last conv input, compute dtype
    # xr_ref  : (1, C, H*W)    original NCHW input (flattened), residual path
    # w1_ref  : (9*C, C)       conv1 weight, all 9 taps fused along K (compute dtype)
    # b1_ref  : (1, C)  f32
    # w2t_ref : (C, 9*C)       conv2 weight, transposed for the NT matmul (compute dtype)
    # b2_ref  : (C, 1)  f32
    # wd_ref  : (C, Cr) f32    1x1 channel-reduction weight
    # bd_ref  : (1, Cr) f32
    # wut_ref : (C, Cr) f32    transposed 1x1 channel-expansion weight
    # bu_ref  : (C, 1)  f32
    # out_ref : (1, C, H*W)    NCHW output block (lane-dense along H*W)
    # xpad    : (H+2, W+2, C)  compute-dtype scratch (zero-halo padded input)
    # h1pad   : (H+2, W+2, C)  compute-dtype scratch (zero-halo padded conv1 act)
    # h2_scr  : (C, H*W)       compute-dtype scratch (conv2 output, channel-major)
    # pool_scr: (C, 1)   f32   running channel sums for the global average pool
    H, W, C = x_ref.shape[1], x_ref.shape[2], x_ref.shape[3]
    Hp, Wp = H + 2, W + 2
    R = rows_per_strip
    RW = R * W
    n_strips = H // R
    cdtype = xpad.dtype

    def for_each_strip(body):
        # body(h0, off): h0 = first image row of the strip, off = h0 * W.
        if n_strips <= _UNROLL_MAX_STRIPS:
            for s in range(n_strips):           # fully unrolled (LLO visibility)
                body(s * R, s * RW)
        else:
            @pl.loop(0, n_strips)
            def _(s):
                body(pl.multiple_of(s * R, R), pl.multiple_of(s * RW, RW))

    # ---- zero only the top/bottom halo rows (cheap, per-step, core-safe) ----
    # Column halos are written as part of the full-width staging stores below.
    zrow = jnp.zeros((1, Wp, C), cdtype)
    xpad[0:1, :, :] = zrow
    xpad[Hp - 1:Hp, :, :] = zrow
    h1pad[0:1, :, :] = zrow
    h1pad[Hp - 1:Hp, :, :] = zrow

    zcol = jnp.zeros((R, 1, C), cdtype)          # hoisted; reused by both staging loops
    b1 = b1_ref[...]                             # (1, C) f32
    b2 = b2_ref[...]                             # (C, 1) f32

    # ---- stage the (unpadded) input into xpad, strip by strip ---------------
    def stage_x(h0, off):
        xpad[pl.ds(h0 + 1, R), :, :] = jnp.concatenate(
            [zcol, x_ref[0, pl.ds(h0, R), :, :], zcol], axis=1)
    for_each_strip(stage_x)

    def im2col(src_pad, h0):
        # (R*W, 9*C): all 9 taps of the 3x3 kernel fused along the contraction dim.
        return jnp.concatenate(
            [src_pad[pl.ds(h0 + dh, R), dw:dw + W, :]
             for dh in range(3) for dw in range(3)],
            axis=-1).reshape(RW, 9 * C)

    # ---- conv1 + bias + ReLU, re-padded into h1pad (one MXU matmul / strip) --
    def conv1_strip(h0, off):
        a = jnp.dot(im2col(xpad, h0), w1_ref[...],
                    preferred_element_type=jnp.float32)              # (RW, C) f32
        a = jnp.maximum(a + b1, 0.0)
        h1pad[pl.ds(h0 + 1, R), :, :] = jnp.concatenate(
            [zcol, a.reshape(R, W, C).astype(cdtype), zcol], axis=1)
    for_each_strip(conv1_strip)

    # ---- conv2 + bias, channel-major straight off the MXU (NT matmul) -------
    # plus running f32 channel sums for the global average pool.
    pool_scr[...] = jnp.zeros_like(pool_scr)

    def conv2_strip(h0, off):
        a_t = lax.dot_general(
            w2t_ref[...], im2col(h1pad, h0),
            (((1,), (1,)), ((), ())),                                # contract K=9C
            preferred_element_type=jnp.float32) + b2                 # (C, RW) f32
        pool_scr[...] += jnp.sum(a_t, axis=1, keepdims=True)         # pre-cast f32
        h2_scr[:, pl.ds(off, RW)] = a_t.astype(cdtype)
    for_each_strip(conv2_strip)

    # ---- channel attention gate: tiny 1x1s on the VPU, all f32 ---------------
    y = pool_scr[...] * (1.0 / (H * W))                              # (C, 1)
    z = jnp.sum(wd_ref[...] * y, axis=0, keepdims=True) + bd_ref[...]    # (1, Cr)
    z = jnp.maximum(z, 0.0)
    gate = jax.nn.sigmoid(
        jnp.sum(wut_ref[...] * z, axis=1, keepdims=True) + bu_ref[...])  # (C, 1)

    # ---- scale + residual, NCHW lane-dense writeback (no transposes) --------
    def epilogue_strip(h0, off):
        h2 = h2_scr[:, pl.ds(off, RW)].astype(jnp.float32)           # (C, RW)
        x_in = xr_ref[0, :, pl.ds(off, RW)].astype(jnp.float32)      # (C, RW)
        out_ref[0, :, pl.ds(off, RW)] = (h2 * gate + x_in).astype(out_ref.dtype)
    for_each_strip(epilogue_strip)


def _rows_per_strip(h, w):
    """Largest divisor r of h with r*w rows of M per strip within the cap.

    Whole image when h*w <= 512; otherwise up to 256 rows of M per MXU pass
    (amortizes the RHS weight push, which dominates at N=64, K=9*C)."""
    cap = 512 if h * w <= 512 else 256
    best = 1
    for r in range(1, h + 1):
        if h % r == 0 and r * w <= cap:
            best = r
    return best


@functools.partial(jax.jit, static_argnames=("compute_dtype",))
def rcab_forward(x_nchw, w1, b1, w2, b2, wd, bd, wu, bu,
                 compute_dtype=jnp.bfloat16):
    """RCAB forward. x is NCHW (PyTorch layout); 3x3 conv weights are HWIO."""
    N, C, H, W = x_nchw.shape
    Cr = wd.shape[1]
    Hp, Wp = H + 2, W + 2
    R = _rows_per_strip(H, W)

    # Conv path: channels-last copy in the compute dtype (transpose + cast fuse
    # into one XLA op, half the write traffic at bf16). The residual / output
    # path uses the original NCHW tensor directly — there is no output-side
    # transpose any more (the kernel writes NCHW itself).
    # TODO(synk): drop this remaining input-side transpose by building the
    # im2col from the NCHW tensor in a channel-major formulation.
    x_nhwc = jnp.transpose(x_nchw, (0, 2, 3, 1)).astype(compute_dtype)
    x_flat = x_nchw.reshape(N, C, H * W)          # contiguous reshape, free

    # Fuse all 9 taps along the contraction dim; pre-transpose conv2's weight
    # for the NT (channel-major output) matmul.
    w1w = w1.reshape(9 * C, C).astype(compute_dtype)                 # (9C, C)
    w2t = jnp.transpose(w2.reshape(9 * C, C)).astype(compute_dtype)  # (C, 9C)
    # Channel-attention params stay f32 (element-wise epilogue on the VPU).
    wdf = wd.astype(jnp.float32)                                     # (C, Cr)
    wut = jnp.transpose(wu).astype(jnp.float32)                      # (C, Cr)

    kernel = functools.partial(rcab_kernel, rows_per_strip=R)

    out = pl.pallas_call(
        kernel,
        out_shape=jax.ShapeDtypeStruct((N, C, H * W), x_nchw.dtype),
        grid_spec=pltpu.PrefetchScalarGridSpec(
            num_scalar_prefetch=0,
            grid=(N,),
            in_specs=[
                pl.BlockSpec((1, H, W, C), lambda n: (n, 0, 0, 0)),
                pl.BlockSpec((1, C, H * W), lambda n: (n, 0, 0)),
                pl.BlockSpec((9 * C, C), lambda n: (0, 0)),
                pl.BlockSpec((1, C), lambda n: (0, 0)),
                pl.BlockSpec((C, 9 * C), lambda n: (0, 0)),
                pl.BlockSpec((C, 1), lambda n: (0, 0)),
                pl.BlockSpec((C, Cr), lambda n: (0, 0)),
                pl.BlockSpec((1, Cr), lambda n: (0, 0)),
                pl.BlockSpec((C, Cr), lambda n: (0, 0)),
                pl.BlockSpec((C, 1), lambda n: (0, 0)),
            ],
            out_specs=pl.BlockSpec((1, C, H * W), lambda n: (n, 0, 0)),
            scratch_shapes=[
                pltpu.VMEM((Hp, Wp, C), compute_dtype),   # padded input
                pltpu.VMEM((Hp, Wp, C), compute_dtype),   # padded conv1 activation
                pltpu.VMEM((C, H * W), compute_dtype),    # conv2 (pre-attention)
                pltpu.VMEM((C, 1), jnp.float32),          # pooled channel sums
            ],
        ),
        compiler_params=pltpu.CompilerParams(
            dimension_semantics=("parallel",)),
        # TODO(synk): for large SR images (e.g. 256x256) add a second grid axis
        # over row strips (halo re-fetch + two-pass gate), set vmem_limit_bytes
        # explicitly, and consider a bf16 residual read, so the per-step VMEM
        # footprint stays within v7x's 64 MiB and both v7x TensorCores are fed
        # even at small batch.
    )(x_nhwc, x_flat,
      w1w, b1.reshape(1, C).astype(jnp.float32),
      w2t, b2.reshape(C, 1).astype(jnp.float32),
      wdf, bd.reshape(1, Cr).astype(jnp.float32),
      wut, bu.reshape(C, 1).astype(jnp.float32))

    return out.reshape(N, C, H, W)                # NCHW already; no transpose


def rcab_reference(x_nchw, w1, b1, w2, b2, wd, bd, wu, bu):
    """Pure-JAX f32 reference matching the PyTorch RCAB forward."""
    def conv3(x, w, b):
        return lax.conv_general_dilated(
            x, w, (1, 1), "SAME",
            dimension_numbers=("NCHW", "HWIO", "NCHW")) + b[None, :, None, None]
    h = jax.nn.relu(conv3(x_nchw, w1, b1))
    h = conv3(h, w2, b2)
    y = jnp.mean(h, axis=(2, 3))                  # AdaptiveAvgPool2d(1)
    y = jax.nn.relu(y @ wd + bd)
    y = jax.nn.sigmoid(y @ wu + bu)
    return h * y[:, :, None, None] + x_nchw


if __name__ == "__main__":
    # RCAB defaults: n_feat=64, kernel_size=3, reduction=16.
    N, C, H, W = 2, 64, 16, 16
    Cr = C // 16

    key = jax.random.PRNGKey(0)
    ks = jax.random.split(key, 9)
    x = jax.random.normal(ks[0], (N, C, H, W), jnp.float32)
    w1 = jax.random.normal(ks[1], (3, 3, C, C), jnp.float32) * 0.05
    b1 = jax.random.normal(ks[2], (C,), jnp.float32) * 0.05
    w2 = jax.random.normal(ks[3], (3, 3, C, C), jnp.float32) * 0.05
    b2 = jax.random.normal(ks[4], (C,), jnp.float32) * 0.05
    wd = jax.random.normal(ks[5], (C, Cr), jnp.float32) * 0.05
    bd = jax.random.normal(ks[6], (Cr,), jnp.float32) * 0.05
    wu = jax.random.normal(ks[7], (Cr, C), jnp.float32) * 0.05
    bu = jax.random.normal(ks[8], (C,), jnp.float32) * 0.05

    args = (x, w1, b1, w2, b2, wd, bd, wu, bu)
    ref = rcab_reference(*args)

    # Exact-math check: f32 compute path must match the f32 reference tightly.
    out_f32 = jax.block_until_ready(rcab_forward(*args, compute_dtype=jnp.float32))
    assert out_f32.shape == (N, C, H, W)
    assert jnp.allclose(out_f32, ref, rtol=1e-3, atol=1e-3), "f32 path mismatch"

    # Fast path (default): bf16 MXU inputs + bf16 intermediate activations,
    # f32 accumulation, f32 gate / residual epilogue. Tolerance reflects bf16
    # input/weight/activation rounding (~2^-8 relative).
    out_bf16 = jax.block_until_ready(rcab_forward(*args))
    assert out_bf16.shape == (N, C, H, W)
    assert jnp.allclose(out_bf16, ref, rtol=3e-2, atol=3e-2), "bf16 path mismatch"

    print("KERNEL_OK")
</pallas_src>

<mosaic_0001>
module attributes {stable_mosaic.version = 11 : i64} {
  func.func @rcab_kernel(%arg0: i32, %arg1: memref<1x16x16x64xf32, #tpu.memory_space<vmem>>, %arg2: memref<1x64x256xf32, #tpu.memory_space<vmem>>, %arg3: memref<576x64xf32, #tpu.memory_space<vmem>>, %arg4: memref<1x64xf32, #tpu.memory_space<vmem>>, %arg5: memref<64x576xf32, #tpu.memory_space<vmem>>, %arg6: memref<64x1xf32, #tpu.memory_space<vmem>>, %arg7: memref<64x4xf32, #tpu.memory_space<vmem>>, %arg8: memref<1x4xf32, #tpu.memory_space<vmem>>, %arg9: memref<64x4xf32, #tpu.memory_space<vmem>>, %arg10: memref<64x1xf32, #tpu.memory_space<vmem>>, %arg11: memref<1x64x256xf32, #tpu.memory_space<vmem>>, %arg12: memref<18x18x64xf32, #tpu.memory_space<vmem>>, %arg13: memref<18x18x64xf32, #tpu.memory_space<vmem>>, %arg14: memref<64x256xf32, #tpu.memory_space<vmem>>, %arg15: memref<64x1xf32, #tpu.memory_space<vmem>>) attributes {dimension_semantics = [#tpu.dimension_semantics<parallel>], iteration_bounds = array<i64: 2>, scalar_prefetch = 0 : i64, scratch_operands = 4 : i64, tpu.core_type = #tpu.core_type<tc>, window_params = [{transform_indices = @transform_0, window_bounds = array<i64: 1, 16, 16, 64>}, {transform_indices = @transform_1, window_bounds = array<i64: 1, 64, 256>}, {pipeline_mode = #tpu.pipeline_mode<synchronous>, transform_indices = @transform_2, window_bounds = array<i64: 576, 64>}, {pipeline_mode = #tpu.pipeline_mode<synchronous>, transform_indices = @transform_3, window_bounds = array<i64: 1, 64>}, {pipeline_mode = #tpu.pipeline_mode<synchronous>, transform_indices = @transform_4, window_bounds = array<i64: 64, 576>}, {pipeline_mode = #tpu.pipeline_mode<synchronous>, transform_indices = @transform_5, window_bounds = array<i64: 64, 1>}, {pipeline_mode = #tpu.pipeline_mode<synchronous>, transform_indices = @transform_6, window_bounds = array<i64: 64, 4>}, {pipeline_mode = #tpu.pipeline_mode<synchronous>, transform_indices = @transform_7, window_bounds = array<i64: 1, 4>}, {pipeline_mode = #tpu.pipeline_mode<synchronous>, transform_indices = @transform_8, window_bounds = array<i64: 64, 4>}, {pipeline_mode = #tpu.pipeline_mode<synchronous>, transform_indices = @transform_9, window_bounds = array<i64: 64, 1>}, {transform_indices = @transform_10, window_bounds = array<i64: 1, 64, 256>}]} {
    %cst = arith.constant 0.000000e+00 : f32
    %0 = vector.broadcast %cst : f32 to vector<1x18x64xf32>
    %c0 = arith.constant 0 : index
    %c0_0 = arith.constant 0 : index
    %c0_1 = arith.constant 0 : index
    %1 = vector.load %arg12[%c0, %c0_0, %c0_1] : memref<18x18x64xf32, #tpu.memory_space<vmem>>, vector<1x18x64xf32>
    tpu.vector_store %arg12[%c0, %c0_0, %c0_1], %0 {strides = array<i32>} : memref<18x18x64xf32, #tpu.memory_space<vmem>>, vector<1x18x64xf32>,
    %c17 = arith.constant 17 : index
    %c0_2 = arith.constant 0 : index
    %c0_3 = arith.constant 0 : index
    %2 = vector.load %arg12[%c17, %c0_2, %c0_3] : memref<18x18x64xf32, #tpu.memory_space<vmem>>, vector<1x18x64xf32>
    tpu.vector_store %arg12[%c17, %c0_2, %c0_3], %0 {strides = array<i32>} : memref<18x18x64xf32, #tpu.memory_space<vmem>>, vector<1x18x64xf32>,
    %c0_4 = arith.constant 0 : index
    %c0_5 = arith.constant 0 : index
    %c0_6 = arith.constant 0 : index
    %3 = vector.load %arg13[%c0_4, %c0_5, %c0_6] : memref<18x18x64xf32, #tpu.memory_space<vmem>>, vector<1x18x64xf32>
    tpu.vector_store %arg13[%c0_4, %c0_5, %c0_6], %0 {strides = array<i32>} : memref<18x18x64xf32, #tpu.memory_space<vmem>>, vector<1x18x64xf32>,
    %c17_7 = arith.constant 17 : index
    %c0_8 = arith.constant 0 : index
    %c0_9 = arith.constant 0 : index
    %4 = vector.load %arg13[%c17_7, %c0_8, %c0_9] : memref<18x18x64xf32, #tpu.memory_space<vmem>>, vector<1x18x64xf32>
    tpu.vector_store %arg13[%c17_7, %c0_8, %c0_9], %0 {strides = array<i32>} : memref<18x18x64xf32, #tpu.memory_space<vmem>>, vector<1x18x64xf32>,
    %cst_10 = arith.constant 0.000000e+00 : f32
    %5 = vector.broadcast %cst_10 : f32 to vector<16x1x64xf32>
    %c0_11 = arith.constant 0 : index
    %c0_12 = arith.constant 0 : index
    %6 = vector.load %arg4[%c0_11, %c0_12] : memref<1x64xf32, #tpu.memory_space<vmem>>, vector<1x64xf32>
    %c0_13 = arith.constant 0 : index
    %c0_14 = arith.constant 0 : index
    %7 = vector.load %arg6[%c0_13, %c0_14] : memref<64x1xf32, #tpu.memory_space<vmem>>, vector<64x1xf32>
    %c0_15 = arith.constant 0 : index
    %c0_16 = arith.constant 0 : index
    %c0_17 = arith.constant 0 : index
    %c0_18 = arith.constant 0 : index
    %8 = vector.load %arg1[%c0_15, %c0_16, %c0_17, %c0_18] : memref<1x16x16x64xf32, #tpu.memory_space<vmem>>, vector<1x16x16x64xf32>
    %9 = vector.shape_cast %8 : vector<1x16x16x64xf32> to vector<16x16x64xf32>
    %10 = tpu.concatenate %5, %9, %5 in 1 : vector<16x1x64xf32>, vector<16x16x64xf32>, vector<16x1x64xf32> -> vector<16x18x64xf32>
    %c1 = arith.constant 1 : index
    %c0_19 = arith.constant 0 : index
    %c0_20 = arith.constant 0 : index
    %11 = vector.load %arg12[%c1, %c0_19, %c0_20] : memref<18x18x64xf32, #tpu.memory_space<vmem>>, vector<16x18x64xf32>
    tpu.vector_store %arg12[%c1, %c0_19, %c0_20], %10 {strides = array<i32>} : memref<18x18x64xf32, #tpu.memory_space<vmem>>, vector<16x18x64xf32>,
    %c0_21 = arith.constant 0 : index
    %c0_22 = arith.constant 0 : index
    %c0_23 = arith.constant 0 : index
    %12 = vector.load %arg12[%c0_21, %c0_22, %c0_23] : memref<18x18x64xf32, #tpu.memory_space<vmem>>, vector<16x16x64xf32>
    %c0_24 = arith.constant 0 : index
    %c1_25 = arith.constant 1 : index
    %c0_26 = arith.constant 0 : index
    %13 = vector.load %arg12[%c0_24, %c1_25, %c0_26] : memref<18x18x64xf32, #tpu.memory_space<vmem>>, vector<16x16x64xf32>
    %c0_27 = arith.constant 0 : index
    %c2 = arith.constant 2 : index
    %c0_28 = arith.constant 0 : index
    %14 = vector.load %arg12[%c0_27, %c2, %c0_28] : memref<18x18x64xf32, #tpu.memory_space<vmem>>, vector<16x16x64xf32>
    %c1_29 = arith.constant 1 : index
    %c0_30 = arith.constant 0 : index
    %c0_31 = arith.constant 0 : index
    %15 = vector.load %arg12[%c1_29, %c0_30, %c0_31] : memref<18x18x64xf32, #tpu.memory_space<vmem>>, vector<16x16x64xf32>
    %c1_32 = arith.constant 1 : index
    %c1_33 = arith.constant 1 : index
    %c0_34 = arith.constant 0 : index
    %16 = vector.load %arg12[%c1_32, %c1_33, %c0_34] : memref<18x18x64xf32, #tpu.memory_space<vmem>>, vector<16x16x64xf32>
    %c1_35 = arith.constant 1 : index
    %c2_36 = arith.constant 2 : index
    %c0_37 = arith.constant 0 : index
    %17 = vector.load %arg12[%c1_35, %c2_36, %c0_37] : memref<18x18x64xf32, #tpu.memory_space<vmem>>, vector<16x16x64xf32>
    %c2_38 = arith.constant 2 : index
    %c0_39 = arith.constant 0 : index
    %c0_40 = arith.constant 0 : index
    %18 = vector.load %arg12[%c2_38, %c0_39, %c0_40] : memref<18x18x64xf32, #tpu.memory_space<vmem>>, vector<16x16x64xf32>
    %c2_41 = arith.constant 2 : index
    %c1_42 = arith.constant 1 : index
    %c0_43 = arith.constant 0 : index
    %19 = vector.load %arg12[%c2_41, %c1_42, %c0_43] : memref<18x18x64xf32, #tpu.memory_space<vmem>>, vector<16x16x64xf32>
    %c2_44 = arith.constant 2 : index
    %c2_45 = arith.constant 2 : index
    %c0_46 = arith.constant 0 : index
    %20 = vector.load %arg12[%c2_44, %c2_45, %c0_46] : memref<18x18x64xf32, #tpu.memory_space<vmem>>, vector<16x16x64xf32>
    %21 = tpu.concatenate %12, %13, %14, %15, %16, %17, %18, %19, %20 in 2 : vector<16x16x64xf32>, vector<16x16x64xf32>, vector<16x16x64xf32>, vector<16x16x64xf32>, vector<16x16x64xf32>, vector<16x16x64xf32>, vector<16x16x64xf32>, vector<16x16x64xf32>, vector<16x16x64xf32> -> vector<16x16x576xf32>
    %22 = vector.shape_cast %21 : vector<16x16x576xf32> to vector<256x576xf32>
    %c0_47 = arith.constant 0 : index
    %c0_48 = arith.constant 0 : index
    %23 = vector.load %arg3[%c0_47, %c0_48] : memref<576x64xf32, #tpu.memory_space<vmem>>, vector<576x64xf32>
    %cst_49 = arith.constant dense<0.000000e+00> : vector<256x64xf32>
    %24 = tpu.matmul %22, %23, %cst_49 {dimension_numbers = #tpu.dot_dimension_numbers<[1], [0], [0], [1], [0, 0, 1, 1], [], []>} : vector<256x576xf32>, vector<576x64xf32>, vector<256x64xf32> -> vector<256x64xf32>
    %25 = vector.broadcast %6 : vector<1x64xf32> to vector<256x64xf32>
    %26 = arith.addf %24, %25 : vector<256x64xf32>
    %cst_50 = arith.constant 0.000000e+00 : f32
    %27 = vector.broadcast %cst_50 : f32 to vector<256x64xf32>
    %28 = arith.maximumf %26, %27 : vector<256x64xf32>
    %29 = vector.shape_cast %28 : vector<256x64xf32> to vector<16x16x64xf32>
    %30 = tpu.concatenate %5, %29, %5 in 1 : vector<16x1x64xf32>, vector<16x16x64xf32>, vector<16x1x64xf32> -> vector<16x18x64xf32>
    %c1_51 = arith.constant 1 : index
    %c0_52 = arith.constant 0 : index
    %c0_53 = arith.constant 0 : index
    %31 = vector.load %arg13[%c1_51, %c0_52, %c0_53] : memref<18x18x64xf32, #tpu.memory_space<vmem>>, vector<16x18x64xf32>
    tpu.vector_store %arg13[%c1_51, %c0_52, %c0_53], %30 {strides = array<i32>} : memref<18x18x64xf32, #tpu.memory_space<vmem>>, vector<16x18x64xf32>,
    %cst_54 = arith.constant 0.000000e+00 : f32
    %32 = vector.broadcast %cst_54 : f32 to vector<64x1xf32>
    %c0_55 = arith.constant 0 : index
    %c0_56 = arith.constant 0 : index
    %33 = vector.load %arg15[%c0_55, %c0_56] : memref<64x1xf32, #tpu.memory_space<vmem>>, vector<64x1xf32>
    tpu.vector_store %arg15[%c0_55, %c0_56], %32 {strides = array<i32>} : memref<64x1xf32, #tpu.memory_space<vmem>>, vector<64x1xf32>,
    %c0_57 = arith.constant 0 : index
    %c0_58 = arith.constant 0 : index
    %34 = vector.load %arg5[%c0_57, %c0_58] : memref<64x576xf32, #tpu.memory_space<vmem>>, vector<64x576xf32>
    %c0_59 = arith.constant 0 : index
    %c0_60 = arith.constant 0 : index
    %c0_61 = arith.constant 0 : index
    %35 = vector.load %arg13[%c0_59, %c0_60, %c0_61] : memref<18x18x64xf32, #tpu.memory_space<vmem>>, vector<16x16x64xf32>
    %c0_62 = arith.constant 0 : index
    %c1_63 = arith.constant 1 : index
    %c0_64 = arith.constant 0 : index
    %36 = vector.load %arg13[%c0_62, %c1_63, %c0_64] : memref<18x18x64xf32, #tpu.memory_space<vmem>>, vector<16x16x64xf32>
    %c0_65 = arith.constant 0 : index
    %c2_66 = arith.constant 2 : index
    %c0_67 = arith.constant 0 : index
    %37 = vector.load %arg13[%c0_65, %c2_66, %c0_67] : memref<18x18x64xf32, #tpu.memory_space<vmem>>, vector<16x16x64xf32>
    %c1_68 = arith.constant 1 : index
    %c0_69 = arith.constant 0 : index
    %c0_70 = arith.constant 0 : index
    %38 = vector.load %arg13[%c1_68, %c0_69, %c0_70] : memref<18x18x64xf32, #tpu.memory_space<vmem>>, vector<16x16x64xf32>
    %c1_71 = arith.constant 1 : index
    %c1_72 = arith.constant 1 : index
    %c0_73 = arith.constant 0 : index
    %39 = vector.load %arg13[%c1_71, %c1_72, %c0_73] : memref<18x18x64xf32, #tpu.memory_space<vmem>>, vector<16x16x64xf32>
    %c1_74 = arith.constant 1 : index
    %c2_75 = arith.constant 2 : index
    %c0_76 = arith.constant 0 : index
    %40 = vector.load %arg13[%c1_74, %c2_75, %c0_76] : memref<18x18x64xf32, #tpu.memory_space<vmem>>, vector<16x16x64xf32>
    %c2_77 = arith.constant 2 : index
    %c0_78 = arith.constant 0 : index
    %c0_79 = arith.constant 0 : index
    %41 = vector.load %arg13[%c2_77, %c0_78, %c0_79] : memref<18x18x64xf32, #tpu.memory_space<vmem>>, vector<16x16x64xf32>
    %c2_80 = arith.constant 2 : index
    %c1_81 = arith.constant 1 : index
    %c0_82 = arith.constant 0 : index
    %42 = vector.load %arg13[%c2_80, %c1_81, %c0_82] : memref<18x18x64xf32, #tpu.memory_space<vmem>>, vector<16x16x64xf32>
    %c2_83 = arith.constant 2 : index
    %c2_84 = arith.constant 2 : index
    %c0_85 = arith.constant 0 : index
    %43 = vector.load %arg13[%c2_83, %c2_84, %c0_85] : memref<18x18x64xf32, #tpu.memory_space<vmem>>, vector<16x16x64xf32>
    %44 = tpu.concatenate %35, %36, %37, %38, %39, %40, %41, %42, %43 in 2 : vector<16x16x64xf32>, vector<16x16x64xf32>, vector<16x16x64xf32>, vector<16x16x64xf32>, vector<16x16x64xf32>, vector<16x16x64xf32>, vector<16x16x64xf32>, vector<16x16x64xf32>, vector<16x16x64xf32> -> vector<16x16x576xf32>
    %45 = vector.shape_cast %44 : vector<16x16x576xf32> to vector<256x576xf32>
    %cst_86 = arith.constant dense<0.000000e+00> : vector<64x256xf32>
    %46 = tpu.matmul %34, %45, %cst_86 {dimension_numbers = #tpu.dot_dimension_numbers<[1], [1], [0], [0], [0, 0, 1, 0], [], []>} : vector<64x576xf32>, vector<256x576xf32>, vector<64x256xf32> -> vector<64x256xf32>
    %47 = vector.broadcast %7 : vector<64x1xf32> to vector<64x256xf32>
    %48 = arith.addf %46, %47 : vector<64x256xf32>
    %c0_87 = arith.constant 0 : index
    %c0_88 = arith.constant 0 : index
    %49 = vector.load %arg15[%c0_87, %c0_88] : memref<64x1xf32, #tpu.memory_space<vmem>>, vector<64x1xf32>
    %cst_89 = arith.constant dense<0.000000e+00> : vector<64xf32>
    %50 = vector.multi_reduction <add>, %48, %cst_89 [1] : vector<64x256xf32> to vector<64xf32>
    %51 = vector.shape_cast %50 : vector<64xf32> to vector<64x1xf32>
    %52 = arith.addf %49, %51 : vector<64x1xf32>
    %c0_90 = arith.constant 0 : index
    %c0_91 = arith.constant 0 : index
    %53 = vector.load %arg15[%c0_90, %c0_91] : memref<64x1xf32, #tpu.memory_space<vmem>>, vector<64x1xf32>
    tpu.vector_store %arg15[%c0_90, %c0_91], %52 {strides = array<i32>} : memref<64x1xf32, #tpu.memory_space<vmem>>, vector<64x1xf32>,
    %c0_92 = arith.constant 0 : index
    %c0_93 = arith.constant 0 : index
    %54 = vector.load %arg14[%c0_92, %c0_93] : memref<64x256xf32, #tpu.memory_space<vmem>>, vector<64x256xf32>
    tpu.vector_store %arg14[%c0_92, %c0_93], %48 {strides = array<i32>} : memref<64x256xf32, #tpu.memory_space<vmem>>, vector<64x256xf32>,
    %c0_94 = arith.constant 0 : index
    %c0_95 = arith.constant 0 : index
    %55 = vector.load %arg15[%c0_94, %c0_95] : memref<64x1xf32, #tpu.memory_space<vmem>>, vector<64x1xf32>
    %cst_96 = arith.constant 3.906250e-03 : f32
    %56 = vector.broadcast %cst_96 : f32 to vector<64x1xf32>
    %57 = arith.mulf %55, %56 : vector<64x1xf32>
    %c0_97 = arith.constant 0 : index
    %c0_98 = arith.constant 0 : index
    %58 = vector.load %arg7[%c0_97, %c0_98] : memref<64x4xf32, #tpu.memory_space<vmem>>, vector<64x4xf32>
    %59 = vector.broadcast %57 : vector<64x1xf32> to vector<64x4xf32>
    %60 = arith.mulf %58, %59 : vector<64x4xf32>
    %cst_99 = arith.constant dense<0.000000e+00> : vector<4xf32>
    %61 = vector.multi_reduction <add>, %60, %cst_99 [0] : vector<64x4xf32> to vector<4xf32>
    %62 = vector.shape_cast %61 : vector<4xf32> to vector<1x4xf32>
    %c0_100 = arith.constant 0 : index
    %c0_101 = arith.constant 0 : index
    %63 = vector.load %arg8[%c0_100, %c0_101] : memref<1x4xf32, #tpu.memory_space<vmem>>, vector<1x4xf32>
    %64 = arith.addf %62, %63 : vector<1x4xf32>
    %cst_102 = arith.constant 0.000000e+00 : f32
    %65 = vector.broadcast %cst_102 : f32 to vector<1x4xf32>
    %66 = arith.maximumf %64, %65 : vector<1x4xf32>
    %c0_103 = arith.constant 0 : index
    %c0_104 = arith.constant 0 : index
    %67 = vector.load %arg9[%c0_103, %c0_104] : memref<64x4xf32, #tpu.memory_space<vmem>>, vector<64x4xf32>
    %68 = vector.broadcast %66 : vector<1x4xf32> to vector<64x4xf32>
    %69 = arith.mulf %67, %68 : vector<64x4xf32>
    %cst_105 = arith.constant dense<0.000000e+00> : vector<64xf32>
    %70 = vector.multi_reduction <add>, %69, %cst_105 [1] : vector<64x4xf32> to vector<64xf32>
    %71 = vector.shape_cast %70 : vector<64xf32> to vector<64x1xf32>
    %c0_106 = arith.constant 0 : index
    %c0_107 = arith.constant 0 : index
    %72 = vector.load %arg10[%c0_106, %c0_107] : memref<64x1xf32, #tpu.memory_space<vmem>>, vector<64x1xf32>
    %73 = arith.addf %71, %72 : vector<64x1xf32>
    %74 = arith.negf %73 : vector<64x1xf32>
    %75 = math.exp %74 : vector<64x1xf32>
    %cst_108 = arith.constant 1.000000e+00 : f32
    %76 = vector.broadcast %cst_108 : f32 to vector<64x1xf32>
    %77 = arith.addf %76, %75 : vector<64x1xf32>
    %78 = arith.divf %76, %77 : vector<64x1xf32>
    %c0_109 = arith.constant 0 : index
    %c0_110 = arith.constant 0 : index
    %79 = vector.load %arg14[%c0_109, %c0_110] : memref<64x256xf32, #tpu.memory_space<vmem>>, vector<64x256xf32>
    %c0_111 = arith.constant 0 : index
    %c0_112 = arith.constant 0 : index
    %c0_113 = arith.constant 0 : index
    %80 = vector.load %arg2[%c0_111, %c0_112, %c0_113] : memref<1x64x256xf32, #tpu.memory_space<vmem>>, vector<1x64x256xf32>
    %81 = vector.shape_cast %80 : vector<1x64x256xf32> to vector<64x256xf32>
    %82 = vector.broadcast %78 : vector<64x1xf32> to vector<64x256xf32>
    %83 = arith.mulf %79, %82 : vector<64x256xf32>
    %84 = arith.addf %83, %81 : vector<64x256xf32>
    %c0_114 = arith.constant 0 : index
    %c0_115 = arith.constant 0 : index
    %c0_116 = arith.constant 0 : index
    %85 = vector.load %arg11[%c0_114, %c0_115, %c0_116] : memref<1x64x256xf32, #tpu.memory_space<vmem>>, vector<1x64x256xf32>
    %86 = vector.shape_cast %85 : vector<1x64x256xf32> to vector<64x256xf32>
    %87 = vector.shape_cast %84 : vector<64x256xf32> to vector<1x64x256xf32>
    tpu.vector_store %arg11[%c0_114, %c0_115, %c0_116], %87 {strides = array<i32>} : memref<1x64x256xf32, #tpu.memory_space<vmem>>, vector<1x64x256xf32>,
    return
  }
  func.func @transform_0(%arg0: i32) -> (i32, i32, i32, i32) {
    %c0_i32 = arith.constant 0 : i32
    %c0_i32_0 = arith.constant 0 : i32
    %c0_i32_1 = arith.constant 0 : i32
    %c0_i32_2 = arith.constant 0 : i32
    return %arg0, %c0_i32, %c0_i32_0, %c0_i32_1 : i32, i32, i32, i32
  }
  func.func @transform_1(%arg0: i32) -> (i32, i32, i32) {
    %c0_i32 = arith.constant 0 : i32
    %c0_i32_0 = arith.constant 0 : i32
    %c0_i32_1 = arith.constant 0 : i32
    return %arg0, %c0_i32, %c0_i32_0 : i32, i32, i32
  }
  func.func @transform_2(%arg0: i32) -> (i32, i32) {
    %c0_i32 = arith.constant 0 : i32
    %c0_i32_0 = arith.constant 0 : i32
    %c0_i32_1 = arith.constant 0 : i32
    return %c0_i32, %c0_i32_0 : i32, i32
  }
  func.func @transform_3(%arg0: i32) -> (i32, i32) {
    %c0_i32 = arith.constant 0 : i32
    %c0_i32_0 = arith.constant 0 : i32
    %c0_i32_1 = arith.constant 0 : i32
    return %c0_i32, %c0_i32_0 : i32, i32
  }
  func.func @transform_4(%arg0: i32) -> (i32, i32) {
    %c0_i32 = arith.constant 0 : i32
    %c0_i32_0 = arith.constant 0 : i32
    %c0_i32_1 = arith.constant 0 : i32
    return %c0_i32, %c0_i32_0 : i32, i32
  }
  func.func @transform_5(%arg0: i32) -> (i32, i32) {
    %c0_i32 = arith.constant 0 : i32
    %c0_i32_0 = arith.constant 0 : i32
    %c0_i32_1 = arith.constant 0 : i32
    return %c0_i32, %c0_i32_0 : i32, i32
  }
  func.func @transform_6(%arg0: i32) -> (i32, i32) {
    %c0_i32 = arith.constant 0 : i32
    %c0_i32_0 = arith.constant 0 : i32
    %c0_i32_1 = arith.constant 0 : i32
    return %c0_i32, %c0_i32_0 : i32, i32
  }
  func.func @transform_7(%arg0: i32) -> (i32, i32) {
    %c0_i32 = arith.constant 0 : i32
    %c0_i32_0 = arith.constant 0 : i32
    %c0_i32_1 = arith.constant 0 : i32
    return %c0_i32, %c0_i32_0 : i32, i32
  }
  func.func @transform_8(%arg0: i32) -> (i32, i32) {
    %c0_i32 = arith.constant 0 : i32
    %c0_i32_0 = arith.constant 0 : i32
    %c0_i32_1 = arith.constant 0 : i32
    return %c0_i32, %c0_i32_0 : i32, i32
  }
  func.func @transform_9(%arg0: i32) -> (i32, i32) {
    %c0_i32 = arith.constant 0 : i32
    %c0_i32_0 = arith.constant 0 : i32
    %c0_i32_1 = arith.constant 0 : i32
    return %c0_i32, %c0_i32_0 : i32, i32
  }
  func.func @transform_10(%arg0: i32) -> (i32, i32, i32) {
    %c0_i32 = arith.constant 0 : i32
    %c0_i32_0 = arith.constant 0 : i32
    %c0_i32_1 = arith.constant 0 : i32
    return %arg0, %c0_i32, %c0_i32_0 : i32, i32, i32
  }
}

</mosaic_0001>

<bundles_post_ra>
// kernel: rcab_forward.1
= control target key start
LH: loop header
LB: loop body
LE: loop exit
PB: predicated region body
PF: predicated region fallthrough
CT: control target
= control target key end

     0   :  { %s6051_s13 = smov 0   ;;  %s8407_s0 = inlined_call_operand.vmem [shape: f32[2,16,16,64], index: 0, kind: input, shape index: {}]   ;;  %s8408_s1 = inlined_call_operand.vmem [shape: f32[2,64,256], index: 1, kind: input, shape index: {}]   ;;  %s8409_s2 = inlined_call_operand.vmem [shape: f32[576,64], index: 2, kind: input, shape index: {}]   ;;  %s8410_s3 = inlined_call_operand.vmem [shape: f32[1,64], index: 3, kind: input, shape index: {}]   ;;  %s8411_s4 = inlined_call_operand.vmem [shape: f32[64,576], index: 4, kind: input, shape index: {}]   ;;  %s8412_s5 = inlined_call_operand.vmem [shape: f32[64,1], index: 5, kind: input, shape index: {}]   ;;  %s8413_s6 = inlined_call_operand.vmem [shape: f32[64,4], index: 6, kind: input, shape index: {}]   ;;  %s8414_s7 = inlined_call_operand.vmem [shape: f32[1,4], index: 7, kind: input, shape index: {}]   ;;  %s8415_s8 = inlined_call_operand.vmem [shape: f32[64,4], index: 8, kind: input, shape index: {}]   ;;  %s8416_s9 = inlined_call_operand.vmem [shape: f32[64,1], index: 9, kind: input, shape index: {}]   ;;  %s8417_s10 = inlined_call_operand.vmem [shape: f32[2,64,256], index: 10, kind: output, shape index: {}]  }
   0x1 LB: > { %s4599_s14 = sadd.s32 4294967295, %s5990_s13   ;;  %p4603_p0 = scmp.ge.s32.totalorder %s5990_s13, 1  ;;  %s5990_s13 = sphi %s6051_s13, %s20_s13  }
   0x2   : > { %p322_p1 = scmp.lt.s32.totalorder %s5990_s13, 3 }
   0x4   : > { %p323_p2 = pnand %p4603_p0, %p322_p1 }
   0x6   : > { %326 = sbr.rel (%p323_p2) target bundleno = 1807 (0x70f), region = 60 }
   0xd   : > { %p6059_p3 = scmp.lt.s32.totalorder %s4599_s14, 1  ;;  %vm380_vm0 = vcmask 523264   ;;  %vm383_vm1 = vcmask 517120   ;;  %v8418_v0 = vmov 0.0   ;;  %v1576_v1 = vld [vmem:[%s8409_s2] sm:$0xff]  ;;  %v1577_v2 = vld [vmem:[%s8409_s2 + $0x8] sm:$0xff] }
   0xe   : > { %381 = vst.msk [vmem:[#allocation2] sm:$0xff] %vm380_vm0, %v8418_v0  ;;  %382 = vst.msk [vmem:[#allocation2 + $0x8] sm:$0xff] %vm380_vm0, %v8418_v0  ;;  %v1578_v3 = vld [vmem:[%s8409_s2 + $0x10] sm:$0xff]  ;;  %v8420_v4 = vmov 0.0|0.0   ;;  %v4849_v5 = vpack.c.bf16 %v1577_v2, %v1576_v1  ;;  %v1579_v6 = vld [vmem:[%s8409_s2 + $0x18] sm:$0xff]  ;;  %vm469_vm2 = vcmask 1040384  }
   0xf   : > { %386 = vst.msk [vmem:[#allocation2 + $0x198] sm:$0xff] %vm380_vm0, %v8418_v0  ;;  %387 = vst.msk [vmem:[#allocation2 + $0x1a0] sm:$0xff] %vm380_vm0, %v8418_v0  ;;  %s8615_s14 = smov (!%p6059_p3, %s4599_s14), 1  ;;  %4848 = vmatprep.subr.bf16.mxu0 %v8420_v4  ;;  %v6107_v7 = vld [vmem:[%s8409_s2 + $0x20] sm:$0xff]  ;;  %v6112_v8 = vld [vmem:[%s8409_s2 + $0x28] sm:$0xff]  ;;  %v4852_v9 = vpack.c.bf16 %v1579_v6, %v1578_v3  ;;  %s5994_s26 = smov 64  }
  0x10   : > { %389 = vst.msk [vmem:[#allocation3] sm:$0xff] %vm380_vm0, %v8418_v0  ;;  %390 = vst.msk [vmem:[#allocation3 + $0x8] sm:$0xff] %vm380_vm0, %v8418_v0  ;;  %s4693_s28 = sshll.u32 %s8615_s14, 8  ;;  %4850 = vmatpush1.bf16.msra.mxu0 %v4849_v5  ;;  %v6118_v10 = vld [vmem:[%s8409_s2 + $0x30] sm:$0xff]  ;;  %v6123_v11 = vld [vmem:[%s8409_s2 + $0x38] sm:$0xff]  ;;  %v4855_v17 = vpack.c.bf16 %v6112_v8, %v6107_v7  ;;  %vm2666_vm4 = vcmask 7168  }
  0x11   : > { %393 = vst.msk [vmem:[#allocation3 + $0x198] sm:$0xff] %vm380_vm0, %v8418_v0  ;;  %394 = vst.msk [vmem:[#allocation3 + $0x1a0] sm:$0xff] %vm380_vm0, %v8418_v0  ;;  %s6128_s17 = scalar_lea.vmem %s8407_s0, %s4693_s28  ;;  %4851 = vmatprep.subr.bf16.mxu0 %v8420_v4  ;;  %v6134_v12 = vld [vmem:[%s8409_s2 + $0x40] sm:$0xff]  ;;  %v6139_v13 = vld [vmem:[%s8409_s2 + $0x48] sm:$0xff]  ;;  %v4858_v24 = vpack.c.bf16 %v6123_v11, %v6118_v10  ;;  %vm4279_vm5 = vcmask 31744  }
  0x12   : > { %384 = vst.msk [vmem:[#allocation2 + $0x10] sm:$0x3] %vm383_vm1, %v8418_v0  ;;  %388 = vst.msk [vmem:[#allocation2 + $0x1a8] sm:$0x3] %vm383_vm1, %v8418_v0  ;;  %v405_v14 = vld [vmem:[%s6128_s17] sm:$0xff]  ;;  %v406_v15 = vld [vmem:[%s6128_s17 + $0x8] sm:$0xff]  ;;  %v4861_v29 = vpack.c.bf16 %v6139_v13, %v6134_v12 }
  0x13   : > { %391 = vst.msk [vmem:[#allocation3 + $0x10] sm:$0x3] %vm383_vm1, %v8418_v0  ;;  %395 = vst.msk [vmem:[#allocation3 + $0x1a8] sm:$0x3] %vm383_vm1, %v8418_v0  ;;  %v407_v16 = vld [vmem:[%s6128_s17 + $0x10] sm:$0xff]  ;;  %v470_v18 = vrot.slane %v405_v14, 7 }
  0x14   : > { %v471_v19 = vrot.slane %v406_v15, 7  ;;  %v473_v20 = vrot.slane %v407_v16, 7  ;;  %v408_v21 = vld [vmem:[%s6128_s17 + $0x18] sm:$0xff]  ;;  %v409_v22 = vld [vmem:[%s6128_s17 + $0x20] sm:$0xff]  ;;  %v410_v23 = vld [vmem:[%s6128_s17 + $0x28] sm:$0xff]  ;;  %4853 = vmatpush1.bf16.msra.mxu0 %v4852_v9 }
  0x15   : > { %v474_v25 = vrot.slane %v408_v21, 7  ;;  %v476_v26 = vrot.slane %v409_v22, 7  ;;  %v477_v27 = vrot.slane %v410_v23, 7  ;;  %v411_v28 = vld [vmem:[%s6128_s17 + $0x30] sm:$0xff]  ;;  %v566_v30 = vsel %vm469_vm2, 0.0, %v470_v18  ;;  %v412_v34 = vld [vmem:[%s6128_s17 + $0x38] sm:$0xff]  ;;  %4854 = vmatprep.subr.bf16.mxu0 %v8420_v4  ;;  %vm7410_vm3 = vmpackc.low %vm380_vm0, %vm380_vm0 }
  0x16   : > { %v472_v31 = vsel %vm469_vm2, %v470_v18, %v471_v19  ;;  %v567_v32 = vsel %vm469_vm2, 0.0, %v473_v20  ;;  %v582_v33 = vsel %vm469_vm2, %v471_v19, 0.0  ;;  %v413_v35 = vld [vmem:[%s6128_s17 + $0x40] sm:$0xff]  ;;  %v414_v36 = vld [vmem:[%s6128_s17 + $0x48] sm:$0xff]  ;;  %599 = vst.msk [vmem:[#allocation2 + $0x18] sm:$0xff] %vm380_vm0, %v566_v30  ;;  %v415_v41 = vld [vmem:[%s6128_s17 + $0x50] sm:$0xff] }
  0x17   : > { %600 = vst.msk [vmem:[#allocation2 + $0x20] sm:$0xff] %vm380_vm0, %v472_v31  ;;  %602 = vst.msk [vmem:[#allocation2 + $0x30] sm:$0xff] %vm380_vm0, %v567_v32  ;;  %v475_v37 = vsel %vm469_vm2, %v473_v20, %v474_v25  ;;  %v568_v38 = vsel %vm469_vm2, 0.0, %v476_v26  ;;  %v478_v39 = vsel %vm469_vm2, %v476_v26, %v477_v27  ;;  %v583_v40 = vsel %vm469_vm2, %v474_v25, 0.0  ;;  %v416_v42 = vld [vmem:[%s6128_s17 + $0x58] sm:$0xff]  ;;  %v417_v43 = vld [vmem:[%s6128_s17 + $0x60] sm:$0xff] }
  0x18   : > { %601 = vst.msk [vmem:[#allocation2 + $0x28] sm:$0x3] %vm383_vm1, %v582_v33  ;;  %604 = vst.msk [vmem:[#allocation2 + $0x40] sm:$0x3] %vm383_vm1, %v583_v40  ;;  %v479_v44 = vrot.slane %v411_v28, 7  ;;  %v480_v45 = vrot.slane %v412_v34, 7  ;;  %4856 = vmatpush1.bf16.msra.mxu0 %v4855_v17 }
  0x19   : > { %603 = vst.msk [vmem:[#allocation2 + $0x38] sm:$0xff] %vm380_vm0, %v475_v37  ;;  %605 = vst.msk [vmem:[#allocation2 + $0x48] sm:$0xff] %vm380_vm0, %v568_v38  ;;  %v584_v46 = vsel %vm469_vm2, %v477_v27, 0.0  ;;  %v482_v47 = vrot.slane %v413_v35, 7  ;;  %v418_v48 = vld [vmem:[%s6128_s17 + $0x68] sm:$0xff]  ;;  %v483_v49 = vrot.slane %v414_v36, 7  ;;  %4857 = vmatprep.subr.bf16.mxu0 %v8420_v4 }
  0x1a   : > { %606 = vst.msk [vmem:[#allocation2 + $0x50] sm:$0xff] %vm380_vm0, %v478_v39  ;;  %v485_v50 = vrot.slane %v415_v41, 7  ;;  %v486_v51 = vrot.slane %v416_v42, 7  ;;  %v488_v52 = vrot.slane %v417_v43, 7  ;;  %v419_v53 = vld [vmem:[%s6128_s17 + $0x70] sm:$0xff]  ;;  %v420_v54 = vld [vmem:[%s6128_s17 + $0x78] sm:$0xff]  ;;  %v481_v56 = vsel %vm469_vm2, %v479_v44, %v480_v45 }
  0x1b   : > { %607 = vst.msk [vmem:[#allocation2 + $0x58] sm:$0x3] %vm383_vm1, %v584_v46  ;;  %v569_v55 = vsel %vm469_vm2, 0.0, %v479_v44  ;;  %v570_v57 = vsel %vm469_vm2, 0.0, %v482_v47  ;;  %v585_v58 = vsel %vm469_vm2, %v480_v45, 0.0  ;;  %v421_v59 = vld [vmem:[%s6128_s17 + $0x80] sm:$0xff]  ;;  %v484_v62 = vsel %vm469_vm2, %v482_v47, %v483_v49 }
  0x1c   : > { %v6189_v60 = vld [vmem:[%s6128_s17 + $0x88] sm:$0xff]  ;;  %v6192_v61 = vld [vmem:[%s6128_s17 + $0x90] sm:$0xff]  ;;  %608 = vst.msk [vmem:[#allocation2 + $0x60] sm:$0xff] %vm380_vm0, %v569_v55  ;;  %609 = vst.msk [vmem:[#allocation2 + $0x68] sm:$0xff] %vm380_vm0, %v481_v56  ;;  %v571_v63 = vsel %vm469_vm2, 0.0, %v485_v50  ;;  %v487_v1 = vsel %vm469_vm2, %v485_v50, %v486_v51  ;;  %v586_v2 = vsel %vm469_vm2, %v483_v49, 0.0  ;;  %4859 = vmatpush1.bf16.msra.mxu0 %v4858_v24 }
  0x1d   : > { %611 = vst.msk [vmem:[#allocation2 + $0x78] sm:$0xff] %vm380_vm0, %v570_v57  ;;  %v6205_v3 = vld [vmem:[%s8409_s2 + $0x50] sm:$0xff]  ;;  %v6210_v5 = vld [vmem:[%s8409_s2 + $0x58] sm:$0xff]  ;;  %v679_v7 = vld [vmem:[#allocation2 + $0x1] sm:$0xff]  ;;  %v572_v9 = vsel %vm469_vm2, 0.0, %v488_v52  ;;  %v489_v14 = vrot.slane %v418_v48, 7  ;;  %4860 = vmatprep.subr.bf16.mxu0 %v8420_v4 }
  0x1e   : > { %610 = vst.msk [vmem:[#allocation2 + $0x70] sm:$0x3] %vm383_vm1, %v585_v58  ;;  %v6213_v6 = vld [vmem:[%s6128_s17 + $0x98] sm:$0xff]  ;;  %v6215_v8 = vld [vmem:[#allocation2 + $0x9] sm:$0xff]  ;;  %613 = vst.msk [vmem:[#allocation2 + $0x88] sm:$0x3] %vm383_vm1, %v586_v2  ;;  %v4864_v38 = vpack.c.bf16 %v6210_v5, %v6205_v3 }
  0x1f   : > { %612 = vst.msk [vmem:[#allocation2 + $0x80] sm:$0xff] %vm380_vm0, %v484_v62  ;;  %614 = vst.msk [vmem:[#allocation2 + $0x90] sm:$0xff] %vm380_vm0, %v571_v63  ;;  %v587_v15 = vsel %vm469_vm2, %v486_v51, 0.0  ;;  %v491_v16 = vrot.slane %v419_v53, 7  ;;  %v492_v17 = vrot.slane %v420_v54, 7  ;;  %v494_v18 = vrot.slane %v421_v59, 7 }
  0x20   : > { %615 = vst.msk [vmem:[#allocation2 + $0x98] sm:$0xff] %vm380_vm0, %v487_v1  ;;  %617 = vst.msk [vmem:[#allocation2 + $0xa8] sm:$0xff] %vm380_vm0, %v572_v9  ;;  %v495_v19 = vrot.slane %v6189_v60, 7  ;;  %v497_v20 = vrot.slane %v6192_v61, 7  ;;  %v425_v21 = vld [vmem:[%s6128_s17 + $0xa0] sm:$0xff]  ;;  %v426_v22 = vld [vmem:[%s6128_s17 + $0xa8] sm:$0xff]  ;;  %v490_v27 = vsel %vm469_vm2, %v488_v52, %v489_v14  ;;  %4862 = vmatpush1.bf16.msra.mxu0 %v4861_v29 }
  0x21   : > { %616 = vst.msk [vmem:[#allocation2 + $0xa0] sm:$0x3] %vm383_vm1, %v587_v15  ;;  %v6232_v23 = vld [vmem:[#allocation2 + $0x18] sm:$0xff]  ;;  %v6234_v25 = vld [vmem:[#allocation2 + $0x20] sm:$0xff]  ;;  %v573_v28 = vsel %vm469_vm2, 0.0, %v491_v16  ;;  %v588_v30 = vsel %vm469_vm2, %v489_v14, 0.0  ;;  %v493_v33 = vsel %vm469_vm2, %v491_v16, %v492_v17  ;;  %4863 = vmatprep.subr.bf16.mxu0 %v8420_v4 }
  0x22   : > { %v681_v26 = vld [vmem:[#allocation2 + $0x19] sm:$0xff]  ;;  %v498_v10 = vrot.slane %v6213_v6, 7  ;;  %v5308_v11 = vpack.i.bf16 %v679_v7, %v6232_v23  ;;  %v6242_v24 = vld [vmem:[#allocation2 + $0x30] sm:$0xff]  ;;  %v682_v31 = vld [vmem:[#allocation2 + $0x21] sm:$0xff]  ;;  %618 = vst.msk [vmem:[#allocation2 + $0xb0] sm:$0xff] %vm380_vm0, %v490_v27  ;;  %v574_v34 = vsel %vm469_vm2, 0.0, %v494_v18  ;;  %v496_v36 = vsel %vm469_vm2, %v494_v18, %v495_v19 }
  0x23   : > { %v6244_v32 = vld [vmem:[#allocation2 + $0x38] sm:$0xff]  ;;  %620 = vst.msk [vmem:[#allocation2 + $0xc0] sm:$0xff] %vm380_vm0, %v573_v28  ;;  %v5318_v35 = vpack.i.bf16 %v681_v26, %v6242_v24  ;;  %621 = vst.msk [vmem:[#allocation2 + $0xc8] sm:$0xff] %vm380_vm0, %v493_v33  ;;  %v589_v37 = vsel %vm469_vm2, %v492_v17, 0.0  ;;  %v5313_v39 = vpack.i.bf16 %v6215_v8, %v6234_v25  ;;  %v575_v40 = vsel %vm469_vm2, 0.0, %v497_v20  ;;  %v1588_v43 = vld [vmem:[%s8409_s2 + $0x60] sm:$0xff] }
  0x24   : > { %619 = vst.msk [vmem:[#allocation2 + $0xb8] sm:$0x3] %vm383_vm1, %v588_v30  ;;  %5309 = vrot.lane.b32.xlu0 %v5308_v11, %s5994_s26  ;;  %622 = vst.msk [vmem:[#allocation2 + $0xd0] sm:$0x3] %vm383_vm1, %v589_v37  ;;  %v499_v41 = vsel %vm469_vm2, %v497_v20, %v498_v10  ;;  %v590_v42 = vsel %vm469_vm2, %v495_v19, 0.0  ;;  %v1589_v44 = vld [vmem:[%s8409_s2 + $0x68] sm:$0xff]  ;;  %v5323_v12 = vpack.i.bf16 %v682_v31, %v6244_v32  ;;  %4865 = vmatpush1.bf16.msra.mxu0 %v4864_v38 }
  0x25   : > { %623 = vst.msk [vmem:[#allocation2 + $0xd8] sm:$0xff] %vm380_vm0, %v574_v34  ;;  %624 = vst.msk [vmem:[#allocation2 + $0xe0] sm:$0xff] %vm380_vm0, %v496_v36  ;;  %5319 = vrot.lane.b32.xlu1 %v5318_v35, %s5994_s26  ;;  %v6277_v13 = vld [vmem:[#allocation2 + $0x31] sm:$0xff]  ;;  %v6279_v29 = vld [vmem:[#allocation2 + $0x48] sm:$0xff]  ;;  %v500_v45 = vrot.slane %v425_v21, 7  ;;  %v501_v46 = vrot.slane %v426_v22, 7  ;;  %v4867_v54 = vpack.c.bf16 %v1589_v44, %v1588_v43  ;;  %4866 = vmatprep.subr.bf16.mxu0 %v8420_v4 }
  0x26   : > { %626 = vst.msk [vmem:[#allocation2 + $0xf0] sm:$0xff] %vm380_vm0, %v575_v40  ;;  %627 = vst.msk [vmem:[#allocation2 + $0xf8] sm:$0xff] %vm380_vm0, %v499_v41  ;;  %v427_v47 = vld [vmem:[%s6128_s17 + $0xb0] sm:$0xff]  ;;  %v6286_v48 = vld [vmem:[#allocation2 + $0x39] sm:$0xff]  ;;  %v591_v50 = vsel %vm469_vm2, %v498_v10, 0.0  ;;  %v5328_v53 = vpack.i.bf16 %v6277_v13, %v6279_v29 }
  0x27   : > { %625 = vst.msk [vmem:[#allocation2 + $0xe8] sm:$0x3] %vm383_vm1, %v590_v42  ;;  %v6288_v49 = vld [vmem:[#allocation2 + $0x50] sm:$0xff]  ;;  %v576_v51 = vsel %vm469_vm2, 0.0, %v500_v45  ;;  %v502_v52 = vsel %vm469_vm2, %v500_v45, %v501_v46  ;;  %628 = vst.msk [vmem:[#allocation2 + $0x100] sm:$0x3] %vm383_vm1, %v591_v50 }
  0x28   : > { %5314 = vrot.lane.b32.xlu0 %v5313_v39, %s5994_s26  ;;  %629 = vst.msk [vmem:[#allocation2 + $0x108] sm:$0xff] %vm380_vm0, %v576_v51  ;;  %v1590_v55 = vld [vmem:[%s8409_s2 + $0x70] sm:$0xff]  ;;  %630 = vst.msk [vmem:[#allocation2 + $0x110] sm:$0xff] %vm380_vm0, %v502_v52  ;;  %v503_v56 = vrot.slane %v427_v47, 7  ;;  %v592_v57 = vsel %vm469_vm2, %v501_v46, 0.0  ;;  %v5333_v58 = vpack.i.bf16 %v6286_v48, %v6288_v49  ;;  %v6308_v60 = vld [vmem:[#allocation2 + $0x60] sm:$0xff]  ;;  %4868 = vmatpush1.bf16.msra.mxu0 %v4867_v54 }
  0x29   : > { %5324 = vrot.lane.b32.xlu1 %v5323_v12, %s5994_s26  ;;  %v6306_v59 = vld [vmem:[#allocation2 + $0x49] sm:$0xff]  ;;  %v1591_v61 = vld [vmem:[%s8409_s2 + $0x78] sm:$0xff]  ;;  %631 = vst.msk [vmem:[#allocation2 + $0x118] sm:$0x3] %vm383_vm1, %v592_v57  ;;  %v1592_v5 = vld [vmem:[%s8409_s2 + $0x80] sm:$0xff]  ;;  %4869 = vmatprep.subr.bf16.mxu0 %v8420_v4 }
  0x2a   : > { %v6315_v62 = vld [vmem:[#allocation2 + $0x51] sm:$0xff]  ;;  %v6317_v63 = vld [vmem:[#allocation2 + $0x68] sm:$0xff]  ;;  %v577_v1 = vsel %vm469_vm2, 0.0, %v503_v56  ;;  %v5338_v2 = vpack.i.bf16 %v6306_v59, %v6308_v60  ;;  %v4870_v3 = vpack.c.bf16 %v1591_v61, %v1590_v55  ;;  %v6340_v15 = vld [vmem:[#allocation2 + $0x80] sm:$0xff] }
  0x2b   : > { %632 = vst.msk [vmem:[#allocation2 + $0x120] sm:$0xff] %vm380_vm0, %v577_v1  ;;  %v5343_v6 = vpack.i.bf16 %v6315_v62, %v6317_v63  ;;  %v6330_v7 = vld [vmem:[#allocation2 + $0x61] sm:$0xff]  ;;  %v6332_v8 = vld [vmem:[#allocation2 + $0x78] sm:$0xff]  ;;  %v6338_v14 = vld [vmem:[#allocation2 + $0x69] sm:$0xff] }
  0x2c   : > { %5329 = vrot.lane.b32.xlu0 %v5328_v53, %s5994_s26  ;;  %v1593_v9 = vld [vmem:[%s8409_s2 + $0x88] sm:$0xff]  ;;  %v428_v16 = vld [vmem:[%s6128_s17 + $0xb8] sm:$0xff]  ;;  %v5348_v18 = vpack.i.bf16 %v6330_v7, %v6332_v8  ;;  %4871 = vmatpush1.bf16.msra.mxu0 %v4870_v3  ;;  %v1594_v21 = vld [vmem:[%s8409_s2 + $0x90] sm:$0xff]  ;;  %v5353_v22 = vpack.i.bf16 %v6338_v14, %v6340_v15 }
  0x2d   : > { %5334 = vrot.lane.b32.xlu1 %v5333_v58, %s5994_s26  ;;  %v504_v17 = vrot.slane %v428_v16, 7  ;;  %v6346_v19 = vld [vmem:[#allocation2 + $0x79] sm:$0xff]  ;;  %v4873_v20 = vpack.c.bf16 %v1593_v9, %v1592_v5  ;;  %v6354_v26 = vld [vmem:[#allocation2 + $0x90] sm:$0xff]  ;;  %4872 = vmatprep.subr.bf16.mxu0 %v8420_v4  ;;  %v6363_v11 = vld [vmem:[#allocation2 + $0x81] sm:$0xff] }
  0x2e   : > { %v1595_v27 = vld [vmem:[%s8409_s2 + $0x98] sm:$0xff]  ;;  %v429_v30 = vld [vmem:[%s6128_s17 + $0xc0] sm:$0xff]  ;;  %v430_v34 = vld [vmem:[%s6128_s17 + $0xc8] sm:$0xff]  ;;  %v5358_v37 = vpack.i.bf16 %v6346_v19, %v6354_v26 }
  0x2f   : > { %v505_v28 = vsel %vm469_vm2, %v503_v56, %v504_v17  ;;  %v593_v10 = vsel %vm469_vm2, %v504_v17, 0.0  ;;  %v6365_v31 = vld [vmem:[#allocation2 + $0x98] sm:$0xff]  ;;  %v506_v33 = vrot.slane %v429_v30, 7  ;;  %v507_v35 = vrot.slane %v430_v34, 7  ;;  %v431_v36 = vld [vmem:[%s6128_s17 + $0xd0] sm:$0xff]  ;;  %v6376_v39 = vld [vmem:[#allocation2 + $0xa8] sm:$0xff] }
  0x30   : > { %5339 = vrot.lane.b32.xlu0 %v5338_v2, %s5994_s26  ;;  %633 = vst.msk [vmem:[#allocation2 + $0x128] sm:$0xff] %vm380_vm0, %v505_v28  ;;  %v6374_v38 = vld [vmem:[#allocation2 + $0x91] sm:$0xff]  ;;  %8490 = vst [vmem:[#allocation6_spill] sm:$0xff] %v6376_v39  ;;  %4874 = vmatpush1.bf16.msra.mxu0 %v4873_v20  ;;  %v4876_v40 = vpack.c.bf16 %v1595_v27, %v1594_v21  ;;  %v509_v42 = vrot.slane %v431_v36, 7  ;;  %v5363_v44 = vpack.i.bf16 %v6363_v11, %v6365_v31  ;;  %v1596_v12 = vld [vmem:[%s8409_s2 + $0xa0] sm:$0xff] }
  0x31   : > { %5344 = vrot.lane.b32.xlu1 %v5343_v6, %s5994_s26  ;;  %634 = vst.msk [vmem:[#allocation2 + $0x130] sm:$0x3] %vm383_vm1, %v593_v10  ;;  %v578_v41 = vsel %vm469_vm2, 0.0, %v506_v33  ;;  %v432_v43 = vld [vmem:[%s6128_s17 + $0xd8] sm:$0xff]  ;;  %4875 = vmatprep.subr.bf16.mxu0 %v8420_v4  ;;  %v1597_v45 = vld [vmem:[%s8409_s2 + $0xa8] sm:$0xff]  ;;  %v508_v46 = vsel %vm469_vm2, %v506_v33, %v507_v35  ;;  %v594_v50 = vsel %vm469_vm2, %v507_v35, 0.0  ;;  %v5368_v1 = vpack.i.bf16 %v6374_v38, %v6376_v39 }
  0x32   : > { %635 = vst.msk [vmem:[#allocation2 + $0x138] sm:$0xff] %vm380_vm0, %v578_v41  ;;  %v510_v47 = vrot.slane %v432_v43, 7  ;;  %v433_v51 = vld [vmem:[%s6128_s17 + $0xe0] sm:$0xff]  ;;  %v6396_v53 = vld [vmem:[#allocation2 + $0xb0] sm:$0xff]  ;;  %636 = vst.msk [vmem:[#allocation2 + $0x140] sm:$0xff] %vm380_vm0, %v508_v46  ;;  %v579_v54 = vsel %vm469_vm2, 0.0, %v509_v42  ;;  %v4879_v3 = vpack.c.bf16 %v1597_v45, %v1596_v12 }
  0x33   : > { %v6394_v52 = vld [vmem:[#allocation2 + $0x99] sm:$0xff]  ;;  %8491 = vst [vmem:[#allocation7_spill] sm:$0xff] %v6396_v53  ;;  %637 = vst.msk [vmem:[#allocation2 + $0x148] sm:$0x3] %vm383_vm1, %v594_v50  ;;  %v512_v55 = vrot.slane %v433_v51, 7  ;;  %v434_v56 = vld [vmem:[%s6128_s17 + $0xe8] sm:$0xff] }
  0x34   : > { %5349 = vrot.lane.b32.xlu0 %v5348_v18, %s5994_s26  ;;  %638 = vst.msk [vmem:[#allocation2 + $0x150] sm:$0xff] %vm380_vm0, %v579_v54  ;;  %v511_v57 = vsel %vm469_vm2, %v509_v42, %v510_v47  ;;  %v513_v58 = vrot.slane %v434_v56, 7  ;;  %v595_v61 = vsel %vm469_vm2, %v510_v47, 0.0  ;;  %v6408_v2 = vld [vmem:[#allocation2 + $0xa9] sm:$0xff]  ;;  %4877 = vmatpush1.bf16.msra.mxu0 %v4876_v40  ;;  %v5373_v9 = vpack.i.bf16 %v6394_v52, %v6396_v53  ;;  %v6417_v16 = vld [vmem:[#allocation2 + $0xc0] sm:$0xff]  ;;  %v1599_v18 = vld [vmem:[%s8409_s2 + $0xb8] sm:$0xff] }
  0x35   : > { %5354 = vrot.lane.b32.xlu1 %v5353_v22, %s5994_s26  ;;  %639 = vst.msk [vmem:[#allocation2 + $0x158] sm:$0xff] %vm380_vm0, %v511_v57  ;;  %v580_v5 = vsel %vm469_vm2, 0.0, %v512_v55  ;;  %v435_v6 = vld [vmem:[%s6128_s17 + $0xf0] sm:$0xff]  ;;  %8492 = vst [vmem:[#allocation8_spill] sm:$0xff] %v6417_v16  ;;  %4878 = vmatprep.subr.bf16.mxu0 %v8420_v4  ;;  %v6431_v28 = vld [vmem:[#allocation2 + $0xc8] sm:$0xff]  ;;  %v5378_v34 = vpack.i.bf16 %v6408_v2, %v6417_v16 }
  0x36   : > { %640 = vst.msk [vmem:[#allocation2 + $0x160] sm:$0x3] %vm383_vm1, %v595_v61  ;;  %v1598_v17 = vld [vmem:[%s8409_s2 + $0xb0] sm:$0xff]  ;;  %v514_v20 = vsel %vm469_vm2, %v512_v55, %v513_v58  ;;  %v515_v21 = vrot.slane %v435_v6, 7  ;;  %v596_v22 = vsel %vm469_vm2, %v513_v58, 0.0  ;;  %8493 = vst [vmem:[#allocation9_spill] sm:$0xff] %v6431_v28 }
  0x37   : > { %641 = vst.msk [vmem:[#allocation2 + $0x168] sm:$0xff] %vm380_vm0, %v580_v5  ;;  %v6429_v27 = vld [vmem:[#allocation2 + $0xb1] sm:$0xff]  ;;  %642 = vst.msk [vmem:[#allocation2 + $0x170] sm:$0xff] %vm380_vm0, %v514_v20  ;;  %v6443_v35 = vld [vmem:[#allocation2 + $0xc1] sm:$0xff] }
  0x38   : > { %5359 = vrot.lane.b32.xlu0 %v5358_v37, %s5994_s26  ;;  %v6435_v30 = vld [vmem:[%s6128_s17 + $0xf8] sm:$0xff]  ;;  %643 = vst.msk [vmem:[#allocation2 + $0x178] sm:$0x3] %vm383_vm1, %v596_v22  ;;  %v581_v10 = vsel %vm469_vm2, 0.0, %v515_v21  ;;  %4880 = vmatpush1.bf16.msra.mxu0 %v4879_v3  ;;  %v4882_v37 = vpack.c.bf16 %v1599_v18, %v1598_v17  ;;  %v5383_v40 = vpack.i.bf16 %v6429_v27, %v6431_v28  ;;  %v1600_v41 = vld [vmem:[%s8409_s2 + $0xc0] sm:$0xff]  ;;  %v1601_v42 = vld [vmem:[%s8409_s2 + $0xc8] sm:$0xff] }
  0x39   : > { %5364 = vrot.lane.b32.xlu1 %v5363_v44, %s5994_s26  ;;  %v8422_v33 = vrot.slane %v6435_v30, 7  ;;  %v6445_v36 = vld [vmem:[#allocation2 + $0xd8] sm:$0xff]  ;;  %644 = vst.msk [vmem:[#allocation2 + $0x180] sm:$0xff] %vm380_vm0, %v581_v10  ;;  %4881 = vmatprep.subr.bf16.mxu0 %v8420_v4  ;;  %v6463_v12 = vld [vmem:[#allocation2 + $0xc9] sm:$0xff]  ;;  %v6465_v45 = vld [vmem:[#allocation2 + $0xe0] sm:$0xff]  ;;  %v4885_v50 = vpack.c.bf16 %v1601_v42, %v1600_v41 }
  0x3a   : > { %8494 = vst [vmem:[#allocation10_spill] sm:$0xff] %v6445_v36  ;;  %v6461_v44 = vld [vmem:[#allocation2 + $0x32] sm:$0xff]  ;;  %8495 = vst [vmem:[#allocation11_spill] sm:$0xff] %v6465_v45  ;;  %v5388_v46 = vpack.i.bf16 %v6443_v35, %v6445_v36  ;;  %v5393_v51 = vpack.i.bf16 %v6463_v12, %v6465_v45  ;;  %v6487_v57 = vld [vmem:[#allocation2 + $0xe1] sm:$0xff] }
  0x3b   : > { %v517_v43 = vsel %vm469_vm2, %v515_v21, %v8422_v33  ;;  %4800 = vmatprep.mubr.msk.f32.mxu1 %vm380_vm0, %v6461_v44  ;;  %v6473_v47 = vld [vmem:[#allocation2 + $0xd9] sm:$0xff]  ;;  %v6478_v54 = vld [vmem:[#allocation2 + $0xf0] sm:$0xff]  ;;  %v6499_v6 = vld [vmem:[#allocation2 + $0x108] sm:$0xff] }
  0x3c   : > { %5369 = vrot.lane.b32.xlu0 %v5368_v1, %s5994_s26  ;;  %645 = vst.msk [vmem:[#allocation2 + $0x188] sm:$0xff] %vm380_vm0, %v517_v43  ;;  %4883 = vmatpush1.bf16.msra.mxu0 %v4882_v37  ;;  %8496 = vst [vmem:[#allocation12_spill] sm:$0xff] %v6478_v54  ;;  %v1602_v55 = vld [vmem:[%s8409_s2 + $0xd0] sm:$0xff]  ;;  %v1603_v56 = vld [vmem:[%s8409_s2 + $0xd8] sm:$0xff]  ;;  %v5398_v61 = vpack.i.bf16 %v6473_v47, %v6478_v54 }
  0x3d   : > { %5374 = vrot.lane.b32.xlu1 %v5373_v9, %s5994_s26  ;;  %4884 = vmatprep.subr.bf16.mxu0 %v8420_v4  ;;  %v6489_v58 = vld [vmem:[#allocation2 + $0xf8] sm:$0xff]  ;;  %v4888_v3 = vpack.c.bf16 %v1603_v56, %v1602_v55  ;;  %8498 = vst [vmem:[#allocation14_spill] sm:$0xff] %v6499_v6  ;;  %v1604_v9 = vld [vmem:[%s8409_s2 + $0xe0] sm:$0xff]  ;;  %v1605_v17 = vld [vmem:[%s8409_s2 + $0xe8] sm:$0xff] }
  0x3e   : > { %8497 = vst [vmem:[#allocation13_spill] sm:$0xff] %v6489_v58  ;;  %v6494_v1 = vld [vmem:[#allocation2 + $0xf1] sm:$0xff]  ;;  %v5403_v5 = vpack.i.bf16 %v6487_v57, %v6489_v58  ;;  %v6508_v18 = vld [vmem:[#allocation2 + $0xf9] sm:$0xff]  ;;  %v6515_v22 = vld [vmem:[#allocation2 + $0x109] sm:$0xff]  ;;  %v4891_v10 = vpack.c.bf16 %v1605_v17, %v1604_v9 }
  0x3f   : > { %v6510_v20 = vld [vmem:[#allocation2 + $0x110] sm:$0xff]  ;;  %v5408_v21 = vpack.i.bf16 %v6494_v1, %v6499_v6  ;;  %v6520_v37 = vld [vmem:[#allocation2 + $0x120] sm:$0xff]  ;;  %v1607_v41 = vld [vmem:[%s8409_s2 + $0xf8] sm:$0xff] }
  0x40   : > { %5379 = vrot.lane.b32.xlu0 %v5378_v34, %s5994_s26  ;;  %4886 = vmatpush1.bf16.msra.mxu0 %v4885_v50  ;;  %8499 = vst [vmem:[#allocation15_spill] sm:$0xff] %v6510_v20  ;;  %v5413_v34 = vpack.i.bf16 %v6508_v18, %v6510_v20  ;;  %8500 = vst [vmem:[#allocation16_spill] sm:$0xff] %v6520_v37  ;;  %v6529_v42 = vld [vmem:[#allocation2 + $0x111] sm:$0xff]  ;;  %v6531_v43 = vld [vmem:[#allocation2 + $0x128] sm:$0xff] }
  0x41   : > { %5384 = vrot.lane.b32.xlu1 %v5383_v40, %s5994_s26  ;;  %4887 = vmatprep.subr.bf16.mxu0 %v8420_v4  ;;  %v1606_v40 = vld [vmem:[%s8409_s2 + $0xf0] sm:$0xff]  ;;  %8501 = vst [vmem:[#allocation17_spill] sm:$0xff] %v6531_v43  ;;  %v6539_v55 = vld [vmem:[#allocation2 + $0x121] sm:$0xff]  ;;  %v6541_v56 = vld [vmem:[#allocation2 + $0x138] sm:$0xff] }
  0x42   : > { %v4894_v50 = vpack.c.bf16 %v1607_v41, %v1606_v40  ;;  %8502 = vst [vmem:[#allocation18_spill] sm:$0xff] %v6541_v56  ;;  %v6554_v17 = vld [vmem:[#allocation2 + $0x139] sm:$0xff]  ;;  %v772_v0 = vld [vmem:[#allocation2 + $0x170] sm:$0xff] }
  0x43   : > { %v6577_v33 = vld [vmem:[#allocation2 + $0x169] sm:$0xff]  ;;  %v6759_v20 = vld [vmem:[#allocation2 + $0x172] sm:$0xff] }
  0x44   : > { %5389 = vrot.lane.b32.xlu0 %v5388_v46, %s5994_s26  ;;  %4889 = vmatpush1.bf16.msra.mxu0 %v4888_v3  ;;  %v5418_v46 = vpack.i.bf16 %v6515_v22, %v6520_v37  ;;  %v6546_v3 = vld [vmem:[#allocation2 + $0x140] sm:$0xff]  ;;  %v712_v53 = vld [vmem:[#allocation2 + $0xa] sm:$0xff] }
  0x45   : > { %5394 = vrot.lane.b32.xlu1 %v5393_v51, %s5994_s26  ;;  %4890 = vmatprep.subr.bf16.mxu0 %v8420_v4  ;;  %v5423_v51 = vpack.i.bf16 %v6529_v42, %v6531_v43  ;;  %8503 = vst [vmem:[#allocation19_spill] sm:$0xff] %v6546_v3  ;;  %v6729_v43 = vld [vmem:[#allocation2 + $0x152] sm:$0xff] }
  0x48   : > { %5399 = vrot.lane.b32.xlu0 %v5398_v61, %s5994_s26  ;;  %4892 = vmatpush1.bf16.msra.mxu0 %v4891_v10  ;;  %v6544_v61 = vld [vmem:[#allocation2 + $0x129] sm:$0xff]  ;;  %v6559_v10 = vld [vmem:[#allocation2 + $0x141] sm:$0xff] }
  0x49   : > { %5404 = vrot.lane.b32.xlu1 %v5403_v5, %s5994_s26  ;;  %4893 = vmatprep.subr.bf16.mxu0 %v8420_v4  ;;  %v5428_v5 = vpack.i.bf16 %v6539_v55, %v6541_v56  ;;  %v5433_v9 = vpack.i.bf16 %v6544_v61, %v6546_v3  ;;  %v6585_v56 = vld [vmem:[#allocation2 + $0x1a] sm:$0xff] }
  0x4c   : > { %5409 = vrot.lane.b32.xlu0 %v5408_v21, %s5994_s26  ;;  %4895 = vmatpush1.bf16.msra.mxu0 %v4894_v50  ;;  %v6556_v21 = vld [vmem:[#allocation2 + $0x150] sm:$0xff]  ;;  %v771_v50 = vld [vmem:[#allocation2 + $0x168] sm:$0xff] }
  0x4d   : > { %5414 = vrot.lane.b32.xlu1 %v5413_v34, %s5994_s26  ;;  %8504 = vst [vmem:[#allocation20_spill] sm:$0xff] %v6556_v21  ;;  %4896 = vmatprep.subr.bf16.mxu0 %v8420_v4  ;;  %v6561_v34 = vld [vmem:[#allocation2 + $0x158] sm:$0xff]  ;;  %v5438_v40 = vpack.i.bf16 %v6554_v17, %v6556_v21 }
  0x4e   : > { %8505 = vst [vmem:[#allocation21_spill] sm:$0xff] %v6561_v34  ;;  %v5443_v41 = vpack.i.bf16 %v6559_v10, %v6561_v34  ;;  %v6579_v21 = vld [vmem:[#allocation2 + $0x171] sm:$0xff]  ;;  %v774_v34 = vld [vmem:[#allocation2 + $0x188] sm:$0xff] }
  0x50   : > { %5419 = vrot.lane.b32.xlu0 %v5418_v46, %s5994_s26  ;;  %v6569_v46 = vld [vmem:[#allocation2 + $0x151] sm:$0xff] }
  0x51   : > { %5424 = vrot.lane.b32.xlu1 %v5423_v51, %s5994_s26  ;;  %v6571_v51 = vld [vmem:[#allocation2 + $0x159] sm:$0xff]  ;;  %v5448_v4 = vpack.i.bf16 %v6569_v46, %v771_v50  ;;  %v6587_v50 = vld [vmem:[#allocation2 + $0x22] sm:$0xff] }
  0x54   : > { %5429 = vrot.lane.b32.xlu0 %v5428_v5, %s5994_s26  ;;  %v5453_v5 = vpack.i.bf16 %v6571_v51, %v772_v0  ;;  %v5468_v0 = vpack.i.bf16 %v6585_v56, %v6277_v13  ;;  %v6605_v13 = vld [vmem:[#allocation2 + $0x52] sm:$0xff] }
  0x55   : > { %5434 = vrot.lane.b32.xlu1 %v5433_v9, %s5994_s26  ;;  %v773_v9 = vld [vmem:[#allocation2 + $0x180] sm:$0xff] }
  0x56   : > { %v5458_v3 = vpack.i.bf16 %v6577_v33, %v773_v9  ;;  %v5493_v9 = vpack.i.bf16 %v6605_v13, %v6338_v14 }
  0x58   : > { %5439 = vrot.lane.b32.xlu0 %v5438_v40, %s5994_s26  ;;  %v5463_v40 = vpack.i.bf16 %v6579_v21, %v774_v34  ;;  %v5478_v34 = vpack.i.bf16 %v6461_v44, %v6306_v59  ;;  %v6613_v59 = vld [vmem:[#allocation2 + $0x62] sm:$0xff] }
  0x59   : > { %5444 = vrot.lane.b32.xlu1 %v5443_v41, %s5994_s26  ;;  %v6595_v41 = vld [vmem:[#allocation2 + $0x3a] sm:$0xff] }
  0x5c   : > { %5449 = vrot.lane.b32.xlu0 %v5448_v4, %s5994_s26  ;;  %v5473_v4 = vpack.i.bf16 %v6587_v50, %v6286_v48 }
  0x5d   : > { %5454 = vrot.lane.b32.xlu1 %v5453_v5, %s5994_s26  ;;  %v6603_v5 = vld [vmem:[#allocation2 + $0x4a] sm:$0xff] }
  0x5e   : > { %v5488_v48 = vpack.i.bf16 %v6603_v5, %v6330_v7  ;;  %v6623_v7 = vld [vmem:[#allocation2 + $0x7a] sm:$0xff] }
  0x5f   : > { %v5508_v14 = vpack.i.bf16 %v6623_v7, %v6374_v38  ;;  %v6643_v38 = vld [vmem:[#allocation2 + $0xaa] sm:$0xff] }
  0x60   : > { %5459 = vrot.lane.b32.xlu0 %v5458_v3, %s5994_s26  ;;  %v5483_v3 = vpack.i.bf16 %v6595_v41, %v6315_v62  ;;  %v5498_v62 = vpack.i.bf16 %v6613_v59, %v6346_v19  ;;  %v6633_v19 = vld [vmem:[#allocation2 + $0x92] sm:$0xff] }
  0x61   : > { %5464 = vrot.lane.b32.xlu1 %v5463_v40, %s5994_s26  ;;  %v6615_v40 = vld [vmem:[#allocation2 + $0x6a] sm:$0xff] }
  0x64   : > { %5469 = vrot.lane.b32.xlu0 %v5468_v0, %s5994_s26  ;;  %v5503_v0 = vpack.i.bf16 %v6615_v40, %v6363_v11  ;;  %v5518_v11 = vpack.i.bf16 %v6633_v19, %v6408_v2  ;;  %v6653_v2 = vld [vmem:[#allocation2 + $0xc2] sm:$0xff] }
  0x65   : > { %5474 = vrot.lane.b32.xlu1 %v5473_v4, %s5994_s26  ;;  %v6625_v4 = vld [vmem:[#allocation2 + $0x82] sm:$0xff] }
  0x68   : > { %5479 = vrot.lane.b32.xlu0 %v5478_v34, %s5994_s26  ;;  %v5513_v34 = vpack.i.bf16 %v6625_v4, %v6394_v52  ;;  %v5528_v52 = vpack.i.bf16 %v6643_v38, %v6443_v35  ;;  %v6663_v35 = vld [vmem:[#allocation2 + $0xda] sm:$0xff] }
  0x69   : > { %5484 = vrot.lane.b32.xlu1 %v5483_v3, %s5994_s26  ;;  %v6635_v3 = vld [vmem:[#allocation2 + $0x9a] sm:$0xff] }
  0x6c   : > { %5489 = vrot.lane.b32.xlu0 %v5488_v48, %s5994_s26  ;;  %v5523_v48 = vpack.i.bf16 %v6635_v3, %v6429_v27  ;;  %v5538_v27 = vpack.i.bf16 %v6653_v2, %v6473_v47  ;;  %v6673_v47 = vld [vmem:[#allocation2 + $0xf2] sm:$0xff] }
  0x6d   : > { %5494 = vrot.lane.b32.xlu1 %v5493_v9, %s5994_s26  ;;  %v6645_v9 = vld [vmem:[#allocation2 + $0xb2] sm:$0xff] }
  0x70   : > { %5499 = vrot.lane.b32.xlu0 %v5498_v62, %s5994_s26  ;;  %v5533_v62 = vpack.i.bf16 %v6645_v9, %v6463_v12  ;;  %v5548_v12 = vpack.i.bf16 %v6663_v35, %v6494_v1  ;;  %v6683_v1 = vld [vmem:[#allocation2 + $0x10a] sm:$0xff] }
  0x71   : > { %5504 = vrot.lane.b32.xlu1 %v5503_v0, %s5994_s26  ;;  %v6655_v0 = vld [vmem:[#allocation2 + $0xca] sm:$0xff] }
  0x74   : > { %5509 = vrot.lane.b32.xlu0 %v5508_v14, %s5994_s26  ;;  %v5543_v14 = vpack.i.bf16 %v6655_v0, %v6487_v57  ;;  %v5558_v57 = vpack.i.bf16 %v6673_v47, %v6515_v22  ;;  %v6693_v22 = vld [vmem:[#allocation2 + $0x122] sm:$0xff] }
  0x75   : > { %5514 = vrot.lane.b32.xlu1 %v5513_v34, %s5994_s26  ;;  %v6665_v34 = vld [vmem:[#allocation2 + $0xe2] sm:$0xff] }
  0x78   : > { %5519 = vrot.lane.b32.xlu0 %v5518_v11, %s5994_s26  ;;  %v5553_v11 = vpack.i.bf16 %v6665_v34, %v6508_v18  ;;  %v5568_v18 = vpack.i.bf16 %v6683_v1, %v6539_v55  ;;  %v5578_v55 = vpack.i.bf16 %v6693_v22, %v6554_v17 }
  0x79   : > { %5524 = vrot.lane.b32.xlu1 %v5523_v48, %s5994_s26  ;;  %v6675_v48 = vld [vmem:[#allocation2 + $0xfa] sm:$0xff] }
  0x7c   : > { %5529 = vrot.lane.b32.xlu0 %v5528_v52, %s5994_s26  ;;  %v5563_v52 = vpack.i.bf16 %v6675_v48, %v6529_v42  ;;  %v1640_v42 = vld [vmem:[%s8409_s2 + $0x200] sm:$0xff] }
  0x7d   : > { %5534 = vrot.lane.b32.xlu1 %v5533_v62, %s5994_s26  ;;  %v6685_v62 = vld [vmem:[#allocation2 + $0x112] sm:$0xff] }
  0x80   : > { %5539 = vrot.lane.b32.xlu0 %v5538_v27, %s5994_s26  ;;  %v5573_v27 = vpack.i.bf16 %v6685_v62, %v6544_v61 }
  0x81   : > { %5544 = vrot.lane.b32.xlu1 %v5543_v14, %s5994_s26  ;;  %v1641_v14 = vld [vmem:[%s8409_s2 + $0x208] sm:$0xff] }
  0x84   : > { %5549 = vrot.lane.b32.xlu0 %v5548_v12, %s5994_s26  ;;  %v6701_v12 = vld [vmem:[#allocation2 + $0x12a] sm:$0xff] }
  0x85   : > { %5554 = vrot.lane.b32.xlu1 %v5553_v11, %s5994_s26  ;;  %v4944_v11 = vpack.c.bf16 %v1641_v14, %v1640_v42  ;;  %v5583_v61 = vpack.i.bf16 %v6701_v12, %v6559_v10  ;;  %v8506_v42 = vrot.slane %v6435_v30, 7  ;;  %v6720_v14 = vld [vmem:[#allocation2 + $0x142] sm:$0xff] }
  0x86   : > { %v1644_v30 = vld [vmem:[%s8409_s2 + $0x220] sm:$0xff] }
  0x87   : > { %4945 = vmatprep.subr.bf16.mxu1 %v4944_v11  ;;  %v597_v17 = vsel %vm469_vm2, %v8506_v42, 0.0  ;;  %v5598_v42 = vpack.i.bf16 %v6729_v43, %v6577_v33  ;;  %v647_v33 = vld [vmem:[#allocation2] sm:$0xff] }
  0x88   : > { %5559 = vrot.lane.b32.xlu0 %v5558_v57, %s5994_s26  ;;  %v6709_v57 = vld [vmem:[#allocation2 + $0x13a] sm:$0xff]  ;;  %4947 = vmatpush3.bf16.msra.mxu1 %v4944_v11  ;;  %646 = vst.msk [vmem:[#allocation2 + $0x190] sm:$0x3] %vm383_vm1, %v597_v17  ;;  %v5593_v11 = vpack.i.bf16 %v6720_v14, %v6571_v51  ;;  %v1609_v51 = vld [vmem:[%s8409_s2 + $0x108] sm:$0xff] }
  0x89   : > { %5564 = vrot.lane.b32.xlu1 %v5563_v52, %s5994_s26  ;;  %v1642_v52 = vld [vmem:[%s8409_s2 + $0x210] sm:$0xff]  ;;  %v5588_v10 = vpack.i.bf16 %v6709_v57, %v6569_v46 }
  0x8a   : > { %v6748_v17 = vld [vmem:[#allocation2 + $0x16a] sm:$0xff] }
  0x8b   : > { %8507 = vst [vmem:[#allocation22_spill] sm:$0xff] %v6748_v17 }
  0x8c   : > { %5569 = vrot.lane.b32.xlu0 %v5568_v18, %s5994_s26  ;;  %v1643_v18 = vld [vmem:[%s8409_s2 + $0x218] sm:$0xff] }
  0x8d   : > { %5574 = vrot.lane.b32.xlu1 %v5573_v27, %s5994_s26  ;;  %v4948_v27 = vpack.c.bf16 %v1643_v18, %v1642_v52  ;;  %v6737_v52 = vld [vmem:[#allocation2 + $0x15a] sm:$0xff]  ;;  %v711_v18 = vld [vmem:[#allocation2 + $0x2] sm:$0xff] }
  0x8f   : > { %4949 = vmatprep.subr.bf16.mxu1 %v4948_v27  ;;  %v901_v58 = vld [vmem:[#allocation2 + $0x189] sm:$0xff] }
  0x90   : > { %5579 = vrot.lane.b32.xlu0 %v5578_v55, %s5994_s26  ;;  %4951 = vmatpush3.bf16.msra.mxu1 %v4948_v27  ;;  %v1645_v55 = vld [vmem:[%s8409_s2 + $0x228] sm:$0xff]  ;;  %v5603_v27 = vpack.i.bf16 %v6737_v52, %v6579_v21 }
  0x91   : > { %5584 = vrot.lane.b32.xlu1 %v5583_v61, %s5994_s26  ;;  %v4952_v46 = vpack.c.bf16 %v1645_v55, %v1644_v30  ;;  %v1608_v61 = vld [vmem:[%s8409_s2 + $0x100] sm:$0xff]  ;;  %v1646_v55 = vld [vmem:[%s8409_s2 + $0x230] sm:$0xff] }
  0x92   : > { %v900_v30 = vld [vmem:[#allocation2 + $0x181] sm:$0xff]  ;;  %v4897_v21 = vpack.c.bf16 %v1609_v51, %v1608_v61  ;;  %v5613_v61 = vpack.i.bf16 %v6759_v20, %v901_v58 }
  0x93   : > { %4953 = vmatprep.subr.bf16.mxu1 %v4952_v46  ;;  %v1612_v58 = vld [vmem:[%s8409_s2 + $0x120] sm:$0xff] }
  0x94   : > { %5589 = vrot.lane.b32.xlu0 %v5588_v10, %s5994_s26  ;;  %4955 = vmatpush3.bf16.msra.mxu1 %v4952_v46  ;;  %v1647_v10 = vld [vmem:[%s8409_s2 + $0x238] sm:$0xff]  ;;  %v5608_v46 = vpack.i.bf16 %v6748_v17, %v900_v30 }
  0x95   : > { %5594 = vrot.lane.b32.xlu1 %v5593_v11, %s5994_s26  ;;  %v4956_v6 = vpack.c.bf16 %v1647_v10, %v1646_v55  ;;  %v1610_v55 = vld [vmem:[%s8409_s2 + $0x110] sm:$0xff] }
  0x96   : > { %v5310_v37 = vpop.permute.xlu0 %5309 }
  0x97   : > { %v5312_v11 = vunpack.i.h.bf16 %v5310_v37  ;;  %v5311_v54 = vunpack.i.l.bf16 %v5310_v37  ;;  %v5320_v45 = vpop.permute.xlu1 %5319  ;;  %4957 = vmatprep.subr.bf16.mxu1 %v4956_v6  ;;  %v1611_v37 = vld [vmem:[%s8409_s2 + $0x118] sm:$0xff] }
  0x98   : > { %v5321_v36 = vunpack.i.l.bf16 %v5320_v45  ;;  %5599 = vrot.lane.b32.xlu0 %v5598_v42, %s5994_s26  ;;  %4959 = vmatpush3.bf16.msra.mxu1 %v4956_v6  ;;  %v648_v42 = vld [vmem:[#allocation2 + $0x8] sm:$0xff]  ;;  %v4900_v17 = vpack.c.bf16 %v1611_v37, %v1610_v55 }
  0x99   : > { %v1480_v28 = vsel %vm380_vm0, %v711_v18, %v5311_v54  ;;  %v1448_v16 = vsel %vm380_vm0, %v647_v33, %v5312_v11  ;;  %5604 = vrot.lane.b32.xlu1 %v5603_v27, %s5994_s26  ;;  %v6773_v54 = vld [vmem:[#allocation2 + $0x182] sm:$0xff]  ;;  %v902_v18 = vld [vmem:[#allocation2 + $0x199] sm:$0xff]  ;;  %v5322_v11 = vunpack.i.h.bf16 %v5320_v45  ;;  %v8508_v27 = vmov 0.0|0.0  }
  0x9a   : > { %1814 = vmatprep.mubr.f32.mxu0 %v1480_v28  ;;  %v5315_v51 = vpop.permute.xlu0 %5314  ;;  %v1482_v39 = vsel %vm380_vm0, %v6585_v56, %v5321_v36  ;;  %v1613_v45 = vld [vmem:[%s8409_s2 + $0x128] sm:$0xff]  ;;  %v5618_v36 = vpack.i.bf16 %v6773_v54, %v902_v18  ;;  %v1614_v18 = vld [vmem:[%s8409_s2 + $0x130] sm:$0xff] }
  0x9b   : > { %v5317_v30 = vunpack.i.h.bf16 %v5315_v51  ;;  %v5316_v10 = vunpack.i.l.bf16 %v5315_v51  ;;  %1815 = vmatmul.mubr.f32.vlgmr.msra.gmra.mrb[0].mxu0 %v1448_v16  ;;  %v5325_v33 = vpop.permute.xlu1 %5324  ;;  %v6789_v56 = vld [vmem:[#allocation2 + $0x18a] sm:$0xff]  ;;  %4801 = vmatmul.mubr.msk.f32.vlgmr.msra.gmra.mrb[0].mxu1 %vm380_vm0, %v6595_v41  ;;  %v1450_v37 = vsel %vm380_vm0, %v6232_v23, %v5322_v11  ;;  %v1616_v11 = vld [vmem:[%s8409_s2 + $0x140] sm:$0xff] }
  0x9c   : > { %4898 = vmatpush1.bf16.msra.mxu0 %v4897_v21  ;;  %5609 = vrot.lane.b32.xlu0 %v5608_v46, %s5994_s26  ;;  %v5326_v16 = vunpack.i.l.bf16 %v5325_v33  ;;  %v903_v21 = vld [vmem:[#allocation2 + $0x1a1] sm:$0xff]  ;;  %v5327_v55 = vunpack.i.h.bf16 %v5325_v33 }
  0x9d   : > { %v1481_v28 = vsel %vm380_vm0, %v712_v53, %v5316_v10  ;;  %v1449_v6 = vsel %vm380_vm0, %v648_v42, %v5317_v30  ;;  %4899 = vmatprep.subr.bf16.mxu0 %v8508_v27  ;;  %5614 = vrot.lane.b32.xlu1 %v5613_v61, %s5994_s26  ;;  %v5623_v53 = vpack.i.bf16 %v6789_v56, %v903_v21  ;;  %v1615_v30 = vld [vmem:[%s8409_s2 + $0x138] sm:$0xff] }
  0x9e   : > { %1819 = vmatprep.mubr.f32.mxu0 %v1481_v28  ;;  %v5330_v46 = vpop.permute.xlu0 %5329  ;;  %4803 = vmatprep.mubr.msk.f32.mxu1 %vm380_vm0, %v6603_v5  ;;  %v4903_v61 = vpack.c.bf16 %v1613_v45, %v1612_v58  ;;  %v1483_v42 = vsel %vm380_vm0, %v6587_v50, %v5326_v16  ;;  %v1451_v50 = vsel %vm380_vm0, %v6234_v25, %v5327_v55  ;;  %v1617_v58 = vld [vmem:[%s8409_s2 + $0x148] sm:$0xff]  ;;  %v1619_v21 = vld [vmem:[%s8409_s2 + $0x158] sm:$0xff] }
  0x9f   : > { %1820 = vmatmul.mubr.f32.gmra.mrb[2].mxu0 %v1449_v6  ;;  %v5331_v51 = vunpack.i.l.bf16 %v5330_v46  ;;  %4804 = vmatmul.mubr.msk.f32.gmra.mrb[2].mxu1 %vm380_vm0, %v6605_v13  ;;  %v5332_v23 = vunpack.i.h.bf16 %v5330_v46  ;;  %v4909_v6 = vpack.c.bf16 %v1617_v58, %v1616_v11  ;;  %v1624_v58 = vld [vmem:[%s8409_s2 + $0x180] sm:$0xff] }
  0xa0   : > { %1824 = vmatprep.mubr.f32.mxu0 %v1482_v39  ;;  %4901 = vmatpush1.bf16.msra.mxu0 %v4900_v17  ;;  %v5335_v39 = vpop.permute.xlu1 %5334  ;;  %v4906_v17 = vpack.c.bf16 %v1615_v30, %v1614_v18 }
  0xa1   : > { %4902 = vmatprep.subr.bf16.mxu0 %v8508_v27  ;;  %5619 = vrot.lane.b32.xlu0 %v5618_v36, %s5994_s26  ;;  %v5336_v10 = vunpack.i.l.bf16 %v5335_v39  ;;  %v1484_v33 = vsel %vm380_vm0, %v6461_v44, %v5331_v51  ;;  %v5337_v25 = vunpack.i.h.bf16 %v5335_v39  ;;  %v1452_v44 = vsel %vm380_vm0, %v6242_v24, %v5332_v23  ;;  %v1618_v36 = vld [vmem:[%s8409_s2 + $0x150] sm:$0xff]  ;;  %v1621_v51 = vld [vmem:[%s8409_s2 + $0x168] sm:$0xff] }
  0xa2   : > { %5624 = vrot.lane.b32.xlu1 %v5623_v53, %s5994_s26  ;;  %4806 = vmatprep.mubr.msk.f32.mxu1 %vm380_vm0, %v6613_v59  ;;  %v5340_v28 = vpop.permute.xlu0 %5339  ;;  %v4912_v53 = vpack.c.bf16 %v1619_v21, %v1618_v36  ;;  %v1622_v23 = vld [vmem:[%s8409_s2 + $0x170] sm:$0xff]  ;;  %v1627_v36 = vld [vmem:[%s8409_s2 + $0x198] sm:$0xff] }
  0xa3   : > { %1825 = vmatmul.mubr.f32.gmra.mrb[4].mxu0 %v1450_v37  ;;  %4807 = vmatmul.mubr.msk.f32.gmra.mrb[4].mxu1 %vm380_vm0, %v6615_v40  ;;  %v5341_v16 = vunpack.i.l.bf16 %v5340_v28  ;;  %v1485_v45 = vsel %vm380_vm0, %v6595_v41, %v5336_v10  ;;  %v5342_v24 = vunpack.i.h.bf16 %v5340_v28  ;;  %v1453_v41 = vsel %vm380_vm0, %v6244_v32, %v5337_v25  ;;  %v1625_v28 = vld [vmem:[%s8409_s2 + $0x188] sm:$0xff] }
  0xa4   : > { %1829 = vmatprep.mubr.f32.mxu0 %v1483_v42  ;;  %4904 = vmatpush1.bf16.msra.mxu0 %v4903_v61  ;;  %v5345_v46 = vpop.permute.xlu1 %5344  ;;  %v1620_v61 = vld [vmem:[%s8409_s2 + $0x160] sm:$0xff] }
  0xa5   : > { %4905 = vmatprep.subr.bf16.mxu0 %v8508_v27  ;;  %4809 = vmatprep.mubr.msk.f32.mxu1 %vm380_vm0, %v6623_v7  ;;  %v5346_v55 = vunpack.i.l.bf16 %v5345_v46  ;;  %v1486_v37 = vsel %vm380_vm0, %v6603_v5, %v5341_v16  ;;  %v5347_v32 = vunpack.i.h.bf16 %v5345_v46  ;;  %v1454_v5 = vsel %vm380_vm0, %v6279_v29, %v5342_v24 }
  0xa6   : > { %v5350_v42 = vpop.permute.xlu0 %5349  ;;  %v4915_v18 = vpack.c.bf16 %v1621_v51, %v1620_v61 }
  0xa7   : > { %1830 = vmatmul.mubr.f32.gmra.mrb[6].mxu0 %v1451_v50  ;;  %4810 = vmatmul.mubr.msk.f32.gmra.mrb[6].mxu1 %vm380_vm0, %v6625_v4  ;;  %v5351_v30 = vunpack.i.l.bf16 %v5350_v42  ;;  %v1487_v39 = vsel %vm380_vm0, %v6605_v13, %v5346_v55  ;;  %v1623_v50 = vld [vmem:[%s8409_s2 + $0x178] sm:$0xff]  ;;  %v5352_v29 = vunpack.i.h.bf16 %v5350_v42  ;;  %v1455_v13 = vsel %vm380_vm0, %v6288_v49, %v5347_v32  ;;  %v1629_v55 = vld [vmem:[%s8409_s2 + $0x1a8] sm:$0xff]  ;;  %v1630_v32 = vld [vmem:[%s8409_s2 + $0x1b0] sm:$0xff] }
  0xa8   : > { %1834 = vmatprep.mubr.f32.mxu0 %v1484_v33  ;;  %4907 = vmatpush1.bf16.msra.mxu0 %v4906_v17  ;;  %v5355_v17 = vpop.permute.xlu1 %5354  ;;  %v4918_v10 = vpack.c.bf16 %v1623_v50, %v1622_v23  ;;  %v1632_v50 = vld [vmem:[%s8409_s2 + $0x1c0] sm:$0xff] }
  0xa9   : > { %4908 = vmatprep.subr.bf16.mxu0 %v8508_v27  ;;  %4812 = vmatprep.mubr.msk.f32.mxu1 %vm380_vm0, %v6633_v19  ;;  %v5356_v33 = vunpack.i.l.bf16 %v5355_v17  ;;  %v1488_v11 = vsel %vm380_vm0, %v6613_v59, %v5351_v30  ;;  %v5357_v49 = vunpack.i.h.bf16 %v5355_v17  ;;  %v1456_v59 = vsel %vm380_vm0, %v6308_v60, %v5352_v29  ;;  %v1633_v17 = vld [vmem:[%s8409_s2 + $0x1c8] sm:$0xff] }
  0xaa   : > { %v5360_v25 = vpop.permute.xlu0 %5359 }
  0xab   : > { %1835 = vmatmul.mubr.f32.gmra.mrb[8].mxu0 %v1452_v44  ;;  %4813 = vmatmul.mubr.msk.f32.gmra.mrb[8].mxu1 %vm380_vm0, %v6635_v3  ;;  %v4921_v44 = vpack.c.bf16 %v1625_v28, %v1624_v58  ;;  %v1489_v16 = vsel %vm380_vm0, %v6615_v40, %v5356_v33  ;;  %v5362_v60 = vunpack.i.h.bf16 %v5360_v25  ;;  %v1457_v40 = vsel %vm380_vm0, %v6317_v63, %v5357_v49  ;;  %v1635_v58 = vld [vmem:[%s8409_s2 + $0x1d8] sm:$0xff] }
  0xac   : > { %1839 = vmatprep.mubr.f32.mxu0 %v1485_v45  ;;  %4910 = vmatpush1.bf16.msra.mxu0 %v4909_v6  ;;  %v5361_v6 = vunpack.i.l.bf16 %v5360_v25  ;;  %v1626_v45 = vld [vmem:[%s8409_s2 + $0x190] sm:$0xff]  ;;  %v5365_v21 = vpop.permute.xlu1 %5364 }
  0xad   : > { %4911 = vmatprep.subr.bf16.mxu0 %v8508_v27  ;;  %4815 = vmatprep.mubr.msk.f32.mxu1 %vm380_vm0, %v6643_v38  ;;  %v4924_v46 = vpack.c.bf16 %v1627_v36, %v1626_v45  ;;  %v5366_v24 = vunpack.i.l.bf16 %v5365_v21  ;;  %v5367_v63 = vunpack.i.h.bf16 %v5365_v21 }
  0xaf   : > { %1840 = vmatmul.mubr.f32.gmra.mrb[10].mxu0 %v1453_v41  ;;  %4816 = vmatmul.mubr.msk.f32.gmra.mrb[10].mxu1 %vm380_vm0, %v6645_v9  ;;  %v1490_v41 = vsel %vm380_vm0, %v6623_v7, %v5361_v6  ;;  %v1458_v7 = vsel %vm380_vm0, %v6332_v8, %v5362_v60  ;;  %v1491_v42 = vsel %vm380_vm0, %v6625_v4, %v5366_v24  ;;  %v1637_v6 = vld [vmem:[%s8409_s2 + $0x1e8] sm:$0xff]  ;;  %v1639_v24 = vld [vmem:[%s8409_s2 + $0x1f8] sm:$0xff] }
  0xb0   : > { %1844 = vmatprep.mubr.f32.mxu0 %v1486_v37  ;;  %4913 = vmatpush1.bf16.msra.mxu0 %v4912_v53  ;;  %v1628_v53 = vld [vmem:[%s8409_s2 + $0x1a0] sm:$0xff]  ;;  %v5370_v37 = vpop.permute.xlu0 %5369  ;;  %v1459_v4 = vsel %vm380_vm0, %v6340_v15, %v5367_v63 }
  0xb1   : > { %4914 = vmatprep.subr.bf16.mxu0 %v8508_v27  ;;  %4818 = vmatprep.mubr.msk.f32.mxu1 %vm380_vm0, %v6653_v2  ;;  %v4927_v61 = vpack.c.bf16 %v1629_v55, %v1628_v53  ;;  %v5371_v51 = vunpack.i.l.bf16 %v5370_v37  ;;  %v5372_v8 = vunpack.i.h.bf16 %v5370_v37 }
  0xb3   : > { %1845 = vmatmul.mubr.f32.gmra.mrb[12].mxu0 %v1454_v5  ;;  %4819 = vmatmul.mubr.msk.f32.gmra.mrb[12].mxu1 %vm380_vm0, %v6655_v0  ;;  %v1631_v5 = vld [vmem:[%s8409_s2 + $0x1b8] sm:$0xff]  ;;  %v1492_v23 = vsel %vm380_vm0, %v6633_v19, %v5371_v51  ;;  %v1460_v19 = vsel %vm380_vm0, %v6354_v26, %v5372_v8 }
  0xb4   : > { %1849 = vmatprep.mubr.f32.mxu0 %v1487_v39  ;;  %4916 = vmatpush1.bf16.msra.mxu0 %v4915_v18  ;;  %v5375_v18 = vpop.permute.xlu1 %5374  ;;  %v4930_v30 = vpack.c.bf16 %v1631_v5, %v1630_v32  ;;  %v5380_v29 = vpop.permute.xlu0 %5379 }
  0xb5   : > { %4917 = vmatprep.subr.bf16.mxu0 %v8508_v27  ;;  %4821 = vmatprep.mubr.msk.f32.mxu1 %vm380_vm0, %v6663_v35  ;;  %v5376_v39 = vunpack.i.l.bf16 %v5375_v18  ;;  %v5377_v15 = vunpack.i.h.bf16 %v5375_v18  ;;  %v5382_v26 = vunpack.i.h.bf16 %v5380_v29 }
  0xb7   : > { %1850 = vmatmul.mubr.f32.gmra.mrb[14].mxu0 %v1455_v13  ;;  %4822 = vmatmul.mubr.msk.f32.gmra.mrb[14].mxu1 %vm380_vm0, %v6665_v34  ;;  %v4933_v13 = vpack.c.bf16 %v1633_v17, %v1632_v50  ;;  %v1493_v33 = vsel %vm380_vm0, %v6635_v3, %v5376_v39  ;;  %v1461_v3 = vsel %vm380_vm0, %v6365_v31, %v5377_v15  ;;  %v8509_v31 = vld [vmem:[#allocation22_spill] sm:$0xff] }
  0xb8   : > { %1854 = vmatprep.mubr.f32.mxu0 %v1488_v11  ;;  %4919 = vmatpush1.bf16.msra.mxu0 %v4918_v10  ;;  %v5381_v10 = vunpack.i.l.bf16 %v5380_v29  ;;  %v1634_v11 = vld [vmem:[%s8409_s2 + $0x1d0] sm:$0xff]  ;;  %v5385_v28 = vpop.permute.xlu1 %5384 }
  0xb9   : > { %4920 = vmatprep.subr.bf16.mxu0 %v8508_v27  ;;  %4824 = vmatprep.mubr.msk.f32.mxu1 %vm380_vm0, %v6673_v47  ;;  %v4936_v25 = vpack.c.bf16 %v1635_v58, %v1634_v11  ;;  %v5386_v49 = vunpack.i.l.bf16 %v5385_v28  ;;  %v5387_v45 = vunpack.i.h.bf16 %v5385_v28  ;;  %v8516_v58 = vld [vmem:[#allocation12_spill] sm:$0xff] }
  0xbb   : > { %1855 = vmatmul.mubr.f32.gmra.mrb[16].mxu0 %v1456_v59  ;;  %4825 = vmatmul.mubr.msk.f32.gmra.mrb[16].mxu1 %vm380_vm0, %v6675_v48  ;;  %v1494_v59 = vsel %vm380_vm0, %v6643_v38, %v5381_v10  ;;  %v8510_v38 = vld [vmem:[#allocation6_spill] sm:$0xff] }
  0xbc   : > { %1859 = vmatprep.mubr.f32.mxu0 %v1489_v16  ;;  %4922 = vmatpush1.bf16.msra.mxu0 %v4921_v44  ;;  %v1636_v44 = vld [vmem:[%s8409_s2 + $0x1e0] sm:$0xff]  ;;  %v5390_v16 = vpop.permute.xlu0 %5389  ;;  %v1462_v36 = vsel %vm380_vm0, %v8510_v38, %v5382_v26 }
  0xbd   : > { %4923 = vmatprep.subr.bf16.mxu0 %v8508_v27  ;;  %4827 = vmatprep.mubr.msk.f32.mxu1 %vm380_vm0, %v6683_v1  ;;  %v4939_v21 = vpack.c.bf16 %v1637_v6, %v1636_v44  ;;  %v5391_v60 = vunpack.i.l.bf16 %v5390_v16  ;;  %v5392_v53 = vunpack.i.h.bf16 %v5390_v16 }
  0xbf   : > { %1860 = vmatmul.mubr.f32.gmra.mrb[18].mxu0 %v1457_v40  ;;  %4828 = vmatmul.mubr.msk.f32.gmra.mrb[18].mxu1 %vm380_vm0, %v6685_v62  ;;  %v1495_v40 = vsel %vm380_vm0, %v6645_v9, %v5386_v49  ;;  %v8511_v9 = vld [vmem:[#allocation7_spill] sm:$0xff]  ;;  %v8517_v49 = vld [vmem:[#allocation13_spill] sm:$0xff] }
  0xc0   : > { %1864 = vmatprep.mubr.f32.mxu0 %v1490_v41  ;;  %4925 = vmatpush1.bf16.msra.mxu0 %v4924_v46  ;;  %v1638_v46 = vld [vmem:[%s8409_s2 + $0x1f0] sm:$0xff]  ;;  %v5395_v41 = vpop.permute.xlu1 %5394  ;;  %v1463_v55 = vsel %vm380_vm0, %v8511_v9, %v5387_v45  ;;  %v8518_v45 = vld [vmem:[#allocation14_spill] sm:$0xff] }
  0xc1   : > { %4926 = vmatprep.subr.bf16.mxu0 %v8508_v27  ;;  %4830 = vmatprep.mubr.msk.f32.mxu1 %vm380_vm0, %v6693_v22  ;;  %v4942_v37 = vpack.c.bf16 %v1639_v24, %v1638_v46  ;;  %v5396_v63 = vunpack.i.l.bf16 %v5395_v41  ;;  %v5397_v51 = vunpack.i.h.bf16 %v5395_v41  ;;  %v8520_v9 = vld [vmem:[#allocation16_spill] sm:$0xff] }
  0xc3   : > { %1865 = vmatmul.mubr.f32.gmra.mrb[20].mxu0 %v1458_v7  ;;  %4831 = vmatmul.mubr.msk.f32.gmra.mrb[20].mxu1 %vm380_vm0, %v6701_v12  ;;  %v1496_v7 = vsel %vm380_vm0, %v6653_v2, %v5391_v60  ;;  %v1497_v5 = vsel %vm380_vm0, %v6655_v0, %v5396_v63 }
  0xc4   : > { %1869 = vmatprep.mubr.f32.mxu0 %v1491_v42  ;;  %4928 = vmatpush1.bf16.msra.mxu0 %v4927_v61  ;;  %v5400_v61 = vpop.permute.xlu0 %5399  ;;  %v5405_v18 = vpop.permute.xlu1 %5404 }
  0xc5   : > { %4929 = vmatprep.subr.bf16.mxu0 %v8508_v27  ;;  %4833 = vmatprep.mubr.msk.f32.mxu1 %vm380_vm0, %v6709_v57  ;;  %v5401_v32 = vunpack.i.l.bf16 %v5400_v61  ;;  %v5402_v2 = vunpack.i.h.bf16 %v5400_v61  ;;  %v5407_v39 = vunpack.i.h.bf16 %v5405_v18  ;;  %v8521_v61 = vld [vmem:[#allocation17_spill] sm:$0xff] }
  0xc7   : > { %1870 = vmatmul.mubr.f32.gmra.mrb[22].mxu0 %v1459_v4  ;;  %4834 = vmatmul.mubr.msk.f32.gmra.mrb[22].mxu1 %vm380_vm0, %v6720_v14  ;;  %v5406_v4 = vunpack.i.l.bf16 %v5405_v18 }
  0xc8   : > { %1874 = vmatprep.mubr.f32.mxu0 %v1492_v23  ;;  %4931 = vmatpush1.bf16.msra.mxu0 %v4930_v30  ;;  %v5410_v30 = vpop.permute.xlu0 %5409  ;;  %v8514_v23 = vld [vmem:[#allocation10_spill] sm:$0xff]  ;;  %v5415_v29 = vpop.permute.xlu1 %5414 }
  0xc9   : > { %4932 = vmatprep.subr.bf16.mxu0 %v8508_v27  ;;  %4836 = vmatprep.mubr.msk.f32.mxu1 %vm380_vm0, %v6729_v43  ;;  %v1466_v50 = vsel %vm380_vm0, %v8514_v23, %v5402_v2  ;;  %v5411_v17 = vunpack.i.l.bf16 %v5410_v30  ;;  %v1499_v0 = vsel %vm380_vm0, %v6665_v34, %v5406_v4  ;;  %v5412_v15 = vunpack.i.h.bf16 %v5410_v30  ;;  %v8523_v4 = vld [vmem:[#allocation19_spill] sm:$0xff] }
  0xca   : > { %v5416_v10 = vunpack.i.l.bf16 %v5415_v29  ;;  %v5417_v11 = vunpack.i.h.bf16 %v5415_v29 }
  0xcb   : > { %1875 = vmatmul.mubr.f32.gmra.mrb[24].mxu0 %v1460_v19  ;;  %4837 = vmatmul.mubr.msk.f32.gmra.mrb[24].mxu1 %vm380_vm0, %v6737_v52  ;;  %v8515_v19 = vld [vmem:[#allocation11_spill] sm:$0xff]  ;;  %v1468_v28 = vsel %vm380_vm0, %v8516_v58, %v5412_v15 }
  0xcc   : > { %1879 = vmatprep.mubr.f32.mxu0 %v1493_v33  ;;  %4934 = vmatpush1.bf16.msra.mxu0 %v4933_v13  ;;  %v1467_v13 = vsel %vm380_vm0, %v8515_v19, %v5407_v39  ;;  %v5420_v33 = vpop.permute.xlu0 %5419  ;;  %v1501_v34 = vsel %vm380_vm0, %v6675_v48, %v5416_v10  ;;  %v8525_v19 = vld [vmem:[#allocation21_spill] sm:$0xff] }
  0xcd   : > { %4935 = vmatprep.subr.bf16.mxu0 %v8508_v27  ;;  %4839 = vmatprep.mubr.msk.f32.mxu1 %vm380_vm0, %v8509_v31  ;;  %v5421_v26 = vunpack.i.l.bf16 %v5420_v33 }
  0xcf   : > { %1880 = vmatmul.mubr.f32.gmra.mrb[26].mxu0 %v1461_v3  ;;  %4840 = vmatmul.mubr.msk.f32.gmra.mrb[26].mxu1 %vm380_vm0, %v6759_v20  ;;  %v5425_v3 = vpop.permute.xlu1 %5424 }
  0xd0   : > { %1884 = vmatprep.mubr.f32.mxu0 %v1494_v59  ;;  %4937 = vmatpush1.bf16.msra.mxu0 %v4936_v25  ;;  %v5422_v25 = vunpack.i.h.bf16 %v5420_v33  ;;  %v1469_v59 = vsel %vm380_vm0, %v8517_v49, %v5417_v11  ;;  %v5426_v44 = vunpack.i.l.bf16 %v5425_v3  ;;  %v5430_v6 = vpop.permute.xlu0 %5429  ;;  %v5427_v16 = vunpack.i.h.bf16 %v5425_v3  ;;  %v840_v3 = vld [vmem:[#allocation2 + $0x30] sm:$0xff] }
  0xd1   : > { %4938 = vmatprep.subr.bf16.mxu0 %v8508_v27  ;;  %4842 = vmatprep.mubr.msk.f32.mxu1 %vm380_vm0, %v6773_v54  ;;  %v8512_v54 = vld [vmem:[#allocation8_spill] sm:$0xff]  ;;  %v5432_v60 = vunpack.i.h.bf16 %v5430_v6 }
  0xd2   : > { %v1464_v42 = vsel %vm380_vm0, %v8512_v54, %v5392_v53  ;;  %v1470_v38 = vsel %vm380_vm0, %v8518_v45, %v5422_v25  ;;  %v1503_v48 = vsel %vm380_vm0, %v6685_v62, %v5426_v44  ;;  %v934_v25 = vld [vmem:[#allocation2 + $0x19a] sm:$0xff] }
  0xd3   : > { %1885 = vmatmul.mubr.f32.gmra.mrb[28].mxu0 %v1462_v36  ;;  %4843 = vmatmul.mubr.msk.f32.gmra.mrb[28].mxu1 %vm380_vm0, %v6789_v56  ;;  %v1498_v56 = vsel %vm380_vm0, %v6663_v35, %v5401_v32  ;;  %v1500_v35 = vsel %vm380_vm0, %v6673_v47, %v5411_v17  ;;  %v1502_v47 = vsel %vm380_vm0, %v6683_v1, %v5421_v26  ;;  %v5431_v36 = vunpack.i.l.bf16 %v5430_v6  ;;  %v7062_v26 = vld [vmem:[#allocation2 + $0x170] sm:$0xff] }
  0xd4   : > { %1889 = vmatprep.mubr.f32.mxu0 %v1495_v40  ;;  %4940 = vmatpush1.bf16.msra.mxu0 %v4939_v21  ;;  %v5435_v21 = vpop.permute.xlu1 %5434  ;;  %v8519_v40 = vld [vmem:[#allocation15_spill] sm:$0xff]  ;;  %v5440_v41 = vpop.permute.xlu0 %5439 }
  0xd5   : > { %4941 = vmatprep.subr.bf16.mxu0 %v8508_v27  ;;  %v8513_v27 = vld [vmem:[#allocation9_spill] sm:$0xff]  ;;  %v1471_v46 = vsel %vm380_vm0, %v8519_v40, %v5427_v16  ;;  %v5436_v24 = vunpack.i.l.bf16 %v5435_v21  ;;  %v1504_v1 = vsel %vm380_vm0, %v6693_v22, %v5431_v36  ;;  %v5437_v53 = vunpack.i.h.bf16 %v5435_v21  ;;  %4845 = vmatprep.mubr.msk.f32.mxu1 %vm380_vm0, %v934_v25  ;;  %v776_v21 = vld [vmem:[#allocation2 + $0x21] sm:$0xff] }
  0xd6   : > { %v1465_v8 = vsel %vm380_vm0, %v8513_v27, %v5397_v51  ;;  %v841_v16 = vld [vmem:[#allocation2 + $0x38] sm:$0xff]  ;;  %v842_v40 = vld [vmem:[#allocation2 + $0x48] sm:$0xff] }
  0xd7   : > { %1890 = vmatmul.mubr.f32.gmra.mrb[30].mxu0 %v1463_v55  ;;  %v1472_v55 = vsel %vm380_vm0, %v8520_v9, %v5432_v60  ;;  %v1505_v62 = vsel %vm380_vm0, %v6701_v12, %v5436_v24  ;;  %v1473_v51 = vsel %vm380_vm0, %v8521_v61, %v5437_v53  ;;  %v777_v53 = vld [vmem:[#allocation2 + $0x31] sm:$0xff]  ;;  %v778_v61 = vld [vmem:[#allocation2 + $0x39] sm:$0xff] }
  0xd8   : > { %1894 = vmatprep.mubr.f32.mxu0 %v1496_v7  ;;  %4943 = vmatpush1.bf16.msra.mxu0 %v4942_v37  ;;  %v5441_v37 = vunpack.i.l.bf16 %v5440_v41  ;;  %v5445_v63 = vpop.permute.xlu1 %5444  ;;  %v5442_v7 = vunpack.i.h.bf16 %v5440_v41  ;;  %v783_v25 = vld [vmem:[#allocation2 + $0x79] sm:$0xff] }
  0xd9   : > { %v5446_v54 = vunpack.i.l.bf16 %v5445_v63  ;;  %v5447_v32 = vunpack.i.h.bf16 %v5445_v63 }
  0xda   : > { %v1506_v22 = vsel %vm380_vm0, %v6709_v57, %v5441_v37 }
  0xdb   : > { %1895 = vmatmul.mubr.f32.gmra.mrb[32].mxu0 %v1464_v42  ;;  %v5450_v42 = vpop.permute.xlu0 %5449  ;;  %v1507_v12 = vsel %vm380_vm0, %v6720_v14, %v5446_v54  ;;  %v844_v54 = vld [vmem:[#allocation2 + $0x60] sm:$0xff] }
  0xdc   : > { %1899 = vmatprep.mubr.f32.mxu0 %v1497_v5  ;;  %v8522_v5 = vld [vmem:[#allocation18_spill] sm:$0xff]  ;;  %v5451_v2 = vunpack.i.l.bf16 %v5450_v42  ;;  %v5455_v27 = vpop.permute.xlu1 %5454 }
  0xdd   : > { %v1474_v18 = vsel %vm380_vm0, %v8522_v5, %v5442_v7  ;;  %v5456_v30 = vunpack.i.l.bf16 %v5455_v27  ;;  %v5457_v23 = vunpack.i.h.bf16 %v5455_v27 }
  0xde   : > { %v1508_v57 = vsel %vm380_vm0, %v6729_v43, %v5451_v2 }
  0xdf   : > { %1900 = vmatmul.mubr.f32.gmra.mrb[34].mxu0 %v1465_v8  ;;  %v5452_v8 = vunpack.i.h.bf16 %v5450_v42  ;;  %v5460_v39 = vpop.permute.xlu0 %5459  ;;  %v1509_v14 = vsel %vm380_vm0, %v6737_v52, %v5456_v30  ;;  %v780_v30 = vld [vmem:[#allocation2 + $0x51] sm:$0xff] }
  0xe0   : > { %1904 = vmatprep.mubr.f32.mxu0 %v1498_v56  ;;  %v1475_v56 = vsel %vm380_vm0, %v8523_v4, %v5447_v32  ;;  %v5465_v29 = vpop.permute.xlu1 %5464  ;;  %v5462_v15 = vunpack.i.h.bf16 %v5460_v39 }
  0xe1   : > { %v5466_v10 = vunpack.i.l.bf16 %v5465_v29  ;;  %v5467_v11 = vunpack.i.h.bf16 %v5465_v29 }
  0xe3   : > { %1905 = vmatmul.mubr.f32.gmra.mrb[36].mxu0 %v1466_v50  ;;  %v8524_v50 = vld [vmem:[#allocation20_spill] sm:$0xff]  ;;  %v5470_v33 = vpop.permute.xlu0 %5469 }
  0xe4   : > { %1909 = vmatprep.mubr.f32.mxu0 %v1499_v0  ;;  %v1476_v17 = vsel %vm380_vm0, %v8524_v50, %v5452_v8  ;;  %v5461_v0 = vunpack.i.l.bf16 %v5460_v39  ;;  %v5471_v58 = vunpack.i.l.bf16 %v5470_v33  ;;  %v5472_v49 = vunpack.i.h.bf16 %v5470_v33  ;;  %v846_v39 = vld [vmem:[#allocation2 + $0x78] sm:$0xff]  ;;  %v782_v33 = vld [vmem:[#allocation2 + $0x69] sm:$0xff] }
  0xe6   : > { %v1510_v43 = vsel %vm380_vm0, %v8509_v31, %v5461_v0  ;;  %v935_v31 = vld [vmem:[#allocation2 + $0x1a2] sm:$0xff] }
  0xe7   : > { %1910 = vmatmul.mubr.f32.gmra.mrb[38].mxu0 %v1467_v13  ;;  %v1477_v13 = vsel %vm380_vm0, %v8525_v19, %v5457_v23  ;;  %4846 = vmatmul.mubr.msk.f32.gmra.mrb[30].mxu1 %vm380_vm0, %v935_v31  ;;  %v5480_v6 = vpop.permute.xlu0 %5479 }
  0xe8   : > { %1914 = vmatprep.mubr.f32.mxu0 %v1500_v35  ;;  %v7056_v35 = vld [vmem:[#allocation2 + $0x168] sm:$0xff]  ;;  %v5481_v36 = vunpack.i.l.bf16 %v5480_v6 }
  0xe9   : > { %v1478_v52 = vsel %vm380_vm0, %v7056_v35, %v5462_v15  ;;  %v847_v15 = vld [vmem:[#allocation2 + $0x80] sm:$0xff] }
  0xea   : > { %v1546_v41 = vsel %vm380_vm0, %v842_v40, %v5481_v36 }
  0xeb   : > { %1915 = vmatmul.mubr.f32.gmra.mrb[40].mxu0 %v1468_v28  ;;  %v1511_v28 = vsel %vm380_vm0, %v6759_v20, %v5466_v10  ;;  %v775_v20 = vld [vmem:[#allocation2 + $0x19] sm:$0xff]  ;;  %v5490_v9 = vpop.permute.xlu0 %5489 }
  0xec   : > { %1919 = vmatprep.mubr.f32.mxu0 %v1501_v34  ;;  %v5475_v34 = vpop.permute.xlu1 %5474  ;;  %v5491_v63 = vunpack.i.l.bf16 %v5490_v9 }
  0xed   : > { %v5476_v44 = vunpack.i.l.bf16 %v5475_v34  ;;  %v5477_v45 = vunpack.i.h.bf16 %v5475_v34 }
  0xee   : > { %v1548_v5 = vsel %vm380_vm0, %v844_v54, %v5491_v63 }
  0xef   : > { %1920 = vmatmul.mubr.f32.gmra.mrb[42].mxu0 %v1469_v59  ;;  %v1479_v59 = vsel %vm380_vm0, %v7062_v26, %v5467_v11  ;;  %v1513_v24 = vsel %vm380_vm0, %v776_v21, %v5477_v45  ;;  %v5500_v2 = vpop.permute.xlu0 %5499  ;;  %v850_v45 = vld [vmem:[#allocation2 + $0xa8] sm:$0xff] }
  0xf0   : > { %1924 = vmatprep.mubr.f32.mxu0 %v1502_v47  ;;  %v1544_v47 = vsel %vm380_vm0, %v840_v3, %v5471_v58  ;;  %v5485_v60 = vpop.permute.xlu1 %5484  ;;  %v5501_v4 = vunpack.i.l.bf16 %v5500_v2  ;;  %v5502_v23 = vunpack.i.h.bf16 %v5500_v2  ;;  %v788_v2 = vld [vmem:[#allocation2 + $0xb1] sm:$0xff] }
  0xf1   : > { %v5487_v37 = vunpack.i.h.bf16 %v5485_v60 }
  0xf2   : > { %v1550_v0 = vsel %vm380_vm0, %v846_v39, %v5501_v4 }
  0xf3   : > { %1925 = vmatmul.mubr.f32.gmra.mrb[44].mxu0 %v1470_v38  ;;  %v1512_v38 = vsel %vm380_vm0, %v775_v20, %v5472_v49  ;;  %v1515_v42 = vsel %vm380_vm0, %v778_v61, %v5487_v37  ;;  %v5510_v29 = vpop.permute.xlu0 %5509  ;;  %v849_v49 = vld [vmem:[#allocation2 + $0x98] sm:$0xff]  ;;  %v852_v37 = vld [vmem:[#allocation2 + $0xc0] sm:$0xff] }
  0xf4   : > { %1929 = vmatprep.mubr.f32.mxu0 %v1503_v48  ;;  %v1545_v48 = vsel %vm380_vm0, %v841_v16, %v5476_v44  ;;  %v5511_v10 = vunpack.i.l.bf16 %v5510_v29  ;;  %v5512_v58 = vunpack.i.h.bf16 %v5510_v29  ;;  %v790_v29 = vld [vmem:[#allocation2 + $0xc9] sm:$0xff] }
  0xf6   : > { %v1520_v44 = vsel %vm380_vm0, %v783_v25, %v5512_v58  ;;  %v857_v58 = vld [vmem:[#allocation2 + $0xf8] sm:$0xff] }
  0xf7   : > { %1930 = vmatmul.mubr.f32.gmra.mrb[46].mxu0 %v1471_v46  ;;  %v5482_v46 = vunpack.i.h.bf16 %v5480_v6  ;;  %v5520_v31 = vpop.permute.xlu0 %5519  ;;  %v784_v6 = vld [vmem:[#allocation2 + $0x81] sm:$0xff] }
  0xf8   : > { %1934 = vmatprep.mubr.f32.mxu0 %v1504_v1  ;;  %v5486_v1 = vunpack.i.l.bf16 %v5485_v60  ;;  %v785_v60 = vld [vmem:[#allocation2 + $0x91] sm:$0xff] }
  0xfb   : > { %1935 = vmatmul.mubr.f32.gmra.mrb[48].mxu0 %v1472_v55  ;;  %v843_v55 = vld [vmem:[#allocation2 + $0x50] sm:$0xff]  ;;  %v5530_v40 = vpop.permute.xlu0 %5529 }
  0xfc   : > { %1939 = vmatprep.mubr.f32.mxu0 %v1505_v62  ;;  %v1514_v62 = vsel %vm380_vm0, %v777_v53, %v5482_v46  ;;  %v1547_v7 = vsel %vm380_vm0, %v843_v55, %v5486_v1  ;;  %v851_v46 = vld [vmem:[#allocation2 + $0xb0] sm:$0xff] }
  0xff   : > { %1940 = vmatmul.mubr.f32.gmra.mrb[50].mxu0 %v1473_v51  ;;  %v5495_v51 = vpop.permute.xlu1 %5494  ;;  %v5540_v54 = vpop.permute.xlu0 %5539 }
 0x100   : > { %1944 = vmatprep.mubr.f32.mxu0 %v1506_v22  ;;  %v5492_v22 = vunpack.i.h.bf16 %v5490_v9  ;;  %v5496_v32 = vunpack.i.l.bf16 %v5495_v51  ;;  %v5497_v27 = vunpack.i.h.bf16 %v5495_v51  ;;  %v786_v9 = vld [vmem:[#allocation2 + $0x99] sm:$0xff]  ;;  %v787_v51 = vld [vmem:[#allocation2 + $0xa9] sm:$0xff] }
 0x102   : > { %v1517_v50 = vsel %vm380_vm0, %v780_v30, %v5497_v27  ;;  %v854_v27 = vld [vmem:[#allocation2 + $0xd8] sm:$0xff] }
 0x103   : > { %1945 = vmatmul.mubr.f32.gmra.mrb[52].mxu0 %v1474_v18  ;;  %v779_v18 = vld [vmem:[#allocation2 + $0x49] sm:$0xff]  ;;  %v5550_v39 = vpop.permute.xlu0 %5549 }
 0x104   : > { %1949 = vmatprep.mubr.f32.mxu0 %v1507_v12  ;;  %v845_v12 = vld [vmem:[#allocation2 + $0x68] sm:$0xff]  ;;  %v1516_v8 = vsel %vm380_vm0, %v779_v18, %v5492_v22 }
 0x105   : > { %v853_v22 = vld [vmem:[#allocation2 + $0xc8] sm:$0xff] }
 0x107   : > { %1950 = vmatmul.mubr.f32.gmra.mrb[54].mxu0 %v1475_v56  ;;  %v1549_v56 = vsel %vm380_vm0, %v845_v12, %v5496_v32 }
 0x108   : > { %1954 = vmatprep.mubr.f32.mxu0 %v1508_v57  ;;  %v5505_v57 = vpop.permute.xlu1 %5504 }
 0x109   : > { %v5507_v19 = vunpack.i.h.bf16 %v5505_v57 }
 0x10b   : > { %1955 = vmatmul.mubr.f32.gmra.mrb[56].mxu0 %v1476_v17  ;;  %v5506_v17 = vunpack.i.l.bf16 %v5505_v57  ;;  %v789_v57 = vld [vmem:[#allocation2 + $0xc1] sm:$0xff] }
 0x10c   : > { %1959 = vmatprep.mubr.f32.mxu0 %v1509_v14  ;;  %v781_v14 = vld [vmem:[#allocation2 + $0x61] sm:$0xff]  ;;  %v5515_v11 = vpop.permute.xlu1 %5514 }
 0x10d   : > { %v5516_v34 = vunpack.i.l.bf16 %v5515_v11 }
 0x10f   : > { %1960 = vmatmul.mubr.f32.gmra.mrb[58].mxu0 %v1477_v13  ;;  %v1518_v13 = vsel %vm380_vm0, %v781_v14, %v5502_v23  ;;  %v1553_v20 = vsel %vm380_vm0, %v849_v49, %v5516_v34  ;;  %v855_v23 = vld [vmem:[#allocation2 + $0xe0] sm:$0xff] }
 0x110   : > { %1964 = vmatprep.mubr.f32.mxu0 %v1510_v43  ;;  %v1551_v43 = vsel %vm380_vm0, %v847_v15, %v5506_v17  ;;  %v5525_v16 = vpop.permute.xlu1 %5524 }
 0x113   : > { %1965 = vmatmul.mubr.f32.gmra.mrb[60].mxu0 %v1478_v52  ;;  %v848_v52 = vld [vmem:[#allocation2 + $0x90] sm:$0xff] }
 0x114   : > { %1969 = vmatprep.mubr.f32.mxu0 %v1511_v28  ;;  %v1519_v28 = vsel %vm380_vm0, %v782_v33, %v5507_v19  ;;  %v1552_v3 = vsel %vm380_vm0, %v848_v52, %v5511_v10  ;;  %v5535_v55 = vpop.permute.xlu1 %5534  ;;  %v856_v19 = vld [vmem:[#allocation2 + $0xf0] sm:$0xff]  ;;  %v5560_v52 = vpop.permute.xlu0 %5559 }
 0x117   : > { %1970 = vmatmul.mubr.f32.gmra.mrb[62].mxu0 %v1479_v59  ;;  %v5517_v59 = vunpack.i.h.bf16 %v5515_v11  ;;  %v791_v11 = vld [vmem:[#allocation2 + $0xd9] sm:$0xff] }
 0x118   : > { %2039 = vmatprep.mubr.f32.mxu0 %v1544_v47  ;;  %v5521_v47 = vunpack.i.l.bf16 %v5520_v31  ;;  %v5545_v12 = vpop.permute.xlu1 %5544 }
 0x119   : > { %v1521_v36 = vsel %vm380_vm0, %v784_v6, %v5517_v59  ;;  %v858_v59 = vld [vmem:[#allocation2 + $0x108] sm:$0xff] }
 0x11a   : > { %v1554_v21 = vsel %vm380_vm0, %v850_v45, %v5521_v47  ;;  %v5570_v45 = vpop.permute.xlu0 %5569 }
 0x11b   : > { %2040 = vmatmul.mubr.f32.vlgmr.msra.gmra.mrb[0].mxu0 %v1512_v38  ;;  %v5522_v38 = vunpack.i.h.bf16 %v5520_v31  ;;  %v792_v31 = vld [vmem:[#allocation2 + $0xe1] sm:$0xff] }
 0x11c   : > { %2044 = vmatprep.mubr.f32.mxu0 %v1545_v48  ;;  %v5526_v48 = vunpack.i.l.bf16 %v5525_v16  ;;  %v5555_v15 = vpop.permute.xlu1 %5554 }
 0x11d   : > { %v1522_v1 = vsel %vm380_vm0, %v785_v60, %v5522_v38  ;;  %v859_v38 = vld [vmem:[#allocation2 + $0x110] sm:$0xff] }
 0x11e   : > { %v1555_v53 = vsel %vm380_vm0, %v851_v46, %v5526_v48 }
 0x11f   : > { %2045 = vmatmul.mubr.f32.gmra.mrb[2].mxu0 %v1513_v24  ;;  %v5527_v24 = vunpack.i.h.bf16 %v5525_v16  ;;  %v793_v16 = vld [vmem:[#allocation2 + $0xf1] sm:$0xff] }
 0x120   : > { %2049 = vmatprep.mubr.f32.mxu0 %v1546_v41  ;;  %v5531_v41 = vunpack.i.l.bf16 %v5530_v40  ;;  %v5565_v49 = vpop.permute.xlu1 %5564 }
 0x121   : > { %v1523_v63 = vsel %vm380_vm0, %v786_v9, %v5527_v24  ;;  %v860_v24 = vld [vmem:[#allocation2 + $0x120] sm:$0xff] }
 0x122   : > { %v1556_v61 = vsel %vm380_vm0, %v852_v37, %v5531_v41  ;;  %v5580_v37 = vpop.permute.xlu0 %5579 }
 0x123   : > { %2050 = vmatmul.mubr.f32.gmra.mrb[4].mxu0 %v1514_v62  ;;  %v5532_v62 = vunpack.i.h.bf16 %v5530_v40  ;;  %v794_v40 = vld [vmem:[#allocation2 + $0xf9] sm:$0xff] }
 0x124   : > { %2054 = vmatprep.mubr.f32.mxu0 %v1547_v7  ;;  %v5536_v7 = vunpack.i.l.bf16 %v5535_v55  ;;  %v5575_v46 = vpop.permute.xlu1 %5574 }
 0x125   : > { %v1524_v32 = vsel %vm380_vm0, %v787_v51, %v5532_v62  ;;  %v861_v62 = vld [vmem:[#allocation2 + $0x128] sm:$0xff] }
 0x126   : > { %v1557_v18 = vsel %vm380_vm0, %v853_v22, %v5536_v7 }
 0x127   : > { %2055 = vmatmul.mubr.f32.gmra.mrb[6].mxu0 %v1515_v42  ;;  %v5537_v42 = vunpack.i.h.bf16 %v5535_v55  ;;  %v795_v55 = vld [vmem:[#allocation2 + $0x109] sm:$0xff] }
 0x128   : > { %2059 = vmatprep.mubr.f32.mxu0 %v1548_v5  ;;  %v5541_v5 = vunpack.i.l.bf16 %v5540_v54  ;;  %v5585_v22 = vpop.permute.xlu1 %5584 }
 0x129   : > { %v1525_v4 = vsel %vm380_vm0, %v788_v2, %v5537_v42  ;;  %v862_v42 = vld [vmem:[#allocation2 + $0x138] sm:$0xff] }
 0x12a   : > { %v1558_v30 = vsel %vm380_vm0, %v854_v27, %v5541_v5  ;;  %v5590_v27 = vpop.permute.xlu0 %5589 }
 0x12b   : > { %2060 = vmatmul.mubr.f32.gmra.mrb[8].mxu0 %v1516_v8  ;;  %v5542_v8 = vunpack.i.h.bf16 %v5540_v54  ;;  %v796_v54 = vld [vmem:[#allocation2 + $0x111] sm:$0xff] }
 0x12c   : > { %2064 = vmatprep.mubr.f32.mxu0 %v1549_v56  ;;  %v5546_v56 = vunpack.i.l.bf16 %v5545_v12 }
 0x12d   : > { %v1526_v17 = vsel %vm380_vm0, %v789_v57, %v5542_v8  ;;  %v863_v8 = vld [vmem:[#allocation2 + $0x140] sm:$0xff] }
 0x12e   : > { %v1559_v14 = vsel %vm380_vm0, %v855_v23, %v5546_v56 }
 0x12f   : > { %2065 = vmatmul.mubr.f32.gmra.mrb[10].mxu0 %v1517_v50  ;;  %v5547_v50 = vunpack.i.h.bf16 %v5545_v12  ;;  %v797_v12 = vld [vmem:[#allocation2 + $0x121] sm:$0xff] }
 0x130   : > { %2069 = vmatprep.mubr.f32.mxu0 %v1550_v0  ;;  %v5551_v0 = vunpack.i.l.bf16 %v5550_v39 }
 0x131   : > { %v1527_v10 = vsel %vm380_vm0, %v790_v29, %v5547_v50  ;;  %v5595_v50 = vpop.permute.xlu1 %5594 }
 0x132   : > { %v1560_v33 = vsel %vm380_vm0, %v856_v19, %v5551_v0 }
 0x133   : > { %2070 = vmatmul.mubr.f32.gmra.mrb[12].mxu0 %v1518_v13  ;;  %v5552_v13 = vunpack.i.h.bf16 %v5550_v39  ;;  %v798_v39 = vld [vmem:[#allocation2 + $0x129] sm:$0xff] }
 0x134   : > { %2074 = vmatprep.mubr.f32.mxu0 %v1551_v43  ;;  %v5556_v43 = vunpack.i.l.bf16 %v5555_v15 }
 0x135   : > { %v1528_v34 = vsel %vm380_vm0, %v791_v11, %v5552_v13  ;;  %v799_v13 = vld [vmem:[#allocation2 + $0x139] sm:$0xff]  ;;  %v5597_v11 = vunpack.i.h.bf16 %v5595_v50 }
 0x136   : > { %v1561_v25 = vsel %vm380_vm0, %v857_v58, %v5556_v43  ;;  %v865_v43 = vld [vmem:[#allocation2 + $0x158] sm:$0xff] }
 0x137   : > { %2075 = vmatmul.mubr.f32.gmra.mrb[14].mxu0 %v1519_v28  ;;  %v5557_v28 = vunpack.i.h.bf16 %v5555_v15  ;;  %v5596_v15 = vunpack.i.l.bf16 %v5595_v50  ;;  %v5983_v50 = vld [vmem:[#allocation2 + $0x189] sm:$0xff] }
 0x138   : > { %2079 = vmatprep.mubr.f32.mxu0 %v1552_v3  ;;  %v5561_v3 = vunpack.i.l.bf16 %v5560_v52 }
 0x139   : > { %v1529_v47 = vsel %vm380_vm0, %v792_v31, %v5557_v28 }
 0x13a   : > { %v1562_v6 = vsel %vm380_vm0, %v858_v59, %v5561_v3  ;;  %v800_v3 = vld [vmem:[#allocation2 + $0x141] sm:$0xff] }
 0x13b   : > { %2080 = vmatmul.mubr.f32.gmra.mrb[16].mxu0 %v1520_v44  ;;  %v5562_v44 = vunpack.i.h.bf16 %v5560_v52 }
 0x13c   : > { %2084 = vmatprep.mubr.f32.mxu0 %v1553_v20  ;;  %v5566_v20 = vunpack.i.l.bf16 %v5565_v49 }
 0x13d   : > { %v1530_v48 = vsel %vm380_vm0, %v793_v16, %v5562_v44  ;;  %v2747_v16 = vld [vmem:[#allocation3 + $0x1] sm:$0xff] }
 0x13e   : > { %v1563_v60 = vsel %vm380_vm0, %v859_v38, %v5566_v20 }
 0x13f   : > { %2085 = vmatmul.mubr.f32.gmra.mrb[18].mxu0 %v1521_v36  ;;  %v5567_v36 = vunpack.i.h.bf16 %v5565_v49  ;;  %v1537_v49 = vsel %vm380_vm0, %v800_v3, %v5597_v11 }
 0x140   : > { %2089 = vmatprep.mubr.f32.mxu0 %v1554_v21  ;;  %v5571_v21 = vunpack.i.l.bf16 %v5570_v45 }
 0x141   : > { %v1531_v41 = vsel %vm380_vm0, %v794_v40, %v5567_v36 }
 0x142   : > { %v1564_v9 = vsel %vm380_vm0, %v860_v24, %v5571_v21  ;;  %v868_v24 = vld [vmem:[#allocation2 + $0x180] sm:$0xff] }
 0x143   : > { %2090 = vmatmul.mubr.f32.gmra.mrb[20].mxu0 %v1522_v1  ;;  %v5572_v1 = vunpack.i.h.bf16 %v5570_v45  ;;  %v2748_v45 = vld [vmem:[#allocation3 + $0x9] sm:$0xff] }
 0x144   : > { %2094 = vmatprep.mubr.f32.mxu0 %v1555_v53  ;;  %v5576_v53 = vunpack.i.l.bf16 %v5575_v46  ;;  %v5633_v21 = vpack.i.bf16 %v2748_v45, %v2747_v16 }
 0x145   : > { %v1532_v7 = vsel %vm380_vm0, %v795_v55, %v5572_v1  ;;  %v803_v55 = vld [vmem:[#allocation2 + $0x169] sm:$0xff] }
 0x146   : > { %v1565_v51 = vsel %vm380_vm0, %v861_v62, %v5576_v53  ;;  %5634 = vrot.lane.b32.xlu1 %v5633_v21, %s5994_s26  ;;  %v869_v62 = vld [vmem:[#allocation2 + $0x188] sm:$0xff] }
 0x147   : > { %2095 = vmatmul.mubr.f32.gmra.mrb[22].mxu0 %v1523_v63  ;;  %v5577_v63 = vunpack.i.h.bf16 %v5575_v46  ;;  %v802_v46 = vld [vmem:[#allocation2 + $0x159] sm:$0xff] }
 0x148   : > { %2099 = vmatprep.mubr.f32.mxu0 %v1556_v61  ;;  %v5581_v61 = vunpack.i.l.bf16 %v5580_v37 }
 0x149   : > { %v1533_v5 = vsel %vm380_vm0, %v796_v54, %v5577_v63 }
 0x14a   : > { %v1566_v2 = vsel %vm380_vm0, %v862_v42, %v5581_v61 }
 0x14b   : > { %2100 = vmatmul.mubr.f32.gmra.mrb[24].mxu0 %v1524_v32  ;;  %v5582_v32 = vunpack.i.h.bf16 %v5580_v37 }
 0x14c   : > { %2104 = vmatprep.mubr.f32.mxu0 %v1557_v18  ;;  %v5586_v18 = vunpack.i.l.bf16 %v5585_v22 }
 0x14d   : > { %v1534_v56 = vsel %vm380_vm0, %v797_v12, %v5582_v32  ;;  %v870_v32 = vld [vmem:[#allocation2 + $0x198] sm:$0xff] }
 0x14e   : > { %v1567_v57 = vsel %vm380_vm0, %v863_v8, %v5586_v18 }
 0x14f   : > { %2105 = vmatmul.mubr.f32.gmra.mrb[26].mxu0 %v1525_v4  ;;  %v5587_v4 = vunpack.i.h.bf16 %v5585_v22  ;;  %v804_v22 = vld [vmem:[#allocation2 + $0x171] sm:$0xff] }
 0x150   : > { %2109 = vmatprep.mubr.f32.mxu0 %v1558_v30  ;;  %v5591_v30 = vunpack.i.l.bf16 %v5590_v27 }
 0x151   : > { %v1535_v29 = vsel %vm380_vm0, %v798_v39, %v5587_v4 }
 0x153   : > { %2110 = vmatmul.mubr.f32.gmra.mrb[28].mxu0 %v1526_v17  ;;  %v864_v17 = vld [vmem:[#allocation2 + $0x150] sm:$0xff] }
 0x154   : > { %2114 = vmatprep.mubr.f32.mxu0 %v1559_v14  ;;  %v5592_v14 = vunpack.i.h.bf16 %v5590_v27  ;;  %v1568_v19 = vsel %vm380_vm0, %v864_v17, %v5591_v30  ;;  %v871_v27 = vld [vmem:[#allocation2 + $0x1a0] sm:$0xff] }
 0x156   : > { %v1536_v52 = vsel %vm380_vm0, %v799_v13, %v5592_v14 }
 0x157   : > { %2115 = vmatmul.mubr.f32.gmra.mrb[30].mxu0 %v1527_v10  ;;  %v5600_v10 = vpop.permute.xlu0 %5599 }
 0x158   : > { %2119 = vmatprep.mubr.f32.mxu0 %v1560_v33  ;;  %v5601_v28 = vunpack.i.l.bf16 %v5600_v10  ;;  %v5602_v31 = vunpack.i.h.bf16 %v5600_v10 }
 0x15a   : > { %v1570_v44 = vsel %vm380_vm0, %v7056_v35, %v5601_v28 }
 0x15b   : > { %2120 = vmatmul.mubr.f32.gmra.mrb[32].mxu0 %v1528_v34  ;;  %v1569_v34 = vsel %vm380_vm0, %v865_v43, %v5596_v15  ;;  %v5610_v20 = vpop.permute.xlu0 %5609 }
 0x15c   : > { %2124 = vmatprep.mubr.f32.mxu0 %v1561_v25  ;;  %v5605_v25 = vpop.permute.xlu1 %5604  ;;  %v5612_v1 = vunpack.i.h.bf16 %v5610_v20 }
 0x15d   : > { %v5606_v59 = vunpack.i.l.bf16 %v5605_v25  ;;  %v5607_v38 = vunpack.i.h.bf16 %v5605_v25 }
 0x15f   : > { %2125 = vmatmul.mubr.f32.gmra.mrb[34].mxu0 %v1529_v47  ;;  %v801_v47 = vld [vmem:[#allocation2 + $0x151] sm:$0xff]  ;;  %v1571_v40 = vsel %vm380_vm0, %v7062_v26, %v5606_v59  ;;  %v5620_v37 = vpop.permute.xlu0 %5619 }
 0x160   : > { %2129 = vmatprep.mubr.f32.mxu0 %v1562_v6  ;;  %v1538_v36 = vsel %vm380_vm0, %v801_v47, %v5602_v31  ;;  %v5615_v35 = vpop.permute.xlu1 %5614 }
 0x161   : > { %v5616_v53 = vunpack.i.l.bf16 %v5615_v35  ;;  %v5617_v26 = vunpack.i.h.bf16 %v5615_v35 }
 0x163   : > { %2130 = vmatmul.mubr.f32.gmra.mrb[36].mxu0 %v1530_v48  ;;  %v1573_v54 = vsel %vm380_vm0, %v869_v62, %v5616_v53  ;;  %v1541_v18 = vsel %vm380_vm0, %v804_v22, %v5617_v26 }
 0x164   : > { %2134 = vmatprep.mubr.f32.mxu0 %v1563_v60  ;;  %v5611_v60 = vunpack.i.l.bf16 %v5610_v20  ;;  %v5625_v42 = vpop.permute.xlu1 %5624 }
 0x165   : > { %v5627_v4 = vunpack.i.h.bf16 %v5625_v42 }
 0x167   : > { %2135 = vmatmul.mubr.f32.gmra.mrb[38].mxu0 %v1531_v41  ;;  %v1539_v41 = vsel %vm380_vm0, %v802_v46, %v5607_v38  ;;  %v1543_v17 = vsel %vm380_vm0, %v5983_v50, %v5627_v4 }
 0x168   : > { %2139 = vmatprep.mubr.f32.mxu0 %v1564_v9  ;;  %v1572_v9 = vsel %vm380_vm0, %v868_v24, %v5611_v60 }
 0x16b   : > { %2140 = vmatmul.mubr.f32.gmra.mrb[40].mxu0 %v1532_v7  ;;  %v1540_v7 = vsel %vm380_vm0, %v803_v55, %v5612_v1 }
 0x16c   : > { %2144 = vmatprep.mubr.f32.mxu0 %v1565_v51  ;;  %v5621_v51 = vunpack.i.l.bf16 %v5620_v37 }
 0x16e   : > { %v7115_v23 = vpop.f32.mrb[0].mxu1  ;;  %v1574_v12 = vsel %vm380_vm0, %v870_v32, %v5621_v51 }
 0x16f   : > { %2145 = vmatmul.mubr.f32.gmra.mrb[42].mxu0 %v1533_v5  ;;  %v7117_v0 = vpop.f32.mrb[1].mxu1  ;;  %v5622_v5 = vunpack.i.h.bf16 %v5620_v37 }
 0x170   : > { %2149 = vmatprep.mubr.f32.mxu0 %v1566_v2  ;;  %v5626_v2 = vunpack.i.l.bf16 %v5625_v42 }
 0x172   : > { %v7121_v33 = vpop.f32.mrb[2].mxu1  ;;  %v1575_v39 = vsel %vm380_vm0, %v871_v27, %v5626_v2 }
 0x173   : > { %2150 = vmatmul.mubr.f32.gmra.mrb[44].mxu0 %v1534_v56  ;;  %v7124_v58 = vpop.f32.mrb[3].mxu1  ;;  %v5982_v56 = vld [vmem:[#allocation2 + $0x181] sm:$0xff] }
 0x174   : > { %2154 = vmatprep.mubr.f32.mxu0 %v1567_v57  ;;  %v1542_v30 = vsel %vm380_vm0, %v5982_v56, %v5622_v5 }
 0x176   : > { %v7130_v6 = vpop.f32.mrb[4].mxu1 }
 0x177   : > { %2155 = vmatmul.mubr.f32.gmra.mrb[46].mxu0 %v1535_v29  ;;  %v7133_v48 = vpop.f32.mrb[5].mxu1 }
 0x178   : > { %2159 = vmatprep.mubr.f32.mxu0 %v1568_v19 }
 0x17a   : > { %v7140_v63 = vpop.f32.mrb[6].mxu1 }
 0x17b   : > { %2160 = vmatmul.mubr.f32.gmra.mrb[48].mxu0 %v1536_v52  ;;  %v7143_v61 = vpop.f32.mrb[7].mxu1 }
 0x17c   : > { %2164 = vmatprep.mubr.f32.mxu0 %v1569_v34 }
 0x17e   : > { %v7148_v8 = vpop.f32.mrb[8].mxu1 }
 0x17f   : > { %2165 = vmatmul.mubr.f32.gmra.mrb[50].mxu0 %v1537_v49  ;;  %v7151_v57 = vpop.f32.mrb[9].mxu1 }
 0x180   : > { %2169 = vmatprep.mubr.f32.mxu0 %v1570_v44 }
 0x182   : > { %v7155_v14 = vpop.f32.mrb[10].mxu1 }
 0x183   : > { %2170 = vmatmul.mubr.f32.gmra.mrb[52].mxu0 %v1538_v36  ;;  %v7157_v29 = vpop.f32.mrb[11].mxu1  ;;  %v7202_v36 = vld [vmem:[%s8410_s3] ss:$0 sm:$0xff] }
 0x184   : > { %2174 = vmatprep.mubr.f32.mxu0 %v1571_v40 }
 0x186   : > { %v7159_v15 = vpop.f32.mrb[12].mxu1 }
 0x187   : > { %2175 = vmatmul.mubr.f32.gmra.mrb[54].mxu0 %v1539_v41  ;;  %v7161_v19 = vpop.f32.mrb[13].mxu1 }
 0x188   : > { %2179 = vmatprep.mubr.f32.mxu0 %v1572_v9 }
 0x18a   : > { %v7163_v13 = vpop.f32.mrb[14].mxu1 }
 0x18b   : > { %2180 = vmatmul.mubr.f32.gmra.mrb[56].mxu0 %v1540_v7  ;;  %v7165_v10 = vpop.f32.mrb[15].mxu1 }
 0x18c   : > { %2184 = vmatprep.mubr.f32.mxu0 %v1573_v54 }
 0x18e   : > { %v7167_v43 = vpop.f32.mrb[16].mxu1 }
 0x18f   : > { %2185 = vmatmul.mubr.f32.gmra.mrb[58].mxu0 %v1541_v18  ;;  %v7169_v11 = vpop.f32.mrb[17].mxu1 }
 0x190   : > { %2189 = vmatprep.mubr.f32.mxu0 %v1574_v12 }
 0x192   : > { %v7171_v52 = vpop.f32.mrb[18].mxu1 }
 0x193   : > { %2190 = vmatmul.mubr.f32.gmra.mrb[60].mxu0 %v1542_v30  ;;  %v7173_v28 = vpop.f32.mrb[19].mxu1 }
 0x194   : > { %2194 = vmatprep.mubr.f32.mxu0 %v1575_v39 }
 0x196   : > { %v7175_v34 = vpop.f32.mrb[20].mxu1 }
 0x197   : > { %2195 = vmatmul.mubr.f32.gmra.mrb[62].mxu0 %v1543_v17  ;;  %v7177_v3 = vpop.f32.mrb[21].mxu1 }
 0x19a   : > { %v7179_v25 = vpop.f32.mrb[22].mxu1 }
 0x19b   : > { %v7181_v31 = vpop.f32.mrb[23].mxu1 }
 0x19e   : > { %v7183_v49 = vpop.f32.mrb[24].mxu1 }
 0x19f   : > { %v7185_v59 = vpop.f32.mrb[25].mxu1 }
 0x1a2   : > { %v7187_v44 = vpop.f32.mrb[26].mxu1 }
 0x1a3   : > { %v7189_v47 = vpop.f32.mrb[27].mxu1 }
 0x1a6   : > { %v7191_v20 = vpop.f32.mrb[28].mxu1 }
 0x1a7   : > { %v7193_v16 = vpop.f32.mrb[29].mxu1 }
 0x1ba   : > { %v7195_v45 = vpop.f32.mrb[30].mxu1 }
 0x1bb   : > { %v7197_v38 = vpop.f32.mrb[31].mxu1 }
 0x1ee   : > { %v2041_v21 = vpop.f32.mrb[0].mxu0 }
 0x1ef   : > { %v5152_v60 = vadd.f32 %v7202_v36, %v2041_v21  ;;  %v2043_v40 = vpop.f32.mrb[1].mxu0 }
 0x1f1   : > { %v2267_v46 = vadd.f32 %v5152_v60, %v7117_v0 }
 0x1f2   : > { %v2046_v35 = vpop.f32.mrb[2].mxu0 }
 0x1f3   : > { %v2425_v24 = vmax.f32 %v2267_v46, 0.0  ;;  %v5153_v1 = vadd.f32 %v7202_v36, %v2046_v35  ;;  %v2048_v41 = vpop.f32.mrb[3].mxu0 }
 0x1f5   : > { %v2489_v53 = vrot.slane %v2425_v24, 7  ;;  %v2272_v9 = vadd.f32 %v5153_v1, %v7115_v23 }
 0x1f6   : > { %v2051_v55 = vpop.f32.mrb[4].mxu0 }
 0x1f7   : > { %v2585_v37 = vsel %vm469_vm2, 0.0, %v2489_v53  ;;  %v2426_v62 = vmax.f32 %v2272_v9, 0.0  ;;  %v5154_v26 = vadd.f32 %v7202_v36, %v2051_v55  ;;  %v2053_v7 = vpop.f32.mrb[5].mxu0 }
 0x1f8   : > { %2618 = vst.msk [vmem:[#allocation3 + $0x18] sm:$0xff] %vm380_vm0, %v2585_v37 }
 0x1f9   : > { %v2490_v51 = vrot.slane %v2426_v62, 7  ;;  %v2277_v0 = vadd.f32 %v5154_v26, %v7124_v58 }
 0x1fa   : > { %v2056_v54 = vpop.f32.mrb[6].mxu0 }
 0x1fb   : > { %v2491_v22 = vsel %vm469_vm2, %v2489_v53, %v2490_v51  ;;  %v2601_v42 = vsel %vm469_vm2, %v2490_v51, 0.0  ;;  %v2427_v32 = vmax.f32 %v2277_v0, 0.0  ;;  %v5155_v23 = vadd.f32 %v7202_v36, %v2056_v54  ;;  %v2058_v5 = vpop.f32.mrb[7].mxu0 }
 0x1fc   : > { %2619 = vst.msk [vmem:[#allocation3 + $0x20] sm:$0xff] %vm380_vm0, %v2491_v22 }
 0x1fd   : > { %2620 = vst.msk [vmem:[#allocation3 + $0x28] sm:$0x3] %vm383_vm1, %v2601_v42  ;;  %v2492_v18 = vrot.slane %v2427_v32, 7  ;;  %v2282_v2 = vadd.f32 %v5155_v23, %v7121_v33 }
 0x1fe   : > { %v2061_v12 = vpop.f32.mrb[8].mxu0 }
 0x1ff   : > { %v2586_v27 = vsel %vm469_vm2, 0.0, %v2492_v18  ;;  %v2428_v58 = vmax.f32 %v2282_v2, 0.0  ;;  %v5156_v4 = vadd.f32 %v7202_v36, %v2061_v12  ;;  %v2063_v56 = vpop.f32.mrb[9].mxu0  ;;  %v7222_v17 = vld [vmem:[#allocation3 + $0x18] sm:$0xff] }
 0x200   : > { %2621 = vst.msk [vmem:[#allocation3 + $0x30] sm:$0xff] %vm380_vm0, %v2586_v27 }
 0x201   : > { %v2493_v30 = vrot.slane %v2428_v58, 7  ;;  %v2287_v39 = vadd.f32 %v5156_v4, %v7133_v48 }
 0x202   : > { %v2066_v50 = vpop.f32.mrb[10].mxu0 }
 0x203   : > { %v2494_v21 = vsel %vm469_vm2, %v2492_v18, %v2493_v30  ;;  %v2602_v60 = vsel %vm469_vm2, %v2493_v30, 0.0  ;;  %v2429_v33 = vmax.f32 %v2287_v39, 0.0  ;;  %v5157_v40 = vadd.f32 %v7202_v36, %v2066_v50  ;;  %v2068_v46 = vpop.f32.mrb[11].mxu0  ;;  %v7227_v35 = vld [vmem:[#allocation3 + $0x20] sm:$0xff] }
 0x204   : > { %v2749_v24 = vld [vmem:[#allocation3 + $0x19] sm:$0xff]  ;;  %v2750_v1 = vld [vmem:[#allocation3 + $0x21] sm:$0xff]  ;;  %2622 = vst.msk [vmem:[#allocation3 + $0x38] sm:$0xff] %vm380_vm0, %v2494_v21  ;;  %v5628_v48 = vpack.i.bf16 %v7227_v35, %v7222_v17 }
 0x205   : > { %2623 = vst.msk [vmem:[#allocation3 + $0x40] sm:$0x3] %vm383_vm1, %v2602_v60  ;;  %v5643_v41 = vpack.i.bf16 %v2750_v1, %v2749_v24  ;;  %v2495_v53 = vrot.slane %v2429_v33, 7  ;;  %v2292_v9 = vadd.f32 %v5157_v40, %v7130_v6 }
 0x206   : > { %v2071_v55 = vpop.f32.mrb[12].mxu0  ;;  %5629 = vrot.lane.b32.xlu0 %v5628_v48, %s5994_s26 }
 0x207   : > { %5644 = vrot.lane.b32.xlu1 %v5643_v41, %s5994_s26  ;;  %v2587_v37 = vsel %vm469_vm2, 0.0, %v2495_v53  ;;  %v2430_v62 = vmax.f32 %v2292_v9, 0.0  ;;  %v5158_v26 = vadd.f32 %v7202_v36, %v2071_v55  ;;  %v2073_v7 = vpop.f32.mrb[13].mxu0  ;;  %v7240_v22 = vld [vmem:[#allocation3 + $0x30] sm:$0xff] }
 0x208   : > { %2624 = vst.msk [vmem:[#allocation3 + $0x48] sm:$0xff] %vm380_vm0, %v2587_v37 }
 0x209   : > { %v2496_v51 = vrot.slane %v2430_v62, 7  ;;  %v2297_v0 = vadd.f32 %v5158_v26, %v7143_v61 }
 0x20a   : > { %v2076_v54 = vpop.f32.mrb[14].mxu0 }
 0x20b   : > { %v2497_v6 = vsel %vm469_vm2, %v2495_v53, %v2496_v51  ;;  %v2603_v42 = vsel %vm469_vm2, %v2496_v51, 0.0  ;;  %v2431_v32 = vmax.f32 %v2297_v0, 0.0  ;;  %v5159_v23 = vadd.f32 %v7202_v36, %v2076_v54  ;;  %v2078_v5 = vpop.f32.mrb[15].mxu0  ;;  %v7245_v18 = vld [vmem:[#allocation3 + $0x38] sm:$0xff] }
 0x20c   : > { %v2751_v2 = vld [vmem:[#allocation3 + $0x31] sm:$0xff]  ;;  %v2752_v12 = vld [vmem:[#allocation3 + $0x39] sm:$0xff]  ;;  %2625 = vst.msk [vmem:[#allocation3 + $0x50] sm:$0xff] %vm380_vm0, %v2497_v6  ;;  %v5638_v61 = vpack.i.bf16 %v7245_v18, %v7240_v22 }
 0x20d   : > { %2626 = vst.msk [vmem:[#allocation3 + $0x58] sm:$0x3] %vm383_vm1, %v2603_v42  ;;  %v7251_v27 = vpack.i.bf16 %v2752_v12, %v2751_v2  ;;  %v2498_v58 = vrot.slane %v2431_v32, 7  ;;  %v2302_v4 = vadd.f32 %v5159_v23, %v7140_v63 }
 0x20e   : > { %v2081_v56 = vpop.f32.mrb[16].mxu0  ;;  %5639 = vrot.lane.b32.xlu0 %v5638_v61, %s5994_s26 }
 0x20f   : > { %5654 = vrot.lane.b32.xlu1 %v7251_v27, %s5994_s26  ;;  %v2588_v30 = vsel %vm469_vm2, 0.0, %v2498_v58  ;;  %v2432_v39 = vmax.f32 %v2302_v4, 0.0  ;;  %v5160_v50 = vadd.f32 %v7202_v36, %v2081_v56  ;;  %v2083_v21 = vpop.f32.mrb[17].mxu0  ;;  %v7261_v46 = vld [vmem:[#allocation3 + $0x48] sm:$0xff] }
 0x210   : > { %2627 = vst.msk [vmem:[#allocation3 + $0x60] sm:$0xff] %vm380_vm0, %v2588_v30 }
 0x211   : > { %v2499_v60 = vrot.slane %v2432_v39, 7  ;;  %v2307_v33 = vadd.f32 %v5160_v50, %v7151_v57 }
 0x212   : > { %v2086_v40 = vpop.f32.mrb[18].mxu0 }
 0x213   : > { %v2500_v63 = vsel %vm469_vm2, %v2498_v58, %v2499_v60  ;;  %v2604_v24 = vsel %vm469_vm2, %v2499_v60, 0.0  ;;  %v2433_v1 = vmax.f32 %v2307_v33, 0.0  ;;  %v5161_v48 = vadd.f32 %v7202_v36, %v2086_v40  ;;  %v2088_v41 = vpop.f32.mrb[19].mxu0  ;;  %v7266_v53 = vld [vmem:[#allocation3 + $0x50] sm:$0xff] }
 0x214   : > { %v2753_v9 = vld [vmem:[#allocation3 + $0x49] sm:$0xff]  ;;  %v2754_v55 = vld [vmem:[#allocation3 + $0x51] sm:$0xff]  ;;  %2628 = vst.msk [vmem:[#allocation3 + $0x68] sm:$0xff] %vm380_vm0, %v2500_v63  ;;  %v5648_v57 = vpack.i.bf16 %v7266_v53, %v7261_v46 }
 0x215   : > { %2629 = vst.msk [vmem:[#allocation3 + $0x70] sm:$0x3] %vm383_vm1, %v2604_v24  ;;  %v7272_v37 = vpack.i.bf16 %v2754_v55, %v2753_v9  ;;  %v2501_v62 = vrot.slane %v2433_v1, 7  ;;  %v2312_v26 = vadd.f32 %v5161_v48, %v7148_v8 }
 0x216   : > { %v2091_v7 = vpop.f32.mrb[20].mxu0  ;;  %5649 = vrot.lane.b32.xlu0 %v5648_v57, %s5994_s26 }
 0x217   : > { %5664 = vrot.lane.b32.xlu1 %v7272_v37, %s5994_s26  ;;  %v2589_v51 = vsel %vm469_vm2, 0.0, %v2501_v62  ;;  %v2434_v0 = vmax.f32 %v2312_v26, 0.0  ;;  %v5162_v54 = vadd.f32 %v7202_v36, %v2091_v7  ;;  %v2093_v6 = vpop.f32.mrb[21].mxu0  ;;  %v7282_v5 = vld [vmem:[#allocation3 + $0x60] sm:$0xff] }
 0x218   : > { %2630 = vst.msk [vmem:[#allocation3 + $0x78] sm:$0xff] %vm380_vm0, %v2589_v51 }
 0x219   : > { %v2502_v42 = vrot.slane %v2434_v0, 7  ;;  %v2317_v32 = vadd.f32 %v5162_v54, %v7157_v29 }
 0x21a   : > { %v2096_v23 = vpop.f32.mrb[22].mxu0 }
 0x21b   : > { %v2503_v8 = vsel %vm469_vm2, %v2501_v62, %v2502_v42  ;;  %v2605_v2 = vsel %vm469_vm2, %v2502_v42, 0.0  ;;  %v2435_v12 = vmax.f32 %v2317_v32, 0.0  ;;  %v5163_v61 = vadd.f32 %v7202_v36, %v2096_v23  ;;  %v2098_v58 = vpop.f32.mrb[23].mxu0  ;;  %v7287_v4 = vld [vmem:[#allocation3 + $0x68] sm:$0xff] }
 0x21c   : > { %v2755_v56 = vld [vmem:[#allocation3 + $0x61] sm:$0xff]  ;;  %v2756_v30 = vld [vmem:[#allocation3 + $0x69] sm:$0xff]  ;;  %2631 = vst.msk [vmem:[#allocation3 + $0x80] sm:$0xff] %vm380_vm0, %v2503_v8  ;;  %v5658_v29 = vpack.i.bf16 %v7287_v4, %v7282_v5 }
 0x21d   : > { %2632 = vst.msk [vmem:[#allocation3 + $0x88] sm:$0x3] %vm383_vm1, %v2605_v2  ;;  %v7293_v39 = vpack.i.bf16 %v2756_v30, %v2755_v56  ;;  %v2504_v50 = vrot.slane %v2435_v12, 7  ;;  %v2322_v21 = vadd.f32 %v5163_v61, %v7155_v14 }
 0x21e   : > { %v2101_v60 = vpop.f32.mrb[24].mxu0  ;;  %5659 = vrot.lane.b32.xlu0 %v5658_v29, %s5994_s26 }
 0x21f   : > { %5674 = vrot.lane.b32.xlu1 %v7293_v39, %s5994_s26  ;;  %v2590_v33 = vsel %vm469_vm2, 0.0, %v2504_v50  ;;  %v2436_v40 = vmax.f32 %v2322_v21, 0.0  ;;  %v5164_v63 = vadd.f32 %v7202_v36, %v2101_v60  ;;  %v2103_v24 = vpop.f32.mrb[25].mxu0  ;;  %v7303_v9 = vld [vmem:[#allocation3 + $0x78] sm:$0xff] }
 0x220   : > { %2633 = vst.msk [vmem:[#allocation3 + $0x90] sm:$0xff] %vm380_vm0, %v2590_v33 }
 0x221   : > { %v2505_v1 = vrot.slane %v2436_v40, 7  ;;  %v2327_v48 = vadd.f32 %v5164_v63, %v7161_v19 }
 0x222   : > { %v2106_v41 = vpop.f32.mrb[26].mxu0 }
 0x223   : > { %v2506_v14 = vsel %vm469_vm2, %v2504_v50, %v2505_v1  ;;  %v2606_v55 = vsel %vm469_vm2, %v2505_v1, 0.0  ;;  %v2437_v57 = vmax.f32 %v2327_v48, 0.0  ;;  %v5165_v62 = vadd.f32 %v7202_v36, %v2106_v41  ;;  %v2108_v26 = vpop.f32.mrb[27].mxu0  ;;  %v7308_v7 = vld [vmem:[#allocation3 + $0x80] sm:$0xff] }
 0x224   : > { %v2757_v51 = vld [vmem:[#allocation3 + $0x79] sm:$0xff]  ;;  %v2758_v0 = vld [vmem:[#allocation3 + $0x81] sm:$0xff]  ;;  %2634 = vst.msk [vmem:[#allocation3 + $0x98] sm:$0xff] %vm380_vm0, %v2506_v14  ;;  %v5668_v19 = vpack.i.bf16 %v7308_v7, %v7303_v9 }
 0x225   : > { %2635 = vst.msk [vmem:[#allocation3 + $0xa0] sm:$0x3] %vm383_vm1, %v2606_v55  ;;  %v7314_v54 = vpack.i.bf16 %v2758_v0, %v2757_v51  ;;  %v2507_v6 = vrot.slane %v2437_v57, 7  ;;  %v2332_v42 = vadd.f32 %v5165_v62, %v7159_v15 }
 0x226   : > { %v2111_v32 = vpop.f32.mrb[28].mxu0  ;;  %5669 = vrot.lane.b32.xlu0 %v5668_v19, %s5994_s26 }
 0x227   : > { %5684 = vrot.lane.b32.xlu1 %v7314_v54, %s5994_s26  ;;  %v2591_v23 = vsel %vm469_vm2, 0.0, %v2507_v6  ;;  %v2438_v8 = vmax.f32 %v2332_v42, 0.0  ;;  %v5166_v2 = vadd.f32 %v7202_v36, %v2111_v32  ;;  %v2113_v12 = vpop.f32.mrb[29].mxu0  ;;  %v7324_v30 = vld [vmem:[#allocation3 + $0x90] sm:$0xff] }
 0x228   : > { %2636 = vst.msk [vmem:[#allocation3 + $0xa8] sm:$0xff] %vm380_vm0, %v2591_v23  ;;  %8526 = vst [vmem:[#allocation22_spill] sm:$0xff] %v7324_v30 }
 0x229   : > { %v2508_v61 = vrot.slane %v2438_v8, 7  ;;  %v2337_v58 = vadd.f32 %v5166_v2, %v7165_v10 }
 0x22a   : > { %v2116_v56 = vpop.f32.mrb[30].mxu0 }
 0x22b   : > { %v2509_v15 = vsel %vm469_vm2, %v2507_v6, %v2508_v61  ;;  %v2607_v29 = vsel %vm469_vm2, %v2508_v61, 0.0  ;;  %v2439_v50 = vmax.f32 %v2337_v58, 0.0  ;;  %v5167_v21 = vadd.f32 %v7202_v36, %v2116_v56  ;;  %v2118_v60 = vpop.f32.mrb[31].mxu0  ;;  %v7329_v33 = vld [vmem:[#allocation3 + $0x98] sm:$0xff] }
 0x22c   : > { %8527 = vst [vmem:[#allocation6_spill] sm:$0xff] %v7329_v33  ;;  %v2759_v40 = vld [vmem:[#allocation3 + $0x91] sm:$0xff]  ;;  %v2760_v63 = vld [vmem:[#allocation3 + $0x99] sm:$0xff]  ;;  %2637 = vst.msk [vmem:[#allocation3 + $0xb0] sm:$0xff] %vm380_vm0, %v2509_v15  ;;  %v5678_v10 = vpack.i.bf16 %v7329_v33, %v7324_v30 }
 0x22d   : > { %2638 = vst.msk [vmem:[#allocation3 + $0xb8] sm:$0x3] %vm383_vm1, %v2607_v29  ;;  %v7335_v24 = vpack.i.bf16 %v2760_v63, %v2759_v40  ;;  %v2510_v1 = vrot.slane %v2439_v50, 7  ;;  %v2342_v48 = vadd.f32 %v5167_v21, %v7163_v13 }
 0x22e   : > { %v2121_v41 = vpop.f32.mrb[32].mxu0  ;;  %5679 = vrot.lane.b32.xlu0 %v5678_v10, %s5994_s26 }
 0x22f   : > { %5694 = vrot.lane.b32.xlu1 %v7335_v24, %s5994_s26  ;;  %v2592_v14 = vsel %vm469_vm2, 0.0, %v2510_v1  ;;  %v2440_v55 = vmax.f32 %v2342_v48, 0.0  ;;  %v5168_v57 = vadd.f32 %v7202_v36, %v2121_v41  ;;  %v2123_v62 = vpop.f32.mrb[33].mxu0  ;;  %v7345_v19 = vld [vmem:[#allocation3 + $0xa8] sm:$0xff] }
 0x230   : > { %2639 = vst.msk [vmem:[#allocation3 + $0xc0] sm:$0xff] %vm380_vm0, %v2592_v14  ;;  %8528 = vst [vmem:[#allocation7_spill] sm:$0xff] %v7345_v19 }
 0x231   : > { %v2511_v26 = vrot.slane %v2440_v55, 7  ;;  %v2347_v51 = vadd.f32 %v5168_v57, %v7169_v11 }
 0x232   : > { %v2126_v0 = vpop.f32.mrb[34].mxu0 }
 0x233   : > { %v2512_v13 = vsel %vm469_vm2, %v2510_v1, %v2511_v26  ;;  %v2608_v6 = vsel %vm469_vm2, %v2511_v26, 0.0  ;;  %v2441_v42 = vmax.f32 %v2347_v51, 0.0  ;;  %v5169_v32 = vadd.f32 %v7202_v36, %v2126_v0  ;;  %v2128_v23 = vpop.f32.mrb[35].mxu0  ;;  %v7350_v8 = vld [vmem:[#allocation3 + $0xb0] sm:$0xff] }
 0x234   : > { %8529 = vst [vmem:[#allocation8_spill] sm:$0xff] %v7350_v8  ;;  %v2761_v2 = vld [vmem:[#allocation3 + $0xa9] sm:$0xff]  ;;  %v2762_v12 = vld [vmem:[#allocation3 + $0xb1] sm:$0xff]  ;;  %2640 = vst.msk [vmem:[#allocation3 + $0xc8] sm:$0xff] %vm380_vm0, %v2512_v13  ;;  %v5688_v11 = vpack.i.bf16 %v7350_v8, %v7345_v19 }
 0x235   : > { %2641 = vst.msk [vmem:[#allocation3 + $0xd0] sm:$0x3] %vm383_vm1, %v2608_v6  ;;  %v7356_v61 = vpack.i.bf16 %v2762_v12, %v2761_v2  ;;  %v2513_v58 = vrot.slane %v2441_v42, 7  ;;  %v2352_v56 = vadd.f32 %v5169_v32, %v7167_v43 }
 0x236   : > { %v2131_v15 = vpop.f32.mrb[36].mxu0  ;;  %5689 = vrot.lane.b32.xlu0 %v5688_v11, %s5994_s26 }
 0x237   : > { %5704 = vrot.lane.b32.xlu1 %v7356_v61, %s5994_s26  ;;  %v2593_v29 = vsel %vm469_vm2, 0.0, %v2513_v58  ;;  %v2442_v50 = vmax.f32 %v2352_v56, 0.0  ;;  %v5170_v21 = vadd.f32 %v7202_v36, %v2131_v15  ;;  %v2133_v60 = vpop.f32.mrb[37].mxu0  ;;  %v7366_v1 = vld [vmem:[#allocation3 + $0xc0] sm:$0xff] }
 0x238   : > { %2642 = vst.msk [vmem:[#allocation3 + $0xd8] sm:$0xff] %vm380_vm0, %v2593_v29  ;;  %8530 = vst [vmem:[#allocation9_spill] sm:$0xff] %v7366_v1 }
 0x239   : > { %v2514_v40 = vrot.slane %v2442_v50, 7  ;;  %v2357_v63 = vadd.f32 %v5170_v21, %v7173_v28 }
 0x23a   : > { %v2136_v10 = vpop.f32.mrb[38].mxu0 }
 0x23b   : > { %v2515_v43 = vsel %vm469_vm2, %v2513_v58, %v2514_v40  ;;  %v2609_v48 = vsel %vm469_vm2, %v2514_v40, 0.0  ;;  %v2443_v41 = vmax.f32 %v2357_v63, 0.0  ;;  %v5171_v14 = vadd.f32 %v7202_v36, %v2136_v10  ;;  %v2138_v55 = vpop.f32.mrb[39].mxu0  ;;  %v7371_v57 = vld [vmem:[#allocation3 + $0xc8] sm:$0xff] }
 0x23c   : > { %8531 = vst [vmem:[#allocation10_spill] sm:$0xff] %v7371_v57  ;;  %v2763_v62 = vld [vmem:[#allocation3 + $0xc1] sm:$0xff]  ;;  %v2764_v26 = vld [vmem:[#allocation3 + $0xc9] sm:$0xff]  ;;  %2643 = vst.msk [vmem:[#allocation3 + $0xe0] sm:$0xff] %vm380_vm0, %v2515_v43  ;;  %v5698_v28 = vpack.i.bf16 %v7371_v57, %v7366_v1 }
 0x23d   : > { %2644 = vst.msk [vmem:[#allocation3 + $0xe8] sm:$0x3] %vm383_vm1, %v2609_v48  ;;  %v7377_v51 = vpack.i.bf16 %v2764_v26, %v2763_v62  ;;  %v2516_v0 = vrot.slane %v2443_v41, 7  ;;  %v2362_v13 = vadd.f32 %v5171_v14, %v7171_v52  ;;  %v2716_v1 = vld [vmem:[#allocation3 + $0x8] sm:$0xff] }
 0x23e   : > { %v2141_v6 = vpop.f32.mrb[40].mxu0  ;;  %5699 = vrot.lane.b32.xlu0 %v5698_v28, %s5994_s26 }
 0x23f   : > { %5714 = vrot.lane.b32.xlu1 %v7377_v51, %s5994_s26  ;;  %v2594_v42 = vsel %vm469_vm2, 0.0, %v2516_v0  ;;  %v2444_v32 = vmax.f32 %v2362_v13, 0.0  ;;  %v5172_v23 = vadd.f32 %v7202_v36, %v2141_v6  ;;  %v2143_v2 = vpop.f32.mrb[41].mxu0  ;;  %v7387_v56 = vld [vmem:[#allocation3 + $0xd8] sm:$0xff] }
 0x240   : > { %2645 = vst.msk [vmem:[#allocation3 + $0xf0] sm:$0xff] %vm380_vm0, %v2594_v42  ;;  %8532 = vst [vmem:[#allocation11_spill] sm:$0xff] %v7387_v56  ;;  %v7416_v42 = vld [vmem:[#allocation3 + $0x32] sm:$0xff] }
 0x241   : > { %v2517_v12 = vrot.slane %v2444_v32, 7  ;;  %v2367_v11 = vadd.f32 %v5172_v23, %v7177_v3  ;;  %v7418_v32 = vld [vmem:[#allocation3 + $0x3a] sm:$0xff] }
 0x242   : > { %v2146_v58 = vpop.f32.mrb[42].mxu0 }
 0x243   : > { %v2518_v52 = vsel %vm469_vm2, %v2516_v0, %v2517_v12  ;;  %v2610_v15 = vsel %vm469_vm2, %v2517_v12, 0.0  ;;  %v2445_v29 = vmax.f32 %v2367_v11, 0.0  ;;  %v5173_v50 = vadd.f32 %v7202_v36, %v2146_v58  ;;  %v2148_v21 = vpop.f32.mrb[43].mxu0  ;;  %v7392_v60 = vld [vmem:[#allocation3 + $0xe0] sm:$0xff] }
 0x244   : > { %8533 = vst [vmem:[#allocation12_spill] sm:$0xff] %v7392_v60  ;;  %v2765_v40 = vld [vmem:[#allocation3 + $0xd9] sm:$0xff]  ;;  %v2766_v63 = vld [vmem:[#allocation3 + $0xe1] sm:$0xff]  ;;  %2646 = vst.msk [vmem:[#allocation3 + $0xf8] sm:$0xff] %vm380_vm0, %v2518_v52  ;;  %v5708_v3 = vpack.i.bf16 %v7392_v60, %v7387_v56 }
 0x245   : > { %2647 = vst.msk [vmem:[#allocation3 + $0x100] sm:$0x3] %vm383_vm1, %v2610_v15  ;;  %v7398_v10 = vpack.i.bf16 %v2766_v63, %v2765_v40  ;;  %v2519_v43 = vrot.slane %v2445_v29, 7  ;;  %v2372_v48 = vadd.f32 %v5173_v50, %v7175_v34  ;;  %v7504_v63 = vld [vmem:[#allocation3 + $0x62] sm:$0xff] }
 0x246   : > { %v2151_v41 = vpop.f32.mrb[44].mxu0  ;;  %5709 = vrot.lane.b32.xlu0 %v5708_v3, %s5994_s26 }
 0x247   : > { %5724 = vrot.lane.b32.xlu1 %v7398_v10, %s5994_s26  ;;  %v2595_v14 = vsel %vm469_vm2, 0.0, %v2519_v43  ;;  %v2446_v55 = vmax.f32 %v2372_v48, 0.0  ;;  %v5174_v62 = vadd.f32 %v7202_v36, %v2151_v41  ;;  %v2153_v26 = vpop.f32.mrb[45].mxu0  ;;  %v7414_v6 = vld [vmem:[#allocation3 + $0xf0] sm:$0xff]  ;;  %v7444_v41 = vpack.c.bf16 %v7418_v32, %v7416_v42 }
 0x248   : > { %2648 = vst.msk [vmem:[#allocation3 + $0x108] sm:$0xff] %vm380_vm0, %v2595_v14  ;;  %8536 = vst [vmem:[#allocation13_spill] sm:$0xff] %v7414_v6 }
 0x249   : > { %v2520_v28 = vrot.slane %v2446_v55, 7  ;;  %v2377_v0 = vadd.f32 %v5174_v62, %v7181_v31  ;;  %8539 = vst [vmem:[#allocation16_spill] sm:$0xff] %v7444_v41 }
 0x24a   : > { %v2156_v13 = vpop.f32.mrb[46].mxu0 }
 0x24b   : > { %v2521_v23 = vsel %vm469_vm2, %v2519_v43, %v2520_v28  ;;  %v2611_v2 = vsel %vm469_vm2, %v2520_v28, 0.0  ;;  %v2447_v12 = vmax.f32 %v2377_v0, 0.0  ;;  %v5175_v31 = vadd.f32 %v7202_v36, %v2156_v13  ;;  %v2158_v11 = vpop.f32.mrb[47].mxu0  ;;  %v7423_v58 = vld [vmem:[#allocation3 + $0xf2] sm:$0xff] }
 0x24c   : > { %v7425_v52 = vld [vmem:[#allocation3 + $0xfa] sm:$0xff]  ;;  %2649 = vst.msk [vmem:[#allocation3 + $0x110] sm:$0xff] %vm380_vm0, %v2521_v23  ;;  %v2767_v21 = vld [vmem:[#allocation3 + $0xf1] sm:$0xff] }
 0x24d   : > { %v7427_v15 = vld [vmem:[#allocation3 + $0xf8] sm:$0xff]  ;;  %2650 = vst.msk [vmem:[#allocation3 + $0x118] sm:$0x3] %vm383_vm1, %v2611_v2  ;;  %v7433_v29 = vpack.c.bf16 %v7425_v52, %v7423_v58  ;;  %v2522_v3 = vrot.slane %v2447_v12, 7  ;;  %v2382_v43 = vadd.f32 %v5175_v31, %v7179_v25  ;;  %v7461_v2 = vld [vmem:[#allocation3 + $0x4a] sm:$0xff] }
 0x24e   : > { %8537 = vst [vmem:[#allocation14_spill] sm:$0xff] %v7427_v15  ;;  %v5718_v50 = vpack.i.bf16 %v7427_v15, %v7414_v6  ;;  %v2768_v40 = vld [vmem:[#allocation3 + $0xf9] sm:$0xff]  ;;  %v2161_v14 = vpop.f32.mrb[48].mxu0 }
 0x24f   : > { %8538 = vst [vmem:[#allocation15_spill] sm:$0xff] %v7433_v29  ;;  %v7440_v48 = vpack.i.bf16 %v2768_v40, %v2767_v21  ;;  %5090 = vmatprep.subr.msk.bf16.mxu0 %vm7410_vm3, %v7433_v29  ;;  %v2596_v55 = vsel %vm469_vm2, 0.0, %v2522_v3  ;;  %v2448_v62 = vmax.f32 %v2382_v43, 0.0  ;;  %v5176_v26 = vadd.f32 %v7202_v36, %v2161_v14  ;;  %v2163_v25 = vpop.f32.mrb[49].mxu0  ;;  %v7459_v23 = vld [vmem:[#allocation3 + $0x108] sm:$0xff]  ;;  %v7463_v12 = vld [vmem:[#allocation3 + $0x52] sm:$0xff] }
 0x250   : > { %5719 = vrot.lane.b32.xlu0 %v5718_v50, %s5994_s26  ;;  %5093 = vmatpush3.bf16.xpose.msk.msra.mxu0 %vm7410_vm3, %v7444_v41  ;;  %2651 = vst.msk [vmem:[#allocation3 + $0x120] sm:$0xff] %vm380_vm0, %v2596_v55  ;;  %8540 = vst [vmem:[#allocation17_spill] sm:$0xff] %v7459_v23 }
 0x251   : > { %5734 = vrot.lane.b32.xlu1 %v7440_v48, %s5994_s26  ;;  %v2523_v28 = vrot.slane %v2448_v62, 7  ;;  %v2387_v0 = vadd.f32 %v5176_v26, %v7185_v59 }
 0x252   : > { %v2166_v13 = vpop.f32.mrb[50].mxu0 }
 0x253   : > { %v2524_v31 = vsel %vm469_vm2, %v2522_v3, %v2523_v28  ;;  %v2612_v11 = vsel %vm469_vm2, %v2523_v28, 0.0  ;;  %v2449_v50 = vmax.f32 %v2387_v0, 0.0  ;;  %v5177_v21 = vadd.f32 %v7202_v36, %v2166_v13  ;;  %v2168_v40 = vpop.f32.mrb[51].mxu0  ;;  %v7468_v43 = vld [vmem:[#allocation3 + $0x10a] sm:$0xff] }
 0x254   : > { %v7470_v14 = vld [vmem:[#allocation3 + $0x112] sm:$0xff]  ;;  %2652 = vst.msk [vmem:[#allocation3 + $0x128] sm:$0xff] %vm380_vm0, %v2524_v31  ;;  %v2769_v62 = vld [vmem:[#allocation3 + $0x109] sm:$0xff]  ;;  %v7487_v13 = vpack.c.bf16 %v7463_v12, %v7461_v2 }
 0x255   : > { %v7472_v59 = vld [vmem:[#allocation3 + $0x110] sm:$0xff]  ;;  %2653 = vst.msk [vmem:[#allocation3 + $0x130] sm:$0x3] %vm383_vm1, %v2612_v11  ;;  %v7478_v55 = vpack.c.bf16 %v7470_v14, %v7468_v43  ;;  %v2525_v25 = vrot.slane %v2449_v50, 7  ;;  %v2392_v28 = vadd.f32 %v5177_v21, %v7183_v49 }
 0x256   : > { %8541 = vst [vmem:[#allocation18_spill] sm:$0xff] %v7472_v59  ;;  %v5728_v3 = vpack.i.bf16 %v7472_v59, %v7459_v23  ;;  %v2770_v26 = vld [vmem:[#allocation3 + $0x111] sm:$0xff]  ;;  %8543 = vst [vmem:[#allocation20_spill] sm:$0xff] %v7487_v13  ;;  %v2171_v31 = vpop.f32.mrb[52].mxu0 }
 0x257   : > { %8542 = vst [vmem:[#allocation19_spill] sm:$0xff] %v7478_v55  ;;  %v7483_v0 = vpack.i.bf16 %v2770_v26, %v2769_v62  ;;  %5096 = vmatprep.subr.msk.bf16.mxu0 %vm7410_vm3, %v7478_v55  ;;  %v2597_v11 = vsel %vm469_vm2, 0.0, %v2525_v25  ;;  %v2450_v40 = vmax.f32 %v2392_v28, 0.0  ;;  %v5178_v50 = vadd.f32 %v7202_v36, %v2171_v31  ;;  %v2173_v49 = vpop.f32.mrb[53].mxu0  ;;  %v7506_v28 = vld [vmem:[#allocation3 + $0x6a] sm:$0xff] }
 0x258   : > { %5729 = vrot.lane.b32.xlu0 %v5728_v3, %s5994_s26  ;;  %5099 = vmatpush3.bf16.xpose.msk.msra.mxu0 %vm7410_vm3, %v7487_v13  ;;  %2654 = vst.msk [vmem:[#allocation3 + $0x138] sm:$0xff] %vm380_vm0, %v2597_v11  ;;  %v7502_v3 = vld [vmem:[#allocation3 + $0x120] sm:$0xff]  ;;  %v7530_v23 = vpack.c.bf16 %v7506_v28, %v7504_v63 }
 0x259   : > { %5744 = vrot.lane.b32.xlu1 %v7483_v0, %s5994_s26  ;;  %v2526_v21 = vrot.slane %v2450_v40, 7  ;;  %v2397_v62 = vadd.f32 %v5178_v50, %v7189_v47  ;;  %8544 = vst [vmem:[#allocation21_spill] sm:$0xff] %v7502_v3 }
 0x25a   : > { %v2176_v26 = vpop.f32.mrb[54].mxu0  ;;  %8548 = vst [vmem:[#allocation26_spill] sm:$0xff] %v7530_v23 }
 0x25b   : > { %v2527_v31 = vsel %vm469_vm2, %v2525_v25, %v2526_v21  ;;  %v2613_v49 = vsel %vm469_vm2, %v2526_v21, 0.0  ;;  %v2451_v55 = vmax.f32 %v2397_v62, 0.0  ;;  %v5179_v41 = vadd.f32 %v7202_v36, %v2176_v26  ;;  %v2178_v13 = vpop.f32.mrb[55].mxu0  ;;  %v7511_v29 = vld [vmem:[#allocation3 + $0x122] sm:$0xff] }
 0x25c   : > { %v7513_v11 = vld [vmem:[#allocation3 + $0x12a] sm:$0xff]  ;;  %2655 = vst.msk [vmem:[#allocation3 + $0x140] sm:$0xff] %vm380_vm0, %v2527_v31  ;;  %v2771_v50 = vld [vmem:[#allocation3 + $0x121] sm:$0xff] }
 0x25d   : > { %v7515_v47 = vld [vmem:[#allocation3 + $0x128] sm:$0xff]  ;;  %2656 = vst.msk [vmem:[#allocation3 + $0x148] sm:$0x3] %vm383_vm1, %v2613_v49  ;;  %v7521_v40 = vpack.c.bf16 %v7513_v11, %v7511_v29  ;;  %v2528_v13 = vrot.slane %v2451_v55, 7  ;;  %v2402_v62 = vadd.f32 %v5179_v41, %v7187_v44 }
 0x25e   : > { %8545 = vst [vmem:[#allocation23_spill] sm:$0xff] %v7515_v47  ;;  %v5738_v25 = vpack.i.bf16 %v7515_v47, %v7502_v3  ;;  %v2772_v21 = vld [vmem:[#allocation3 + $0x129] sm:$0xff]  ;;  %v2181_v31 = vpop.f32.mrb[56].mxu0 }
 0x25f   : > { %8546 = vst [vmem:[#allocation24_spill] sm:$0xff] %v7521_v40  ;;  %v7526_v26 = vpack.i.bf16 %v2772_v21, %v2771_v50  ;;  %5102 = vmatprep.subr.msk.bf16.mxu0 %vm7410_vm3, %v7521_v40  ;;  %v2598_v49 = vsel %vm469_vm2, 0.0, %v2528_v13  ;;  %v2452_v3 = vmax.f32 %v2402_v62, 0.0  ;;  %v5180_v55 = vadd.f32 %v7202_v36, %v2181_v31  ;;  %v2183_v44 = vpop.f32.mrb[57].mxu0  ;;  %v7547_v40 = vld [vmem:[#allocation3 + $0x7a] sm:$0xff]  ;;  %v7549_v62 = vld [vmem:[#allocation3 + $0x82] sm:$0xff] }
 0x260   : > { %5739 = vrot.lane.b32.xlu0 %v5738_v25, %s5994_s26  ;;  %5105 = vmatpush3.bf16.xpose.msk.msra.mxu0 %vm7410_vm3, %v7530_v23  ;;  %2657 = vst.msk [vmem:[#allocation3 + $0x150] sm:$0xff] %vm380_vm0, %v2598_v49  ;;  %v7545_v25 = vld [vmem:[#allocation3 + $0x138] sm:$0xff]  ;;  %v7573_v15 = vpack.c.bf16 %v7549_v62, %v7547_v40 }
 0x261   : > { %8547 = vst [vmem:[#allocation25_spill] sm:$0xff] %v7526_v26  ;;  %5754 = vrot.lane.b32.xlu1 %v7526_v26, %s5994_s26  ;;  %v2529_v41 = vrot.slane %v2452_v3, 7  ;;  %v2407_v50 = vadd.f32 %v5180_v55, %v7193_v16  ;;  %8549 = vst [vmem:[#allocation27_spill] sm:$0xff] %v7545_v25 }
 0x262   : > { %v2186_v21 = vpop.f32.mrb[58].mxu0  ;;  %8555 = vst [vmem:[#allocation33_spill] sm:$0xff] %v7573_v15 }
 0x263   : > { %v2530_v31 = vsel %vm469_vm2, %v2528_v13, %v2529_v41  ;;  %v2614_v44 = vsel %vm469_vm2, %v2529_v41, 0.0  ;;  %v2453_v47 = vmax.f32 %v2407_v50, 0.0  ;;  %v5181_v59 = vadd.f32 %v7202_v36, %v2186_v21  ;;  %v2188_v23 = vpop.f32.mrb[59].mxu0  ;;  %v7554_v6 = vld [vmem:[#allocation3 + $0x13a] sm:$0xff] }
 0x264   : > { %8550 = vst [vmem:[#allocation28_spill] sm:$0xff] %v7554_v6  ;;  %v7556_v3 = vld [vmem:[#allocation3 + $0x142] sm:$0xff]  ;;  %2658 = vst.msk [vmem:[#allocation3 + $0x158] sm:$0xff] %vm380_vm0, %v2530_v31  ;;  %v2773_v55 = vld [vmem:[#allocation3 + $0x139] sm:$0xff] }
 0x265   : > { %8551 = vst [vmem:[#allocation29_spill] sm:$0xff] %v7556_v3  ;;  %v7558_v16 = vld [vmem:[#allocation3 + $0x140] sm:$0xff]  ;;  %2659 = vst.msk [vmem:[#allocation3 + $0x160] sm:$0x3] %vm383_vm1, %v2614_v44  ;;  %v7564_v49 = vpack.c.bf16 %v7556_v3, %v7554_v6  ;;  %v2531_v23 = vrot.slane %v2453_v47, 7  ;;  %v2412_v50 = vadd.f32 %v5181_v59, %v7191_v20 }
 0x266   : > { %8552 = vst [vmem:[#allocation30_spill] sm:$0xff] %v7558_v16  ;;  %v5748_v13 = vpack.i.bf16 %v7558_v16, %v7545_v25  ;;  %v2774_v41 = vld [vmem:[#allocation3 + $0x141] sm:$0xff]  ;;  %v2191_v31 = vpop.f32.mrb[60].mxu0 }
 0x267   : > { %8553 = vst [vmem:[#allocation31_spill] sm:$0xff] %v7564_v49  ;;  %v7569_v21 = vpack.i.bf16 %v2774_v41, %v2773_v55  ;;  %5108 = vmatprep.subr.msk.bf16.mxu0 %vm7410_vm3, %v7564_v49  ;;  %v2599_v44 = vsel %vm469_vm2, 0.0, %v2531_v23  ;;  %v2454_v25 = vmax.f32 %v2412_v50, 0.0  ;;  %v5182_v47 = vadd.f32 %v7202_v36, %v2191_v31  ;;  %v2193_v20 = vpop.f32.mrb[61].mxu0  ;;  %v7590_v49 = vld [vmem:[#allocation3 + $0x92] sm:$0xff]  ;;  %v7592_v50 = vld [vmem:[#allocation3 + $0x9a] sm:$0xff] }
 0x268   : > { %5749 = vrot.lane.b32.xlu0 %v5748_v13, %s5994_s26  ;;  %5111 = vmatpush3.bf16.xpose.msk.msra.mxu0 %vm7410_vm3, %v7573_v15  ;;  %2660 = vst.msk [vmem:[#allocation3 + $0x168] sm:$0xff] %vm380_vm0, %v2599_v44  ;;  %v7588_v13 = vld [vmem:[#allocation3 + $0x150] sm:$0xff] }
 0x269   : > { %8554 = vst [vmem:[#allocation32_spill] sm:$0xff] %v7569_v21  ;;  %5764 = vrot.lane.b32.xlu1 %v7569_v21, %s5994_s26  ;;  %v2532_v59 = vrot.slane %v2454_v25, 7  ;;  %v2417_v55 = vadd.f32 %v5182_v47, %v7197_v38  ;;  %8556 = vst [vmem:[#allocation34_spill] sm:$0xff] %v7588_v13  ;;  %v3003_v21 = vld [vmem:[#allocation3 + $0x1a2] sm:$0xff] }
 0x26a   : > { %v2196_v41 = vpop.f32.mrb[62].mxu0 }
 0x26b   : > { %v2533_v31 = vsel %vm469_vm2, %v2531_v23, %v2532_v59  ;;  %v2615_v20 = vsel %vm469_vm2, %v2532_v59, 0.0  ;;  %v2455_v16 = vmax.f32 %v2417_v55, 0.0  ;;  %v5183_v56 = vadd.f32 %v7202_v36, %v2196_v41  ;;  %v2198_v15 = vpop.f32.mrb[63].mxu0  ;;  %v7597_v60 = vld [vmem:[#allocation3 + $0x152] sm:$0xff] }
 0x26c   : > { %8557 = vst [vmem:[#allocation35_spill] sm:$0xff] %v7597_v60  ;;  %v7599_v25 = vld [vmem:[#allocation3 + $0x15a] sm:$0xff]  ;;  %2661 = vst.msk [vmem:[#allocation3 + $0x170] sm:$0xff] %vm380_vm0, %v2533_v31  ;;  %v2775_v47 = vld [vmem:[#allocation3 + $0x151] sm:$0xff]  ;;  %v7616_v41 = vpack.c.bf16 %v7592_v50, %v7590_v49 }
 0x26d   : > { %8558 = vst [vmem:[#allocation36_spill] sm:$0xff] %v7599_v25  ;;  %v7601_v38 = vld [vmem:[#allocation3 + $0x158] sm:$0xff]  ;;  %2662 = vst.msk [vmem:[#allocation3 + $0x178] sm:$0x3] %vm383_vm1, %v2615_v20  ;;  %v7607_v44 = vpack.c.bf16 %v7599_v25, %v7597_v60  ;;  %v2534_v15 = vrot.slane %v2455_v16, 7  ;;  %v2422_v59 = vadd.f32 %v5183_v56, %v7195_v45  ;;  %v7631_v16 = vld [vmem:[#allocation3 + $0xaa] sm:$0xff] }
 0x26e   : > { %8559 = vst [vmem:[#allocation37_spill] sm:$0xff] %v7601_v38  ;;  %v5758_v23 = vpack.i.bf16 %v7601_v38, %v7588_v13  ;;  %v2776_v36 = vld [vmem:[#allocation3 + $0x159] sm:$0xff]  ;;  %8562 = vst [vmem:[#allocation40_spill] sm:$0xff] %v7616_v41  ;;  %v7668_v60 = vld [vmem:[#allocation3 + $0xc2] sm:$0xff] }
 0x26f   : > { %8560 = vst [vmem:[#allocation38_spill] sm:$0xff] %v7607_v44  ;;  %v7612_v55 = vpack.i.bf16 %v2776_v36, %v2775_v47  ;;  %5114 = vmatprep.subr.msk.bf16.mxu0 %vm7410_vm3, %v7607_v44  ;;  %v2600_v31 = vsel %vm469_vm2, 0.0, %v2534_v15  ;;  %v2456_v20 = vmax.f32 %v2422_v59, 0.0  ;;  %v7629_v56 = vld [vmem:[#allocation3 + $0x168] sm:$0xff]  ;;  %v7633_v47 = vld [vmem:[#allocation3 + $0xb2] sm:$0xff]  ;;  %v5635_v59 = vpop.permute.xlu1 %5634 }
 0x270   : > { %5759 = vrot.lane.b32.xlu0 %v5758_v23, %s5994_s26  ;;  %5117 = vmatpush3.bf16.xpose.msk.msra.mxu0 %vm7410_vm3, %v7616_v41  ;;  %2663 = vst.msk [vmem:[#allocation3 + $0x180] sm:$0xff] %vm380_vm0, %v2600_v31  ;;  %8563 = vst [vmem:[#allocation41_spill] sm:$0xff] %v7629_v56  ;;  %v5637_v31 = vunpack.i.h.bf16 %v5635_v59  ;;  %v5636_v57 = vunpack.i.l.bf16 %v5635_v59  ;;  %v7655_v8 = vpack.c.bf16 %v7633_v47, %v7631_v16 }
 0x271   : > { %8561 = vst [vmem:[#allocation39_spill] sm:$0xff] %v7612_v55  ;;  %5774 = vrot.lane.b32.xlu1 %v7612_v55, %s5994_s26  ;;  %v2535_v45 = vrot.slane %v2456_v20, 7  ;;  %v2876_v55 = vld [vmem:[#allocation3 + $0x22] sm:$0xff] }
 0x272   : > { %8569 = vst [vmem:[#allocation47_spill] sm:$0xff] %v7655_v8 }
 0x273   : > { %v2536_v23 = vsel %vm469_vm2, %v2534_v15, %v2535_v45  ;;  %v2616_v36 = vsel %vm469_vm2, %v2535_v45, 0.0  ;;  %v7637_v44 = vld [vmem:[#allocation3 + $0x16a] sm:$0xff] }
 0x274   : > { %8564 = vst [vmem:[#allocation42_spill] sm:$0xff] %v7637_v44  ;;  %v7639_v13 = vld [vmem:[#allocation3 + $0x172] sm:$0xff]  ;;  %2664 = vst.msk [vmem:[#allocation3 + $0x188] sm:$0xff] %vm380_vm0, %v2536_v23  ;;  %v2777_v45 = vld [vmem:[#allocation3 + $0x169] sm:$0xff] }
 0x275   : > { %8565 = vst [vmem:[#allocation43_spill] sm:$0xff] %v7639_v13  ;;  %v7641_v38 = vld [vmem:[#allocation3 + $0x170] sm:$0xff]  ;;  %2665 = vst.msk [vmem:[#allocation3 + $0x190] sm:$0x3] %vm383_vm1, %v2616_v36  ;;  %v7647_v20 = vpack.c.bf16 %v7639_v13, %v7637_v44  ;;  %v2715_v23 = vld [vmem:[#allocation3] sm:$0xff] }
 0x276   : > { %8566 = vst [vmem:[#allocation44_spill] sm:$0xff] %v7641_v38  ;;  %v5768_v15 = vpack.i.bf16 %v7641_v38, %v7629_v56  ;;  %v2778_v41 = vld [vmem:[#allocation3 + $0x171] sm:$0xff]  ;;  %v2875_v36 = vld [vmem:[#allocation3 + $0x1a] sm:$0xff]  ;;  %v3516_v38 = vsel %vm380_vm0, %v2715_v23, %v5636_v57 }
 0x277   : > { %8567 = vst [vmem:[#allocation45_spill] sm:$0xff] %v7647_v20  ;;  %v7651_v19 = vpack.i.bf16 %v2778_v41, %v2777_v45  ;;  %5120 = vmatprep.subr.msk.bf16.mxu0 %vm7410_vm3, %v7647_v20  ;;  %v3517_v41 = vsel %vm380_vm0, %v2716_v1, %v5637_v31  ;;  %v2779_v45 = vld [vmem:[#allocation3 + $0x2] sm:$0xff]  ;;  %v2780_v56 = vld [vmem:[#allocation3 + $0xa] sm:$0xff]  ;;  %v5793_v44 = vpack.i.bf16 %v2876_v55, %v2875_v36 }
 0x278   : > { %5769 = vrot.lane.b32.xlu0 %v5768_v15, %s5994_s26  ;;  %5123 = vmatpush3.bf16.xpose.msk.msra.mxu0 %vm7410_vm3, %v7655_v8  ;;  %v5630_v59 = vpop.permute.xlu0 %5629  ;;  %v3002_v15 = vld [vmem:[#allocation3 + $0x19a] sm:$0xff]  ;;  %v4962_v3 = vpack.c.bf16 %v3517_v41, %v3516_v38  ;;  %v5813_v38 = vpack.i.bf16 %v7463_v12, %v7461_v2 }
 0x279   : > { %8568 = vst [vmem:[#allocation46_spill] sm:$0xff] %v7651_v19  ;;  %5784 = vrot.lane.b32.xlu1 %v7651_v19, %s5994_s26  ;;  %v5632_v13 = vunpack.i.h.bf16 %v5630_v59  ;;  %v5631_v20 = vunpack.i.l.bf16 %v5630_v59  ;;  %v2841_v25 = vld [vmem:[#allocation3 + $0x180] sm:$0xff]  ;;  %v7670_v19 = vld [vmem:[#allocation3 + $0xca] sm:$0xff]  ;;  %v5645_v23 = vpop.permute.xlu1 %5644  ;;  %v7685_v6 = vpack.c.bf16 %v3003_v21, %v3002_v15 }
 0x27a   : > { %v7716_v15 = vld [vmem:[#allocation3 + $0xda] sm:$0xff] }
 0x27b   : > { %v7673_v8 = vld [vmem:[#allocation3 + $0x182] sm:$0xff]  ;;  %v3548_v30 = vsel %vm380_vm0, %v2779_v45, %v5631_v20  ;;  %v3549_v57 = vsel %vm380_vm0, %v2780_v56, %v5632_v13  ;;  %v7693_v13 = vpack.c.bf16 %v7670_v19, %v7668_v60  ;;  %v5647_v56 = vunpack.i.h.bf16 %v5645_v23 }
 0x27c   : > { %v7675_v1 = vld [vmem:[#allocation3 + $0x18a] sm:$0xff]  ;;  %v4960_v26 = vpack.c.bf16 %v3549_v57, %v3548_v30  ;;  %v5646_v20 = vunpack.i.l.bf16 %v5645_v23  ;;  %v2676_v30 = vld [vmem:[%s8411_s4 + $0x8] sm:$0xff] }
 0x27d   : > { %5794 = vrot.lane.b32.xlu1 %v5793_v44, %s5994_s26  ;;  %v2842_v31 = vld [vmem:[#allocation3 + $0x188] sm:$0xff]  ;;  %v7681_v59 = vpack.c.bf16 %v7675_v1, %v7673_v8  ;;  %v5803_v44 = vpack.i.bf16 %v7418_v32, %v7416_v42  ;;  %3868 = vmatprep.mubr.f32.mxu1 %v2676_v30 }
 0x27e   : > { %v5778_v33 = vpack.i.bf16 %v2842_v31, %v2841_v25  ;;  %4961 = vmatprep.subr.bf16.mxu1 %v4960_v26  ;;  %v3518_v26 = vsel %vm380_vm0, %v7222_v17, %v5646_v20  ;;  %v7718_v31 = vld [vmem:[#allocation3 + $0xe2] sm:$0xff] }
 0x27f   : > { %5126 = vmatprep.subr.msk.bf16.mxu0 %vm7410_vm3, %v7681_v59  ;;  %4963 = vmatpush1.bf16.xpose.msra.mxu1 %v4962_v3  ;;  %v3519_v3 = vsel %vm380_vm0, %v7227_v35, %v5647_v56  ;;  %v7726_v35 = vpack.c.bf16 %v7718_v31, %v7716_v15 }
 0x280   : > { %5779 = vrot.lane.b32.xlu0 %v5778_v33, %s5994_s26  ;;  %5129 = vmatpush3.bf16.xpose.msk.msra.mxu0 %vm7410_vm3, %v7693_v13  ;;  %v5640_v21 = vpop.permute.xlu0 %5639  ;;  %v4966_v17 = vpack.c.bf16 %v3519_v3, %v3518_v26  ;;  %v5843_v3 = vpack.i.bf16 %v7592_v50, %v7590_v49 }
 0x281   : > { %5804 = vrot.lane.b32.xlu1 %v5803_v44, %s5994_s26  ;;  %v5642_v33 = vunpack.i.h.bf16 %v5640_v21  ;;  %v5641_v25 = vunpack.i.l.bf16 %v5640_v21  ;;  %5132 = vmatprep.subr.msk.bf16.mxu0 %vm7410_vm3, %v7685_v6  ;;  %v5655_v57 = vpop.permute.xlu1 %5654 }
 0x283   : > { %v3550_v41 = vsel %vm380_vm0, %v2875_v36, %v5641_v25  ;;  %v3551_v45 = vsel %vm380_vm0, %v2876_v55, %v5642_v33  ;;  %v5657_v36 = vunpack.i.h.bf16 %v5655_v57  ;;  %v5656_v55 = vunpack.i.l.bf16 %v5655_v57 }
 0x284   : > { %5789 = vrot.lane.b32.xlu0 %v7251_v27, %s5994_s26  ;;  %v4964_v23 = vpack.c.bf16 %v3551_v45, %v3550_v41  ;;  %v5823_v27 = vpack.i.bf16 %v7506_v28, %v7504_v63 }
 0x285   : > { %5814 = vrot.lane.b32.xlu1 %v5813_v38, %s5994_s26  ;;  %v3521_v30 = vsel %vm380_vm0, %v7245_v18, %v5657_v36  ;;  %v3520_v21 = vsel %vm380_vm0, %v7240_v22, %v5656_v55  ;;  %v5863_v55 = vpack.i.bf16 %v7670_v19, %v7668_v60 }
 0x286   : > { %4965 = vmatprep.subr.bf16.mxu1 %v4964_v23  ;;  %v4970_v18 = vpack.c.bf16 %v3521_v30, %v3520_v21 }
 0x287   : > { %4967 = vmatpush1.bf16.xpose.msra.mxu1 %v4966_v17 }
 0x288   : > { %5799 = vrot.lane.b32.xlu0 %v7272_v37, %s5994_s26  ;;  %5135 = vmatpush3.bf16.xpose.msk.msra.mxu0 %vm7410_vm3, %v7726_v35  ;;  %v5650_v44 = vpop.permute.xlu0 %5649  ;;  %v5833_v37 = vpack.i.bf16 %v7549_v62, %v7547_v40 }
 0x289   : > { %5824 = vrot.lane.b32.xlu1 %v5823_v27, %s5994_s26  ;;  %v5652_v56 = vunpack.i.h.bf16 %v5650_v44  ;;  %v5651_v20 = vunpack.i.l.bf16 %v5650_v44  ;;  %v5665_v38 = vpop.permute.xlu1 %5664 }
 0x28a   : > { %v5666_v22 = vunpack.i.l.bf16 %v5665_v38 }
 0x28b   : > { %v3552_v33 = vsel %vm380_vm0, %v7416_v42, %v5651_v20  ;;  %v3553_v25 = vsel %vm380_vm0, %v7418_v32, %v5652_v56  ;;  %v5853_v32 = vpack.i.bf16 %v7633_v47, %v7631_v16 }
 0x28c   : > { %5809 = vrot.lane.b32.xlu0 %v7293_v39, %s5994_s26  ;;  %v4968_v26 = vpack.c.bf16 %v3553_v25, %v3552_v33  ;;  %v5667_v39 = vunpack.i.h.bf16 %v5665_v38 }
 0x28d   : > { %5834 = vrot.lane.b32.xlu1 %v5833_v37, %s5994_s26 }
 0x28e   : > { %4969 = vmatprep.subr.bf16.mxu1 %v4968_v26  ;;  %v3523_v57 = vsel %vm380_vm0, %v7266_v53, %v5667_v39 }
 0x28f   : > { %4971 = vmatpush1.bf16.xpose.msra.mxu1 %v4970_v18 }
 0x290   : > { %5819 = vrot.lane.b32.xlu0 %v7314_v54, %s5994_s26  ;;  %v5660_v41 = vpop.permute.xlu0 %5659  ;;  %v3522_v54 = vsel %vm380_vm0, %v7261_v46, %v5666_v22  ;;  %v5903_v22 = vpack.i.bf16 %v7513_v11, %v7511_v29 }
 0x291   : > { %5844 = vrot.lane.b32.xlu1 %v5843_v3, %s5994_s26  ;;  %v5662_v42 = vunpack.i.h.bf16 %v5660_v41  ;;  %v5661_v45 = vunpack.i.l.bf16 %v5660_v41  ;;  %v5675_v17 = vpop.permute.xlu1 %5674 }
 0x292   : > { %v5677_v53 = vunpack.i.h.bf16 %v5675_v17  ;;  %v5676_v46 = vunpack.i.l.bf16 %v5675_v17 }
 0x293   : > { %v3554_v23 = vsel %vm380_vm0, %v7461_v2, %v5661_v45  ;;  %v3555_v27 = vsel %vm380_vm0, %v7463_v12, %v5662_v42  ;;  %v5873_v12 = vpack.i.bf16 %v7718_v31, %v7716_v15  ;;  %v8571_v45 = vld [vmem:[#allocation28_spill] sm:$0xff] }
 0x294   : > { %5829 = vrot.lane.b32.xlu0 %v7335_v24, %s5994_s26  ;;  %v4972_v36 = vpack.c.bf16 %v3555_v27, %v3554_v23  ;;  %v4974_v24 = vpack.c.bf16 %v3523_v57, %v3522_v54  ;;  %v3525_v20 = vsel %vm380_vm0, %v7287_v4, %v5677_v53  ;;  %v8573_v57 = vld [vmem:[#allocation25_spill] sm:$0xff]  ;;  %v8574_v54 = vld [vmem:[#allocation6_spill] sm:$0xff]  ;;  %v8576_v53 = vld [vmem:[#allocation35_spill] sm:$0xff] }
 0x295   : > { %5854 = vrot.lane.b32.xlu1 %v5853_v32, %s5994_s26  ;;  %v8575_v27 = vld [vmem:[#allocation22_spill] sm:$0xff] }
 0x296   : > { %4973 = vmatprep.subr.bf16.mxu1 %v4972_v36 }
 0x297   : > { %4975 = vmatpush1.bf16.xpose.msra.mxu1 %v4974_v24 }
 0x298   : > { %5839 = vrot.lane.b32.xlu0 %v7356_v61, %s5994_s26  ;;  %v5670_v44 = vpop.permute.xlu0 %5669  ;;  %v3524_v61 = vsel %vm380_vm0, %v7282_v5, %v5676_v46  ;;  %v8570_v5 = vpack.i.bf16 %v7425_v52, %v7423_v58  ;;  %v8577_v46 = vld [vmem:[#allocation36_spill] sm:$0xff] }
 0x299   : > { %5864 = vrot.lane.b32.xlu1 %v5863_v55, %s5994_s26  ;;  %v5672_v2 = vunpack.i.h.bf16 %v5670_v44  ;;  %v5671_v56 = vunpack.i.l.bf16 %v5670_v44  ;;  %v5685_v21 = vpop.permute.xlu1 %5684  ;;  %v4978_v25 = vpack.c.bf16 %v3525_v20, %v3524_v61  ;;  %v5923_v44 = vpack.i.bf16 %v8577_v46, %v8576_v53 }
 0x29a   : > { %v5686_v4 = vunpack.i.l.bf16 %v5685_v21 }
 0x29b   : > { %v3556_v37 = vsel %vm380_vm0, %v7504_v63, %v5671_v56  ;;  %v3557_v30 = vsel %vm380_vm0, %v7506_v28, %v5672_v2  ;;  %v5893_v28 = vpack.i.bf16 %v7470_v14, %v7468_v43  ;;  %v8578_v56 = vld [vmem:[#allocation32_spill] sm:$0xff] }
 0x29c   : > { %5849 = vrot.lane.b32.xlu0 %v7377_v51, %s5994_s26  ;;  %v4976_v33 = vpack.c.bf16 %v3557_v30, %v3556_v37  ;;  %v5687_v51 = vunpack.i.h.bf16 %v5685_v21  ;;  %v3526_v3 = vsel %vm380_vm0, %v7303_v9, %v5686_v4  ;;  %v8579_v30 = vld [vmem:[#allocation42_spill] sm:$0xff]  ;;  %v8583_v4 = vld [vmem:[#allocation7_spill] sm:$0xff] }
 0x29d   : > { %5874 = vrot.lane.b32.xlu1 %v5873_v12, %s5994_s26 }
 0x29e   : > { %4977 = vmatprep.subr.bf16.mxu1 %v4976_v33  ;;  %v8581_v33 = vld [vmem:[#allocation39_spill] sm:$0xff] }
 0x29f   : > { %4979 = vmatpush1.bf16.xpose.msra.mxu1 %v4978_v25  ;;  %v8582_v25 = vld [vmem:[#allocation8_spill] sm:$0xff] }
 0x2a0   : > { %5859 = vrot.lane.b32.xlu0 %v7398_v10, %s5994_s26  ;;  %v5680_v38 = vpop.permute.xlu0 %5679  ;;  %v3527_v10 = vsel %vm380_vm0, %v7308_v7, %v5687_v51 }
 0x2a1   : > { %5884 = vrot.lane.b32.xlu1 %v8570_v5, %s5994_s26  ;;  %v5682_v63 = vunpack.i.h.bf16 %v5680_v38  ;;  %v5681_v26 = vunpack.i.l.bf16 %v5680_v38  ;;  %v5695_v18 = vpop.permute.xlu1 %5694 }
 0x2a2   : > { %v5697_v7 = vunpack.i.h.bf16 %v5695_v18  ;;  %v5696_v9 = vunpack.i.l.bf16 %v5695_v18  ;;  %v8584_v18 = vld [vmem:[#allocation46_spill] sm:$0xff] }
 0x2a3   : > { %v3558_v58 = vsel %vm380_vm0, %v7547_v40, %v5681_v26  ;;  %v3559_v52 = vsel %vm380_vm0, %v7549_v62, %v5682_v63  ;;  %v8572_v62 = vld [vmem:[#allocation29_spill] sm:$0xff] }
 0x2a4   : > { %5869 = vrot.lane.b32.xlu0 %v7440_v48, %s5994_s26  ;;  %v4980_v39 = vpack.c.bf16 %v3559_v52, %v3558_v58  ;;  %v4982_v48 = vpack.c.bf16 %v3527_v10, %v3526_v3  ;;  %v5913_v32 = vpack.i.bf16 %v8572_v62, %v8571_v45  ;;  %v3529_v23 = vsel %vm380_vm0, %v8574_v54, %v5697_v7  ;;  %v7838_v3 = vld [vmem:[#allocation3 + $0x181] sm:$0xff]  ;;  %v7840_v58 = vld [vmem:[#allocation3 + $0x189] sm:$0xff] }
 0x2a5   : > { %5894 = vrot.lane.b32.xlu1 %v5893_v28, %s5994_s26  ;;  %v5943_v10 = vpack.i.bf16 %v7675_v1, %v7673_v8  ;;  %v5928_v8 = vpack.i.bf16 %v7840_v58, %v7838_v3 }
 0x2a6   : > { %4981 = vmatprep.subr.bf16.mxu1 %v4980_v39 }
 0x2a7   : > { %4983 = vmatpush1.bf16.xpose.msra.mxu1 %v4982_v48 }
 0x2a8   : > { %5879 = vrot.lane.b32.xlu0 %v7483_v0, %s5994_s26  ;;  %v5690_v41 = vpop.permute.xlu0 %5689  ;;  %v3528_v0 = vsel %vm380_vm0, %v8575_v27, %v5696_v9 }
 0x2a9   : > { %5904 = vrot.lane.b32.xlu1 %v5903_v22, %s5994_s26  ;;  %v5692_v40 = vunpack.i.h.bf16 %v5690_v41  ;;  %v5691_v42 = vunpack.i.l.bf16 %v5690_v41  ;;  %v5705_v55 = vpop.permute.xlu1 %5704  ;;  %v4986_v2 = vpack.c.bf16 %v3529_v23, %v3528_v0  ;;  %v8585_v41 = vld [vmem:[#allocation10_spill] sm:$0xff] }
 0x2aa   : > { %v5707_v12 = vunpack.i.h.bf16 %v5705_v55  ;;  %v5706_v20 = vunpack.i.l.bf16 %v5705_v55 }
 0x2ab   : > { %v3560_v17 = vsel %vm380_vm0, %v7590_v49, %v5691_v42  ;;  %v3561_v36 = vsel %vm380_vm0, %v7592_v50, %v5692_v40  ;;  %v8580_v50 = vld [vmem:[#allocation43_spill] sm:$0xff]  ;;  %v8586_v42 = vld [vmem:[#allocation9_spill] sm:$0xff] }
 0x2ac   : > { %5889 = vrot.lane.b32.xlu0 %v8573_v57, %s5994_s26  ;;  %v4984_v24 = vpack.c.bf16 %v3561_v36, %v3560_v17  ;;  %v5933_v21 = vpack.i.bf16 %v8580_v50, %v8579_v30  ;;  %v3531_v51 = vsel %vm380_vm0, %v8582_v25, %v5707_v12  ;;  %v3530_v5 = vsel %vm380_vm0, %v8583_v4, %v5706_v20  ;;  %v8588_v12 = vld [vmem:[#allocation11_spill] sm:$0xff] }
 0x2ad   : > { %5914 = vrot.lane.b32.xlu1 %v5913_v32, %s5994_s26  ;;  %v4990_v52 = vpack.c.bf16 %v3531_v51, %v3530_v5  ;;  %v2799_v5 = vld [vmem:[#allocation3 + $0xf2] sm:$0xff] }
 0x2ae   : > { %4985 = vmatprep.subr.bf16.mxu1 %v4984_v24 }
 0x2af   : > { %4987 = vmatpush1.bf16.xpose.msra.mxu1 %v4986_v2  ;;  %v8587_v2 = vld [vmem:[#allocation12_spill] sm:$0xff] }
 0x2b0   : > { %5899 = vrot.lane.b32.xlu0 %v8578_v56, %s5994_s26  ;;  %v5700_v61 = vpop.permute.xlu0 %5699 }
 0x2b1   : > { %5924 = vrot.lane.b32.xlu1 %v5923_v44, %s5994_s26  ;;  %v5702_v49 = vunpack.i.h.bf16 %v5700_v61  ;;  %v5701_v37 = vunpack.i.l.bf16 %v5700_v61  ;;  %v5715_v26 = vpop.permute.xlu1 %5714 }
 0x2b2   : > { %v5717_v39 = vunpack.i.h.bf16 %v5715_v26  ;;  %v5716_v22 = vunpack.i.l.bf16 %v5715_v26 }
 0x2b3   : > { %v3562_v38 = vsel %vm380_vm0, %v7631_v16, %v5701_v37  ;;  %v3563_v63 = vsel %vm380_vm0, %v7633_v47, %v5702_v49  ;;  %v2970_v16 = vld [vmem:[#allocation3 + $0x199] sm:$0xff]  ;;  %v2971_v47 = vld [vmem:[#allocation3 + $0x1a1] sm:$0xff] }
 0x2b4   : > { %5909 = vrot.lane.b32.xlu0 %v8581_v33, %s5994_s26  ;;  %v4988_v28 = vpack.c.bf16 %v3563_v63, %v3562_v38  ;;  %v5938_v9 = vpack.i.bf16 %v2971_v47, %v2970_v16  ;;  %v3533_v40 = vsel %vm380_vm0, %v8585_v41, %v5717_v39  ;;  %v3532_v32 = vsel %vm380_vm0, %v8586_v42, %v5716_v22  ;;  %v2800_v38 = vld [vmem:[#allocation3 + $0xfa] sm:$0xff]  ;;  %v8589_v63 = vld [vmem:[#allocation14_spill] sm:$0xff] }
 0x2b5   : > { %5934 = vrot.lane.b32.xlu1 %v5933_v21, %s5994_s26  ;;  %v4994_v0 = vpack.c.bf16 %v3533_v40, %v3532_v32 }
 0x2b6   : > { %4989 = vmatprep.subr.bf16.mxu1 %v4988_v28  ;;  %v8590_v28 = vld [vmem:[#allocation13_spill] sm:$0xff] }
 0x2b7   : > { %4991 = vmatpush1.bf16.xpose.msra.mxu1 %v4990_v52 }
 0x2b8   : > { %5919 = vrot.lane.b32.xlu0 %v8584_v18, %s5994_s26  ;;  %v5710_v48 = vpop.permute.xlu0 %5709 }
 0x2b9   : > { %5944 = vrot.lane.b32.xlu1 %v5943_v10, %s5994_s26  ;;  %v5712_v1 = vunpack.i.h.bf16 %v5710_v48  ;;  %v5711_v7 = vunpack.i.l.bf16 %v5710_v48  ;;  %v5725_v23 = vpop.permute.xlu1 %5724 }
 0x2ba   : > { %v5727_v17 = vunpack.i.h.bf16 %v5725_v23  ;;  %v5726_v36 = vunpack.i.l.bf16 %v5725_v23 }
 0x2bb   : > { %v3564_v57 = vsel %vm380_vm0, %v7668_v60, %v5711_v7  ;;  %v3565_v54 = vsel %vm380_vm0, %v7670_v19, %v5712_v1  ;;  %v8591_v1 = vld [vmem:[#allocation18_spill] sm:$0xff] }
 0x2bc   : > { %5929 = vrot.lane.b32.xlu0 %v5928_v8, %s5994_s26  ;;  %v4992_v27 = vpack.c.bf16 %v3565_v54, %v3564_v57  ;;  %v3535_v56 = vsel %vm380_vm0, %v8587_v2, %v5727_v17  ;;  %v3534_v60 = vsel %vm380_vm0, %v8588_v12, %v5726_v36 }
 0x2bd   : > { %v4998_v37 = vpack.c.bf16 %v3535_v56, %v3534_v60 }
 0x2be   : > { %4993 = vmatprep.subr.bf16.mxu1 %v4992_v27 }
 0x2bf   : > { %4995 = vmatpush1.bf16.xpose.msra.mxu1 %v4994_v0 }
 0x2c0   : > { %5939 = vrot.lane.b32.xlu0 %v5938_v9, %s5994_s26  ;;  %v8592_v9 = vld [vmem:[#allocation17_spill] sm:$0xff]  ;;  %s4694_s26 = sshll.u32 %s8615_s14, 7 }
 0x2c1   : > { %s8349_s17 = scalar_lea.vmem %s8408_s1, %s4694_s26  ;;  %s8360_s19 = scalar_lea.vmem %s8417_s10, %s4694_s26 }
 0x2c2   : > { %v5720_v55 = vpop.permute.xlu0 %5719 }
 0x2c3   : > { %v5722_v24 = vunpack.i.h.bf16 %v5720_v55  ;;  %v5721_v44 = vunpack.i.l.bf16 %v5720_v55  ;;  %v5735_v61 = vpop.permute.xlu1 %5734  ;;  %v8593_v55 = vld [vmem:[#allocation23_spill] sm:$0xff] }
 0x2c4   : > { %v5737_v21 = vunpack.i.h.bf16 %v5735_v61  ;;  %v5736_v33 = vunpack.i.l.bf16 %v5735_v61 }
 0x2c5   : > { %v3566_v19 = vsel %vm380_vm0, %v7716_v15, %v5721_v44  ;;  %v3567_v20 = vsel %vm380_vm0, %v7718_v31, %v5722_v24  ;;  %v8594_v44 = vld [vmem:[#allocation21_spill] sm:$0xff] }
 0x2c6   : > { %v4996_v49 = vpack.c.bf16 %v3567_v20, %v3566_v19  ;;  %v3537_v26 = vsel %vm380_vm0, %v8589_v63, %v5737_v21  ;;  %v3536_v15 = vsel %vm380_vm0, %v8590_v28, %v5736_v33  ;;  %v8595_v21 = vld [vmem:[#allocation30_spill] sm:$0xff] }
 0x2c7   : > { %v5002_v39 = vpack.c.bf16 %v3537_v26, %v3536_v15 }
 0x2c8   : > { %4997 = vmatprep.subr.bf16.mxu1 %v4996_v49 }
 0x2c9   : > { %4999 = vmatpush1.bf16.xpose.msra.mxu1 %v4998_v37 }
 0x2ca   : > { %v5730_v25 = vpop.permute.xlu0 %5729 }
 0x2cb   : > { %v5732_v51 = vunpack.i.h.bf16 %v5730_v25  ;;  %v5731_v4 = vunpack.i.l.bf16 %v5730_v25  ;;  %v5745_v52 = vpop.permute.xlu1 %5744  ;;  %v8596_v25 = vld [vmem:[#allocation27_spill] sm:$0xff] }
 0x2cc   : > { %v5747_v22 = vunpack.i.h.bf16 %v5745_v52  ;;  %v5746_v16 = vunpack.i.l.bf16 %v5745_v52 }
 0x2cd   : > { %v3568_v31 = vsel %vm380_vm0, %v2799_v5, %v5731_v4  ;;  %v3569_v10 = vsel %vm380_vm0, %v2800_v38, %v5732_v51 }
 0x2ce   : > { %v5000_v18 = vpack.c.bf16 %v3569_v10, %v3568_v31  ;;  %v3539_v7 = vsel %vm380_vm0, %v8591_v1, %v5747_v22  ;;  %v3538_v41 = vsel %vm380_vm0, %v8592_v9, %v5746_v16  ;;  %v8597_v10 = vld [vmem:[#allocation37_spill] sm:$0xff] }
 0x2cf   : > { %v5006_v54 = vpack.c.bf16 %v3539_v7, %v3538_v41  ;;  %v8599_v41 = vld [vmem:[#allocation44_spill] sm:$0xff] }
 0x2d0   : > { %5001 = vmatprep.subr.bf16.mxu1 %v5000_v18  ;;  %v8598_v18 = vld [vmem:[#allocation34_spill] sm:$0xff] }
 0x2d1   : > { %5003 = vmatpush1.bf16.xpose.msra.mxu1 %v5002_v39 }
 0x2d2   : > { %v5740_v47 = vpop.permute.xlu0 %5739 }
 0x2d3   : > { %v5742_v48 = vunpack.i.h.bf16 %v5740_v47  ;;  %v5741_v8 = vunpack.i.l.bf16 %v5740_v47  ;;  %v5755_v32 = vpop.permute.xlu1 %5754 }
 0x2d4   : > { %v5757_v23 = vunpack.i.h.bf16 %v5755_v32  ;;  %v5756_v27 = vunpack.i.l.bf16 %v5755_v32 }
 0x2d5   : > { %v3570_v40 = vsel %vm380_vm0, %v7468_v43, %v5741_v8  ;;  %v3571_v42 = vsel %vm380_vm0, %v7470_v14, %v5742_v48 }
 0x2d6   : > { %v5004_v57 = vpack.c.bf16 %v3571_v42, %v3570_v40  ;;  %v3541_v24 = vsel %vm380_vm0, %v8593_v55, %v5757_v23  ;;  %v3540_v2 = vsel %vm380_vm0, %v8594_v44, %v5756_v27  ;;  %v8600_v42 = vld [vmem:[#allocation41_spill] sm:$0xff]  ;;  %v2909_v55 = vld [vmem:[#allocation3 + $0x38] sm:$0xff] }
 0x2d7   : > { %v5010_v60 = vpack.c.bf16 %v3541_v24, %v3540_v2 }
 0x2d8   : > { %5005 = vmatprep.subr.bf16.mxu1 %v5004_v57 }
 0x2d9   : > { %5007 = vmatpush1.bf16.xpose.msra.mxu1 %v5006_v54 }
 0x2da   : > { %v5750_v0 = vpop.permute.xlu0 %5749 }
 0x2db   : > { %v5752_v17 = vunpack.i.h.bf16 %v5750_v0  ;;  %v5751_v36 = vunpack.i.l.bf16 %v5750_v0  ;;  %v5765_v56 = vpop.permute.xlu1 %5764 }
 0x2dc   : > { %v5767_v19 = vunpack.i.h.bf16 %v5765_v56  ;;  %v5766_v20 = vunpack.i.l.bf16 %v5765_v56 }
 0x2dd   : > { %v3572_v43 = vsel %vm380_vm0, %v7511_v29, %v5751_v36  ;;  %v3573_v14 = vsel %vm380_vm0, %v7513_v11, %v5752_v17  ;;  %v2908_v36 = vld [vmem:[#allocation3 + $0x30] sm:$0xff] }
 0x2de   : > { %v5008_v12 = vpack.c.bf16 %v3573_v14, %v3572_v43  ;;  %v3543_v33 = vsel %vm380_vm0, %v8595_v21, %v5767_v19  ;;  %v3542_v51 = vsel %vm380_vm0, %v8596_v25, %v5766_v20  ;;  %v2675_v21 = vld [vmem:[%s8411_s4] sm:$0xff] }
 0x2df   : > { %v5014_v38 = vpack.c.bf16 %v3543_v33, %v3542_v51 }
 0x2e0   : > { %5009 = vmatprep.subr.bf16.mxu1 %v5008_v12  ;;  %v2843_v12 = vld [vmem:[#allocation3 + $0x19] sm:$0xff] }
 0x2e1   : > { %5011 = vmatpush1.bf16.xpose.msra.mxu1 %v5010_v60  ;;  %v2844_v60 = vld [vmem:[#allocation3 + $0x21] sm:$0xff] }
 0x2e2   : > { %v5760_v61 = vpop.permute.xlu0 %5759 }
 0x2e3   : > { %v5762_v49 = vunpack.i.h.bf16 %v5760_v61  ;;  %v5761_v37 = vunpack.i.l.bf16 %v5760_v61  ;;  %v5775_v4 = vpop.permute.xlu1 %5774  ;;  %v2910_v61 = vld [vmem:[#allocation3 + $0x48] sm:$0xff] }
 0x2e4   : > { %v5777_v63 = vunpack.i.h.bf16 %v5775_v4  ;;  %v5776_v26 = vunpack.i.l.bf16 %v5775_v4 }
 0x2e5   : > { %v3574_v29 = vsel %vm380_vm0, %v8571_v45, %v5761_v37  ;;  %v3575_v11 = vsel %vm380_vm0, %v8572_v62, %v5762_v49  ;;  %v2911_v49 = vld [vmem:[#allocation3 + $0x50] sm:$0xff] }
 0x2e6   : > { %v5012_v5 = vpack.c.bf16 %v3575_v11, %v3574_v29  ;;  %v3545_v52 = vsel %vm380_vm0, %v8597_v10, %v5777_v63  ;;  %v3544_v39 = vsel %vm380_vm0, %v8598_v18, %v5776_v26  ;;  %v2681_v29 = vld [vmem:[%s8411_s4 + $0x30] sm:$0xff]  ;;  %v2845_v10 = vld [vmem:[#allocation3 + $0x31] sm:$0xff] }
 0x2e7   : > { %v5018_v47 = vpack.c.bf16 %v3545_v52, %v3544_v39  ;;  %v2846_v52 = vld [vmem:[#allocation3 + $0x39] sm:$0xff] }
 0x2e8   : > { %5013 = vmatprep.subr.bf16.mxu1 %v5012_v5 }
 0x2e9   : > { %5015 = vmatpush1.bf16.xpose.msra.mxu1 %v5014_v38 }
 0x2ea   : > { %v5770_v28 = vpop.permute.xlu0 %5769 }
 0x2eb   : > { %v5772_v15 = vunpack.i.h.bf16 %v5770_v28  ;;  %v5771_v31 = vunpack.i.l.bf16 %v5770_v28  ;;  %v5785_v22 = vpop.permute.xlu1 %5784  ;;  %v2680_v28 = vld [vmem:[%s8411_s4 + $0x28] sm:$0xff] }
 0x2ec   : > { %v5787_v48 = vunpack.i.h.bf16 %v5785_v22  ;;  %v5786_v8 = vunpack.i.l.bf16 %v5785_v22  ;;  %v2684_v22 = vld [vmem:[%s8411_s4 + $0x48] sm:$0xff] }
 0x2ed   : > { %v3576_v45 = vsel %vm380_vm0, %v8576_v53, %v5771_v31  ;;  %v3577_v62 = vsel %vm380_vm0, %v8577_v46, %v5772_v15  ;;  %v2679_v15 = vld [vmem:[%s8411_s4 + $0x20] sm:$0xff]  ;;  %v2686_v31 = vld [vmem:[%s8411_s4 + $0x58] sm:$0xff] }
 0x2ee   : > { %v5016_v16 = vpack.c.bf16 %v3577_v62, %v3576_v45  ;;  %v3547_v40 = vsel %vm380_vm0, %v8599_v41, %v5787_v48  ;;  %v3546_v32 = vsel %vm380_vm0, %v8600_v42, %v5786_v8  ;;  %4768 = vmatprep.mubr.msk.f32.mxu0 %vm380_vm0, %v2679_v15  ;;  %v2912_v45 = vld [vmem:[#allocation3 + $0x60] sm:$0xff]  ;;  %v2913_v62 = vld [vmem:[#allocation3 + $0x68] sm:$0xff] }
 0x2ef   : > { %v5795_v57 = vpop.permute.xlu1 %5794  ;;  %v5022_v17 = vpack.c.bf16 %v3547_v40, %v3546_v32  ;;  %4769 = vmatmul.mubr.msk.f32.vlgmr.msra.gmra.mrb[64].mxu0 %vm380_vm0, %v2679_v15  ;;  %v2685_v8 = vld [vmem:[%s8411_s4 + $0x50] sm:$0xff] }
 0x2f0   : > { %5017 = vmatprep.subr.bf16.mxu1 %v5016_v16  ;;  %v5797_v24 = vunpack.i.h.bf16 %v5795_v57  ;;  %v5796_v44 = vunpack.i.l.bf16 %v5795_v57  ;;  %4770 = vmatprep.mubr.msk.f32.mxu0 %vm380_vm0, %v2684_v22  ;;  %v2689_v57 = vld [vmem:[%s8411_s4 + $0x70] sm:$0xff] }
 0x2f1   : > { %5019 = vmatpush1.bf16.xpose.msra.mxu1 %v5018_v47 }
 0x2f2   : > { %v5780_v1 = vpop.permute.xlu0 %5779  ;;  %v3581_v19 = vsel %vm380_vm0, %v2844_v60, %v5797_v24  ;;  %v3580_v20 = vsel %vm380_vm0, %v2843_v12, %v5796_v44  ;;  %v2694_v24 = vld [vmem:[%s8411_s4 + $0x98] sm:$0xff] }
 0x2f3   : > { %v5782_v7 = vunpack.i.h.bf16 %v5780_v1  ;;  %v5781_v9 = vunpack.i.l.bf16 %v5780_v1  ;;  %v5805_v37 = vpop.permute.xlu1 %5804  ;;  %v5026_v11 = vpack.c.bf16 %v3581_v19, %v3580_v20  ;;  %4771 = vmatmul.mubr.msk.f32.gmra.mrb[66].mxu0 %vm380_vm0, %v2684_v22  ;;  %v2710_v22 = vld [vmem:[%s8411_s4 + $0x118] sm:$0xff] }
 0x2f4   : > { %v5807_v4 = vunpack.i.h.bf16 %v5805_v37  ;;  %v5806_v5 = vunpack.i.l.bf16 %v5805_v37  ;;  %4772 = vmatprep.mubr.msk.f32.mxu0 %vm380_vm0, %v2689_v57  ;;  %v2699_v37 = vld [vmem:[%s8411_s4 + $0xc0] sm:$0xff] }
 0x2f5   : > { %v3578_v53 = vsel %vm380_vm0, %v8579_v30, %v5781_v9  ;;  %v3579_v46 = vsel %vm380_vm0, %v8580_v50, %v5782_v7  ;;  %v2691_v7 = vld [vmem:[%s8411_s4 + $0x80] sm:$0xff] }
 0x2f6   : > { %v5790_v54 = vpop.permute.xlu0 %5789  ;;  %v5020_v23 = vpack.c.bf16 %v3579_v46, %v3578_v53  ;;  %v3583_v18 = vsel %vm380_vm0, %v2846_v52, %v5807_v4  ;;  %v3582_v39 = vsel %vm380_vm0, %v2845_v10, %v5806_v5  ;;  %v2690_v46 = vld [vmem:[%s8411_s4 + $0x78] sm:$0xff]  ;;  %v2917_v4 = vld [vmem:[#allocation3 + $0x98] sm:$0xff] }
 0x2f7   : > { %v5792_v27 = vunpack.i.h.bf16 %v5790_v54  ;;  %v5791_v0 = vunpack.i.l.bf16 %v5790_v54  ;;  %v5815_v16 = vpop.permute.xlu1 %5814  ;;  %v5030_v9 = vpack.c.bf16 %v3583_v18, %v3582_v39  ;;  %v2696_v54 = vld [vmem:[%s8411_s4 + $0xa8] sm:$0xff]  ;;  %4773 = vmatmul.mubr.msk.f32.gmra.mrb[68].mxu0 %vm380_vm0, %v2689_v57 }
 0x2f8   : > { %5021 = vmatprep.subr.bf16.mxu1 %v5020_v23  ;;  %v5817_v41 = vunpack.i.h.bf16 %v5815_v16  ;;  %v5816_v40 = vunpack.i.l.bf16 %v5815_v16  ;;  %v2847_v23 = vld [vmem:[#allocation3 + $0x49] sm:$0xff]  ;;  %4774 = vmatprep.mubr.msk.f32.mxu0 %vm380_vm0, %v2694_v24  ;;  %v2704_v5 = vld [vmem:[%s8411_s4 + $0xe8] sm:$0xff] }
 0x2f9   : > { %v3612_v2 = vsel %vm380_vm0, %v2908_v36, %v5791_v0  ;;  %v3613_v43 = vsel %vm380_vm0, %v2909_v55, %v5792_v27  ;;  %5023 = vmatpush1.bf16.xpose.msra.mxu1 %v5022_v17  ;;  %v2848_v27 = vld [vmem:[#allocation3 + $0x51] sm:$0xff]  ;;  %v2915_v55 = vld [vmem:[#allocation3 + $0x80] sm:$0xff]  ;;  %v2678_v16 = vld [vmem:[%s8411_s4 + $0x18] sm:$0xff] }
 0x2fa   : > { %v5800_v30 = vpop.permute.xlu0 %5799  ;;  %v5024_v14 = vpack.c.bf16 %v3613_v43, %v3612_v2  ;;  %v3585_v0 = vsel %vm380_vm0, %v2848_v27, %v5817_v41  ;;  %v3584_v17 = vsel %vm380_vm0, %v2847_v23, %v5816_v40  ;;  %v2914_v36 = vld [vmem:[#allocation3 + $0x78] sm:$0xff] }
 0x2fb   : > { %v5802_v56 = vunpack.i.h.bf16 %v5800_v30  ;;  %v5801_v50 = vunpack.i.l.bf16 %v5800_v30  ;;  %v5825_v44 = vpop.permute.xlu1 %5824  ;;  %v2695_v30 = vld [vmem:[%s8411_s4 + $0xa0] sm:$0xff]  ;;  %4775 = vmatmul.mubr.msk.f32.gmra.mrb[70].mxu0 %vm380_vm0, %v2694_v24  ;;  %v2920_v24 = vld [vmem:[#allocation3 + $0xc0] sm:$0xff] }
 0x2fc   : > { %5025 = vmatprep.subr.bf16.mxu1 %v5024_v14  ;;  %v5827_v12 = vunpack.i.h.bf16 %v5825_v44  ;;  %v5826_v60 = vunpack.i.l.bf16 %v5825_v44  ;;  %4776 = vmatprep.mubr.msk.f32.mxu0 %vm380_vm0, %v2699_v37  ;;  %v2921_v44 = vld [vmem:[#allocation3 + $0xc8] sm:$0xff] }
 0x2fd   : > { %v3614_v33 = vsel %vm380_vm0, %v2910_v61, %v5801_v50  ;;  %v3615_v25 = vsel %vm380_vm0, %v2911_v49, %v5802_v56  ;;  %v2701_v56 = vld [vmem:[%s8411_s4 + $0xd0] sm:$0xff]  ;;  %v5034_v50 = vpack.c.bf16 %v3585_v0, %v3584_v17  ;;  %v2700_v49 = vld [vmem:[%s8411_s4 + $0xc8] sm:$0xff] }
 0x2fe   : > { %v5810_v51 = vpop.permute.xlu0 %5809  ;;  %v5028_v38 = vpack.c.bf16 %v3615_v25, %v3614_v33  ;;  %v2849_v33 = vld [vmem:[#allocation3 + $0x61] sm:$0xff]  ;;  %v2850_v25 = vld [vmem:[#allocation3 + $0x69] sm:$0xff]  ;;  %v2853_v0 = vld [vmem:[#allocation3 + $0x91] sm:$0xff] }
 0x2ff   : > { %v5812_v63 = vunpack.i.h.bf16 %v5810_v51  ;;  %v5811_v26 = vunpack.i.l.bf16 %v5810_v51  ;;  %4777 = vmatmul.mubr.msk.f32.gmra.mrb[72].mxu0 %vm380_vm0, %v2699_v37  ;;  %v3587_v51 = vsel %vm380_vm0, %v2850_v25, %v5827_v12  ;;  %v2854_v17 = vld [vmem:[#allocation3 + $0x99] sm:$0xff] }
 0x300   : > { %3869 = vmatmul.mubr.f32.vlgmr.msra.gmra.mrb[32].mxu1 %v2675_v21  ;;  %v2706_v21 = vld [vmem:[%s8411_s4 + $0xf8] sm:$0xff]  ;;  %4778 = vmatprep.mubr.msk.f32.mxu0 %vm380_vm0, %v2704_v5  ;;  %v2923_v25 = vld [vmem:[#allocation3 + $0xe0] sm:$0xff] }
 0x301   : > { %5027 = vmatpush1.bf16.xpose.msra.mxu1 %v5026_v11  ;;  %3874 = vmatprep.mubr.f32.mxu1 %v2681_v29  ;;  %v3616_v47 = vsel %vm380_vm0, %v2912_v45, %v5811_v26  ;;  %v3617_v48 = vsel %vm380_vm0, %v2913_v62, %v5812_v63  ;;  %v3586_v29 = vsel %vm380_vm0, %v2849_v33, %v5826_v60  ;;  %v2916_v11 = vld [vmem:[#allocation3 + $0x90] sm:$0xff]  ;;  %v2922_v33 = vld [vmem:[#allocation3 + $0xd8] sm:$0xff] }
 0x302   : > { %5029 = vmatprep.subr.bf16.mxu1 %v5028_v38  ;;  %v5820_v1 = vpop.permute.xlu0 %5819  ;;  %v5032_v42 = vpack.c.bf16 %v3617_v48, %v3616_v47  ;;  %v5835_v38 = vpop.permute.xlu1 %5834  ;;  %v5038_v10 = vpack.c.bf16 %v3587_v51, %v3586_v29  ;;  %v2851_v47 = vld [vmem:[#allocation3 + $0x79] sm:$0xff]  ;;  %v2852_v48 = vld [vmem:[#allocation3 + $0x81] sm:$0xff] }
 0x303   : > { %v5822_v32 = vunpack.i.h.bf16 %v5820_v1  ;;  %v5821_v53 = vunpack.i.l.bf16 %v5820_v1  ;;  %4779 = vmatmul.mubr.msk.f32.gmra.mrb[74].mxu0 %vm380_vm0, %v2704_v5  ;;  %v5837_v52 = vunpack.i.h.bf16 %v5835_v38  ;;  %v5836_v18 = vunpack.i.l.bf16 %v5835_v38 }
 0x304   : > { %3875 = vmatmul.mubr.f32.gmra.mrb[34].mxu1 %v2680_v28  ;;  %v2705_v28 = vld [vmem:[%s8411_s4 + $0xf0] sm:$0xff] }
 0x305   : > { %3880 = vmatprep.mubr.f32.mxu1 %v2686_v31  ;;  %v3618_v2 = vsel %vm380_vm0, %v2914_v36, %v5821_v53  ;;  %v3619_v43 = vsel %vm380_vm0, %v2915_v55, %v5822_v32  ;;  %v2711_v31 = vld [vmem:[%s8411_s4 + $0x120] sm:$0xff]  ;;  %v3588_v1 = vsel %vm380_vm0, %v2851_v47, %v5836_v18 }
 0x306   : > { %v5830_v14 = vpop.permute.xlu0 %5829  ;;  %v5036_v19 = vpack.c.bf16 %v3619_v43, %v3618_v2  ;;  %v5845_v41 = vpop.permute.xlu1 %5844 }
 0x307   : > { %v5832_v20 = vunpack.i.h.bf16 %v5830_v14  ;;  %v5831_v61 = vunpack.i.l.bf16 %v5830_v14  ;;  %v5846_v57 = vunpack.i.l.bf16 %v5845_v41 }
 0x308   : > { %3881 = vmatmul.mubr.f32.gmra.mrb[36].mxu1 %v2685_v8  ;;  %v3589_v8 = vsel %vm380_vm0, %v2852_v48, %v5837_v52 }
 0x309   : > { %5031 = vmatpush1.bf16.xpose.msra.mxu1 %v5030_v9  ;;  %3886 = vmatprep.mubr.f32.mxu1 %v2691_v7  ;;  %v3620_v63 = vsel %vm380_vm0, %v2916_v11, %v5831_v61  ;;  %v3621_v26 = vsel %vm380_vm0, %v2917_v4, %v5832_v20  ;;  %v2918_v7 = vld [vmem:[#allocation3 + $0xa8] sm:$0xff]  ;;  %v2919_v9 = vld [vmem:[#allocation3 + $0xb0] sm:$0xff]  ;;  %v5042_v53 = vpack.c.bf16 %v3589_v8, %v3588_v1 }
 0x30a   : > { %5033 = vmatprep.subr.bf16.mxu1 %v5032_v42  ;;  %v5840_v15 = vpop.permute.xlu0 %5839  ;;  %v5040_v39 = vpack.c.bf16 %v3621_v26, %v3620_v63  ;;  %v3590_v55 = vsel %vm380_vm0, %v2853_v0, %v5846_v57  ;;  %v5855_v2 = vpop.permute.xlu1 %5854  ;;  %v2855_v61 = vld [vmem:[#allocation3 + $0xa9] sm:$0xff] }
 0x30b   : > { %v5842_v45 = vunpack.i.h.bf16 %v5840_v15  ;;  %v5841_v62 = vunpack.i.l.bf16 %v5840_v15  ;;  %v5856_v12 = vunpack.i.l.bf16 %v5855_v2  ;;  %v2927_v57 = vld [vmem:[#allocation3 + $0x110] sm:$0xff] }
 0x30c   : > { %3887 = vmatmul.mubr.f32.gmra.mrb[38].mxu1 %v2690_v46  ;;  %v5847_v46 = vunpack.i.h.bf16 %v5845_v41 }
 0x30d   : > { %3892 = vmatprep.mubr.f32.mxu1 %v2696_v54  ;;  %v3622_v40 = vsel %vm380_vm0, %v2918_v7, %v5841_v62  ;;  %v3623_v42 = vsel %vm380_vm0, %v2919_v9, %v5842_v45  ;;  %v2925_v45 = vld [vmem:[#allocation3 + $0xf8] sm:$0xff] }
 0x30e   : > { %v5850_v32 = vpop.permute.xlu0 %5849  ;;  %v5044_v54 = vpack.c.bf16 %v3623_v42, %v3622_v40  ;;  %v3591_v36 = vsel %vm380_vm0, %v2854_v17, %v5847_v46  ;;  %v5865_v51 = vpop.permute.xlu1 %5864  ;;  %v2859_v40 = vld [vmem:[#allocation3 + $0xd9] sm:$0xff]  ;;  %v2860_v42 = vld [vmem:[#allocation3 + $0xe1] sm:$0xff] }
 0x30f   : > { %v5852_v23 = vunpack.i.h.bf16 %v5850_v32  ;;  %v5851_v27 = vunpack.i.l.bf16 %v5850_v32  ;;  %v5867_v38 = vunpack.i.h.bf16 %v5865_v51  ;;  %v5866_v63 = vunpack.i.l.bf16 %v5865_v51  ;;  %v2926_v46 = vld [vmem:[#allocation3 + $0x108] sm:$0xff] }
 0x310   : > { %3893 = vmatmul.mubr.f32.gmra.mrb[40].mxu1 %v2695_v30 }
 0x311   : > { %5035 = vmatpush1.bf16.xpose.msra.mxu1 %v5034_v50  ;;  %3898 = vmatprep.mubr.f32.mxu1 %v2701_v56  ;;  %v3624_v43 = vsel %vm380_vm0, %v2920_v24, %v5851_v27  ;;  %v3625_v30 = vsel %vm380_vm0, %v2921_v44, %v5852_v23  ;;  %v5046_v56 = vpack.c.bf16 %v3591_v36, %v3590_v55  ;;  %v5857_v50 = vunpack.i.h.bf16 %v5855_v2 }
 0x312   : > { %5037 = vmatprep.subr.bf16.mxu1 %v5036_v19  ;;  %v5860_v14 = vpop.permute.xlu0 %5859  ;;  %v5048_v60 = vpack.c.bf16 %v3625_v30, %v3624_v43  ;;  %v5875_v62 = vpop.permute.xlu1 %5874  ;;  %v2861_v43 = vld [vmem:[#allocation3 + $0xf1] sm:$0xff]  ;;  %v2862_v30 = vld [vmem:[#allocation3 + $0xf9] sm:$0xff] }
 0x313   : > { %v5862_v19 = vunpack.i.h.bf16 %v5860_v14  ;;  %v5861_v20 = vunpack.i.l.bf16 %v5860_v14  ;;  %v5877_v8 = vunpack.i.h.bf16 %v5875_v62  ;;  %v5876_v1 = vunpack.i.l.bf16 %v5875_v62  ;;  %v2928_v14 = vld [vmem:[#allocation3 + $0x120] sm:$0xff] }
 0x314   : > { %3899 = vmatmul.mubr.f32.gmra.mrb[42].mxu1 %v2700_v49  ;;  %v2856_v49 = vld [vmem:[#allocation3 + $0xb1] sm:$0xff] }
 0x315   : > { %3904 = vmatprep.mubr.f32.mxu1 %v2706_v21  ;;  %v3593_v37 = vsel %vm380_vm0, %v2856_v49, %v5857_v50  ;;  %v3592_v21 = vsel %vm380_vm0, %v2855_v61, %v5856_v12  ;;  %v3626_v29 = vsel %vm380_vm0, %v2922_v33, %v5861_v20  ;;  %v3627_v11 = vsel %vm380_vm0, %v2923_v25, %v5862_v19  ;;  %v2929_v12 = vld [vmem:[#allocation3 + $0x128] sm:$0xff]  ;;  %v398_v19 = vld [vmem:[%s8412_s5 + $0x8] sm:$0xff]  ;;  %v399_v25 = vld [vmem:[%s8412_s5 + $0x10] sm:$0xff] }
 0x316   : > { %v5870_v4 = vpop.permute.xlu0 %5869  ;;  %v5050_v5 = vpack.c.bf16 %v3593_v37, %v3592_v21  ;;  %v5052_v26 = vpack.c.bf16 %v3627_v11, %v3626_v29  ;;  %v3597_v32 = vsel %vm380_vm0, %v2860_v42, %v5877_v8  ;;  %v5995_v37 = vmov 0   ;;  %v2866_v42 = vld [vmem:[#allocation3 + $0x129] sm:$0xff] }
 0x317   : > { %v5871_v15 = vunpack.i.l.bf16 %v5870_v4  ;;  %5948 = vset.pattern.permute.xlu0 %v5995_v37  ;;  %5949 = vset.pattern.permute.xlu1 %v5995_v37 }
 0x318   : > { %3905 = vmatmul.mubr.f32.gmra.mrb[44].mxu1 %v2705_v28  ;;  %v5872_v28 = vunpack.i.h.bf16 %v5870_v4  ;;  %3651 = vperm.xlu1 %5949, %v398_v19   ;;  %v400_v4 = vld [vmem:[%s8412_s5 + $0x18] sm:$0xff] }
 0x319   : > { %5039 = vmatpush1.bf16.xpose.msra.mxu1 %v5038_v10  ;;  %3910 = vmatprep.mubr.f32.mxu1 %v2711_v31  ;;  %v2857_v31 = vld [vmem:[#allocation3 + $0xc1] sm:$0xff]  ;;  %v2858_v10 = vld [vmem:[#allocation3 + $0xc9] sm:$0xff] }
 0x31a   : > { %5041 = vmatprep.subr.bf16.mxu1 %v5040_v39  ;;  %v3595_v52 = vsel %vm380_vm0, %v2858_v10, %v5867_v38  ;;  %v3594_v18 = vsel %vm380_vm0, %v2857_v31, %v5866_v63  ;;  %v2924_v39 = vld [vmem:[#allocation3 + $0xf0] sm:$0xff]  ;;  %v5880_v47 = vpop.permute.xlu0 %5879  ;;  %v2930_v10 = vld [vmem:[#allocation3 + $0x138] sm:$0xff] }
 0x31b   : > { %v5054_v48 = vpack.c.bf16 %v3595_v52, %v3594_v18  ;;  %v5882_v9 = vunpack.i.h.bf16 %v5880_v47  ;;  %v5881_v41 = vunpack.i.l.bf16 %v5880_v47  ;;  %v2863_v63 = vld [vmem:[#allocation3 + $0x109] sm:$0xff]  ;;  %v2931_v52 = vld [vmem:[#allocation3 + $0x140] sm:$0xff]  ;;  %v402_v18 = vld [vmem:[%s8412_s5 + $0x28] sm:$0xff] }
 0x31c   : > { %3911 = vmatmul.mubr.f32.gmra.mrb[46].mxu1 %v2710_v22  ;;  %v3628_v22 = vsel %vm380_vm0, %v2924_v39, %v5871_v15  ;;  %3656 = vperm.xlu1 %5949, %v399_v25   ;;  %v403_v47 = vld [vmem:[%s8412_s5 + $0x30] sm:$0xff] }
 0x31d   : > { %3981 = vmatprep.mubr.f32.mxu1 %v2678_v16  ;;  %v3629_v16 = vsel %vm380_vm0, %v2925_v45, %v5872_v28  ;;  %v3630_v23 = vsel %vm380_vm0, %v2926_v46, %v5881_v41  ;;  %v3631_v27 = vsel %vm380_vm0, %v2927_v57, %v5882_v9  ;;  %v401_v28 = vld [vmem:[%s8412_s5 + $0x20] sm:$0xff]  ;;  %v2933_v57 = vld [vmem:[#allocation3 + $0x158] sm:$0xff] }
 0x31e   : > { %v5056_v7 = vpack.c.bf16 %v3629_v16, %v3628_v22  ;;  %v5890_v0 = vpop.permute.xlu0 %5889  ;;  %v5060_v24 = vpack.c.bf16 %v3631_v27, %v3630_v23  ;;  %v2932_v46 = vld [vmem:[#allocation3 + $0x150] sm:$0xff] }
 0x31f   : > { %v5892_v44 = vunpack.i.h.bf16 %v5890_v0  ;;  %v5891_v2 = vunpack.i.l.bf16 %v5890_v0 }
 0x320   : > { %3666 = vperm.xlu1 %5949, %v401_v28  }
 0x321   : > { %5043 = vmatpush1.bf16.xpose.msra.mxu1 %v5042_v53  ;;  %v3596_v53 = vsel %vm380_vm0, %v2859_v40, %v5876_v1  ;;  %v3632_v61 = vsel %vm380_vm0, %v2928_v14, %v5891_v2  ;;  %v3633_v49 = vsel %vm380_vm0, %v2929_v12, %v5892_v44  ;;  %v2865_v40 = vld [vmem:[#allocation3 + $0x121] sm:$0xff]  ;;  %v2935_v12 = vld [vmem:[#allocation3 + $0x170] sm:$0xff] }
 0x322   : > { %5045 = vmatprep.subr.bf16.mxu1 %v5044_v54  ;;  %v5885_v54 = vpop.permute.xlu1 %5884  ;;  %v5058_v17 = vpack.c.bf16 %v3597_v32, %v3596_v53  ;;  %v5900_v21 = vpop.permute.xlu0 %5899  ;;  %v5064_v11 = vpack.c.bf16 %v3633_v49, %v3632_v61 }
 0x323   : > { %v5887_v36 = vunpack.i.h.bf16 %v5885_v54  ;;  %v5886_v55 = vunpack.i.l.bf16 %v5885_v54  ;;  %v5901_v38 = vunpack.i.l.bf16 %v5900_v21 }
 0x324   : > { %3676 = vperm.xlu1 %5949, %v403_v47   ;;  %v2871_v47 = vld [vmem:[#allocation3 + $0x169] sm:$0xff] }
 0x325   : > { %v3598_v50 = vsel %vm380_vm0, %v2861_v43, %v5886_v55  ;;  %v3634_v45 = vsel %vm380_vm0, %v2930_v10, %v5901_v38  ;;  %v2867_v43 = vld [vmem:[#allocation3 + $0x139] sm:$0xff] }
 0x326   : > { %v5895_v20 = vpop.permute.xlu1 %5894  ;;  %v5910_v22 = vpop.permute.xlu0 %5909  ;;  %v2936_v38 = vld [vmem:[#allocation3 + $0x180] sm:$0xff] }
 0x327   : > { %v5897_v51 = vunpack.i.h.bf16 %v5895_v20  ;;  %v5896_v29 = vunpack.i.l.bf16 %v5895_v20  ;;  %v5912_v9 = vunpack.i.h.bf16 %v5910_v22  ;;  %v5911_v41 = vunpack.i.l.bf16 %v5910_v22  ;;  %v2938_v22 = vld [vmem:[#allocation3 + $0x198] sm:$0xff] }
 0x329   : > { %5047 = vmatpush1.bf16.xpose.msra.mxu1 %v5046_v56  ;;  %v3599_v56 = vsel %vm380_vm0, %v2862_v30, %v5887_v36  ;;  %v3600_v31 = vsel %vm380_vm0, %v2863_v63, %v5896_v29  ;;  %v3636_v23 = vsel %vm380_vm0, %v2932_v46, %v5911_v41  ;;  %v3637_v27 = vsel %vm380_vm0, %v2933_v57, %v5912_v9  ;;  %v2868_v30 = vld [vmem:[#allocation3 + $0x141] sm:$0xff]  ;;  %v2869_v29 = vld [vmem:[#allocation3 + $0x151] sm:$0xff] }
 0x32a   : > { %5049 = vmatprep.subr.bf16.mxu1 %v5048_v60  ;;  %v397_v60 = vld [vmem:[%s8412_s5] sm:$0xff]  ;;  %v5062_v33 = vpack.c.bf16 %v3599_v56, %v3598_v50  ;;  %v5905_v39 = vpop.permute.xlu1 %5904  ;;  %v5920_v0 = vpop.permute.xlu0 %5919  ;;  %v2934_v50 = vld [vmem:[#allocation3 + $0x168] sm:$0xff] }
 0x32b   : > { %3646 = vperm.xlu0 %5948, %v397_v60   ;;  %v5906_v8 = vunpack.i.l.bf16 %v5905_v39  ;;  %v5922_v44 = vunpack.i.h.bf16 %v5920_v0  ;;  %v5921_v2 = vunpack.i.l.bf16 %v5920_v0  ;;  %v2937_v63 = vld [vmem:[#allocation3 + $0x188] sm:$0xff]  ;;  %v2683_v0 = vld [vmem:[%s8411_s4 + $0x40] sm:$0xff] }
 0x32d   : > { %v3602_v53 = vsel %vm380_vm0, %v2865_v40, %v5906_v8  ;;  %v3638_v19 = vsel %vm380_vm0, %v2934_v50, %v5921_v2  ;;  %v3639_v20 = vsel %vm380_vm0, %v2935_v12, %v5922_v44  ;;  %v8604_v44 = vld [vmem:[#allocation20_spill] sm:$0xff]  ;;  %v2692_v2 = vld [vmem:[%s8411_s4 + $0x88] sm:$0xff]  ;;  %v8606_v50 = vld [vmem:[#allocation26_spill] sm:$0xff] }
 0x32e   : > { %v5915_v54 = vpop.permute.xlu1 %5914  ;;  %v5930_v61 = vpop.permute.xlu0 %5929  ;;  %v2702_v12 = vld [vmem:[%s8411_s4 + $0xd8] sm:$0xff] }
 0x32f   : > { %3661 = vperm.xlu0 %5948, %v400_v4   ;;  %v5917_v36 = vunpack.i.h.bf16 %v5915_v54  ;;  %v5916_v55 = vunpack.i.l.bf16 %v5915_v54  ;;  %v5932_v25 = vunpack.i.h.bf16 %v5930_v61 }
 0x331   : > { %5051 = vmatpush1.bf16.xpose.msra.mxu1 %v5050_v5  ;;  %v5902_v5 = vunpack.i.h.bf16 %v5900_v21  ;;  %v3605_v14 = vsel %vm380_vm0, %v2868_v30, %v5917_v36  ;;  %v3604_v56 = vsel %vm380_vm0, %v2867_v43, %v5916_v55  ;;  %v2688_v36 = vld [vmem:[%s8411_s4 + $0x68] sm:$0xff]  ;;  %v2687_v55 = vld [vmem:[%s8411_s4 + $0x60] sm:$0xff]  ;;  %v8605_v43 = vld [vmem:[#allocation24_spill] sm:$0xff] }
 0x332   : > { %5053 = vmatprep.subr.bf16.mxu1 %v5052_v26  ;;  %v2864_v26 = vld [vmem:[#allocation3 + $0x111] sm:$0xff]  ;;  %v5925_v60 = vpop.permute.xlu1 %5924  ;;  %v5074_v49 = vpack.c.bf16 %v3605_v14, %v3604_v56  ;;  %v2698_v30 = vld [vmem:[%s8411_s4 + $0xb8] sm:$0xff]  ;;  %v2697_v14 = vld [vmem:[%s8411_s4 + $0xb0] sm:$0xff] }
 0x333   : > { %v3601_v15 = vsel %vm380_vm0, %v2864_v26, %v5897_v51  ;;  %v3635_v62 = vsel %vm380_vm0, %v2931_v52, %v5902_v5  ;;  %3671 = vperm.xlu0 %5948, %v402_v18   ;;  %v5927_v37 = vunpack.i.h.bf16 %v5925_v60  ;;  %v5926_v21 = vunpack.i.l.bf16 %v5925_v60  ;;  %v5940_v26 = vpop.permute.xlu0 %5939  ;;  %v2703_v56 = vld [vmem:[%s8411_s4 + $0xe0] sm:$0xff]  ;;  %v8607_v60 = vld [vmem:[#allocation31_spill] sm:$0xff] }
 0x334   : > { %v5066_v16 = vpack.c.bf16 %v3601_v15, %v3600_v31  ;;  %v5068_v1 = vpack.c.bf16 %v3635_v62, %v3634_v45  ;;  %v5931_v51 = vunpack.i.l.bf16 %v5930_v61  ;;  %v3641_v31 = vsel %vm380_vm0, %v2937_v63, %v5932_v25  ;;  %v2713_v61 = vld [vmem:[%s8411_s4 + $0x130] sm:$0xff] }
 0x335   : > { %v3606_v5 = vsel %vm380_vm0, %v2869_v29, %v5926_v21  ;;  %v5942_v52 = vunpack.i.h.bf16 %v5940_v26  ;;  %v5941_v18 = vunpack.i.l.bf16 %v5940_v26  ;;  %v8609_v21 = vld [vmem:[#allocation38_spill] sm:$0xff]  ;;  %v8610_v25 = vld [vmem:[#allocation40_spill] sm:$0xff]  ;;  %v8612_v29 = vld [vmem:[#allocation47_spill] sm:$0xff] }
 0x336   : > { %v5935_v28 = vpop.permute.xlu1 %5934  ;;  %v3640_v15 = vsel %vm380_vm0, %v2936_v38, %v5931_v51  ;;  %v8611_v51 = vld [vmem:[#allocation45_spill] sm:$0xff] }
 0x337   : > { %v5936_v45 = vunpack.i.l.bf16 %v5935_v28  ;;  %v5080_v62 = vpack.c.bf16 %v3641_v31, %v3640_v15  ;;  %v3642_v8 = vsel %vm380_vm0, %v2938_v22, %v5941_v18  ;;  %v8613_v31 = vmov 0.0  }
 0x338   : > { %2667 = vst.msk [vmem:[#allocation5] sm:$0xff] %vm2666_vm4, %v8613_v31  ;;  %2668 = vst.msk [vmem:[#allocation5 + $0x8] sm:$0xff] %vm2666_vm4, %v8613_v31 }
 0x339   : > { %5055 = vmatpush1.bf16.xpose.msra.mxu1 %v5054_v48  ;;  %v5907_v48 = vunpack.i.h.bf16 %v5905_v39  ;;  %v5937_v39 = vunpack.i.h.bf16 %v5935_v28  ;;  %v3608_v9 = vsel %vm380_vm0, %v2871_v47, %v5936_v45  ;;  %2669 = vst.msk [vmem:[#allocation5 + $0x10] sm:$0xff] %vm2666_vm4, %v8613_v31  ;;  %2670 = vst.msk [vmem:[#allocation5 + $0x18] sm:$0xff] %vm2666_vm4, %v8613_v31 }
 0x33a   : > { %5057 = vmatprep.subr.bf16.mxu1 %v5056_v7  ;;  %v404_v7 = vld [vmem:[%s8412_s5 + $0x38] sm:$0xff]  ;;  %v5945_v41 = vpop.permute.xlu1 %5944  ;;  %2671 = vst.msk [vmem:[#allocation5 + $0x20] sm:$0xff] %vm2666_vm4, %v8613_v31  ;;  %2672 = vst.msk [vmem:[#allocation5 + $0x28] sm:$0xff] %vm2666_vm4, %v8613_v31 }
 0x33b   : > { %3681 = vperm.xlu0 %5948, %v404_v7   ;;  %v3603_v32 = vsel %vm380_vm0, %v2866_v42, %v5907_v48  ;;  %v2872_v48 = vld [vmem:[#allocation3 + $0x171] sm:$0xff]  ;;  %2673 = vst.msk [vmem:[#allocation5 + $0x30] sm:$0xff] %vm2666_vm4, %v8613_v31  ;;  %2674 = vst.msk [vmem:[#allocation5 + $0x38] sm:$0xff] %vm2666_vm4, %v8613_v31 }
 0x33c   : > { %v3609_v7 = vsel %vm380_vm0, %v2872_v48, %v5937_v39 }
 0x33d   : > { %v5082_v42 = vpack.c.bf16 %v3609_v7, %v3608_v9 }
 0x33f   : > { %v4144_v31 = vld [vmem:[#allocation5 + $0x8] sm:$0xff] }
 0x341   : > { %5059 = vmatpush1.bf16.xpose.msra.mxu1 %v5058_v17  ;;  %v5070_v17 = vpack.c.bf16 %v3603_v32, %v3602_v53  ;;  %v5947_v32 = vunpack.i.h.bf16 %v5945_v41  ;;  %v5946_v53 = vunpack.i.l.bf16 %v5945_v41 }
 0x342   : > { %5061 = vmatprep.subr.bf16.mxu1 %v5060_v24  ;;  %v5072_v24 = vpack.c.bf16 %v3637_v27, %v3636_v23  ;;  %v8601_v23 = vld [vmem:[#allocation15_spill] sm:$0xff]  ;;  %v2677_v27 = vld [vmem:[%s8411_s4 + $0x10] sm:$0xff] }
 0x343   : > { %v3611_v46 = vsel %vm380_vm0, %v7840_v58, %v5947_v32  ;;  %v3610_v57 = vsel %vm380_vm0, %v7838_v3, %v5946_v53  ;;  %v2682_v3 = vld [vmem:[%s8411_s4 + $0x38] sm:$0xff]  ;;  %v8603_v58 = vld [vmem:[#allocation19_spill] sm:$0xff] }
 0x344   : > { %v5086_v54 = vpack.c.bf16 %v3611_v46, %v3610_v57 }
 0x349   : > { %5063 = vmatpush1.bf16.xpose.msra.mxu1 %v5062_v33  ;;  %v5076_v33 = vpack.c.bf16 %v3639_v20, %v3638_v19  ;;  %v2708_v19 = vld [vmem:[%s8411_s4 + $0x108] sm:$0xff]  ;;  %v2707_v20 = vld [vmem:[%s8411_s4 + $0x100] sm:$0xff] }
 0x34a   : > { %5065 = vmatprep.subr.bf16.mxu1 %v5064_v11  ;;  %v2870_v11 = vld [vmem:[#allocation3 + $0x159] sm:$0xff] }
 0x34b   : > { %v3607_v4 = vsel %vm380_vm0, %v2870_v11, %v5927_v37  ;;  %v2712_v37 = vld [vmem:[%s8411_s4 + $0x128] sm:$0xff]  ;;  %v2714_v11 = vld [vmem:[%s8411_s4 + $0x138] sm:$0xff] }
 0x34c   : > { %v5078_v10 = vpack.c.bf16 %v3607_v4, %v3606_v5 }
 0x351   : > { %5067 = vmatpush1.bf16.xpose.msra.mxu1 %v5066_v16  ;;  %v2939_v16 = vld [vmem:[#allocation3 + $0x1a0] sm:$0xff] }
 0x352   : > { %5069 = vmatprep.subr.bf16.mxu1 %v5068_v1  ;;  %v3643_v1 = vsel %vm380_vm0, %v2939_v16, %v5942_v52 }
 0x353   : > { %v5084_v40 = vpack.c.bf16 %v3643_v1, %v3642_v8 }
 0x359   : > { %5071 = vmatpush1.bf16.xpose.msra.mxu1 %v5070_v17  ;;  %v8602_v17 = vld [vmem:[#allocation16_spill] sm:$0xff] }
 0x35a   : > { %5073 = vmatprep.subr.bf16.mxu1 %v5072_v24  ;;  %v2693_v24 = vld [vmem:[%s8411_s4 + $0x90] sm:$0xff] }
 0x361   : > { %5075 = vmatpush1.bf16.xpose.msra.mxu1 %v5074_v49  ;;  %v8608_v49 = vld [vmem:[#allocation33_spill] sm:$0xff] }
 0x362   : > { %5077 = vmatprep.subr.bf16.mxu1 %v5076_v33  ;;  %v2709_v33 = vld [vmem:[%s8411_s4 + $0x110] sm:$0xff] }
 0x369   : > { %5079 = vmatpush1.bf16.xpose.msra.mxu1 %v5078_v10 }
 0x36a   : > { %5081 = vmatprep.subr.bf16.mxu1 %v5080_v62 }
 0x371   : > { %5083 = vmatpush1.bf16.xpose.msra.mxu1 %v5082_v42 }
 0x372   : > { %5085 = vmatprep.subr.bf16.mxu1 %v5084_v40 }
 0x379   : > { %5087 = vmatpush1.bf16.xpose.msra.mxu1 %v5086_v54 }
 0x37a   : > { %5136 = vmatprep.subr.msk.bf16.mxu1 %vm7410_vm3, %v8601_v23 }
 0x380   : > { %3982 = vmatmul.mubr.f32.vlgmr.msra.gmra.mrb[32].mxu1 %v2677_v27 }
 0x381   : > { %5144 = vmatpush3.bf16.xpose.msk.msra.mxu1 %vm7410_vm3, %v8602_v17  ;;  %3987 = vmatprep.mubr.f32.mxu1 %v2683_v0 }
 0x382   : > { %5137 = vmatprep.subr.msk.bf16.mxu1 %vm7410_vm3, %v8603_v58 }
 0x384   : > { %3988 = vmatmul.mubr.f32.gmra.mrb[34].mxu1 %v2682_v3 }
 0x385   : > { %3993 = vmatprep.mubr.f32.mxu1 %v2688_v36 }
 0x388   : > { %3994 = vmatmul.mubr.f32.gmra.mrb[36].mxu1 %v2687_v55 }
 0x389   : > { %5145 = vmatpush3.bf16.xpose.msk.msra.mxu1 %vm7410_vm3, %v8604_v44  ;;  %3999 = vmatprep.mubr.f32.mxu1 %v2693_v24 }
 0x38a   : > { %5138 = vmatprep.subr.msk.bf16.mxu1 %vm7410_vm3, %v8605_v43 }
 0x38c   : > { %4000 = vmatmul.mubr.f32.gmra.mrb[38].mxu1 %v2692_v2 }
 0x38d   : > { %4005 = vmatprep.mubr.f32.mxu1 %v2698_v30 }
 0x390   : > { %4006 = vmatmul.mubr.f32.gmra.mrb[40].mxu1 %v2697_v14 }
 0x391   : > { %5146 = vmatpush3.bf16.xpose.msk.msra.mxu1 %vm7410_vm3, %v8606_v50  ;;  %4011 = vmatprep.mubr.f32.mxu1 %v2703_v56 }
 0x392   : > { %5139 = vmatprep.subr.msk.bf16.mxu1 %vm7410_vm3, %v8607_v60 }
 0x394   : > { %4012 = vmatmul.mubr.f32.gmra.mrb[42].mxu1 %v2702_v12 }
 0x395   : > { %4017 = vmatprep.mubr.f32.mxu1 %v2708_v19 }
 0x397   : > { %v3652_v18 = vpop.permute.xlu1 %3651 }
 0x398   : > { %4018 = vmatmul.mubr.f32.gmra.mrb[44].mxu1 %v2707_v20 }
 0x399   : > { %5147 = vmatpush3.bf16.xpose.msk.msra.mxu1 %vm7410_vm3, %v8608_v49  ;;  %4023 = vmatprep.mubr.f32.mxu1 %v2713_v61 }
 0x39a   : > { %5140 = vmatprep.subr.msk.bf16.mxu1 %vm7410_vm3, %v8609_v21 }
 0x39b   : > { %v3657_v9 = vpop.permute.xlu1 %3656 }
 0x39c   : > { %4024 = vmatmul.mubr.f32.gmra.mrb[46].mxu1 %v2712_v37 }
 0x39d   : > { %4780 = vmatprep.mubr.msk.f32.mxu1 %vm380_vm0, %v2709_v33 }
 0x39f   : > { %v3667_v55 = vpop.permute.xlu1 %3666 }
 0x3a1   : > { %5148 = vmatpush3.bf16.xpose.msk.msra.mxu1 %vm7410_vm3, %v8610_v25 }
 0x3a2   : > { %5141 = vmatprep.subr.msk.bf16.mxu1 %vm7410_vm3, %v8611_v51 }
 0x3a3   : > { %v3677_v51 = vpop.permute.xlu1 %3676 }
 0x3a9   : > { %5149 = vmatpush3.bf16.xpose.msk.msra.mxu1 %vm7410_vm3, %v8612_v29 }
 0x3aa   : > { %5142 = vmatprep.subr.msk.bf16.mxu1 %vm7410_vm3, %v7681_v59  ;;  %v3647_v10 = vpop.permute.xlu0 %3646 }
 0x3ae   : > { %v3662_v54 = vpop.permute.xlu0 %3661 }
 0x3b1   : > { %5150 = vmatpush3.bf16.xpose.msk.msra.mxu1 %vm7410_vm3, %v7693_v13 }
 0x3b2   : > { %5143 = vmatprep.subr.msk.bf16.mxu1 %vm7410_vm3, %v7685_v6  ;;  %v3672_v50 = vpop.permute.xlu0 %3671 }
 0x3b9   : > { %5151 = vmatpush3.bf16.xpose.msk.msra.mxu1 %vm7410_vm3, %v7726_v35 }
 0x3c0   : > { %4781 = vmatmul.mubr.msk.f32.vlgmr.msra.gmra.mrb[44].mxu1 %vm380_vm0, %v2709_v33 }
 0x3c1   : > { %4782 = vmatprep.mubr.msk.f32.mxu1 %vm380_vm0, %v2714_v11 }
 0x3c2   : > { %v4096_v59 = vpop.f32.mrb[64].mxu0 }
 0x3c3   : > { %v4098_v13 = vpop.f32.mrb[65].mxu0 }
 0x3c4   : > { %4783 = vmatmul.mubr.msk.f32.gmra.mrb[46].mxu1 %vm380_vm0, %v2714_v11 }
 0x3c6   : > { %v4102_v4 = vpop.f32.mrb[66].mxu0 }
 0x3c7   : > { %v4104_v5 = vpop.f32.mrb[67].mxu0 }
 0x3ca   : > { %v4108_v38 = vpop.f32.mrb[68].mxu0 }
 0x3cb   : > { %v4110_v6 = vpop.f32.mrb[69].mxu0 }
 0x3ce   : > { %v4114_v63 = vpop.f32.mrb[70].mxu0 }
 0x3cf   : > { %v4116_v26 = vpop.f32.mrb[71].mxu0 }
 0x3d2   : > { %v4120_v34 = vpop.f32.mrb[72].mxu0 }
 0x3d3   : > { %v4122_v35 = vpop.f32.mrb[73].mxu0 }
 0x3d6   : > { %v4126_v28 = vpop.f32.mrb[74].mxu0 }
 0x3d7   : > { %v4128_v15 = vpop.f32.mrb[75].mxu0 }
 0x453   : > { %v3983_v52 = vpop.f32.mrb[32].mxu1 }
 0x454   : > { %v5184_v39 = vadd.f32 %v3983_v52, %v3647_v10  ;;  %v3985_v45 = vpop.f32.mrb[33].mxu1 }
 0x455   : > { %v5186_v62 = vadd.f32 %v3985_v45, %v3647_v10 }
 0x456   : > { %v8198_v22 = vadd.f32 %v5184_v39, %v4096_v59 }
 0x457   : > { %v8200_v16 = vadd.f32 %v5186_v62, %v4098_v13  ;;  %v3989_v47 = vpop.f32.mrb[34].mxu1  ;;  %v4146_v62 = vld [vmem:[#allocation5 + $0x18] sm:$0xff] }
 0x458   : > { %v5188_v48 = vadd.f32 %v3989_v47, %v3652_v18  ;;  %v3991_v8 = vpop.f32.mrb[35].mxu1 }
 0x459   : > { %v4151_v1 = vadd.f32 %v8200_v16, %v8198_v22  ;;  %v5190_v7 = vadd.f32 %v3991_v8, %v3652_v18  ;;  %v4145_v18 = vld [vmem:[#allocation5 + $0x10] sm:$0xff] }
 0x45a   : > { %v8204_v41 = vadd.f32 %v5188_v48, %v4102_v4  ;;  %v3682_v4 = vpop.permute.xlu0 %3681 }
 0x45b   : > { %v8206_v40 = vadd.f32 %v5190_v7, %v4104_v5  ;;  %4152 = vadd.xlane.f32.xlu1 %v4151_v1  ;;  %v3995_v42 = vpop.f32.mrb[36].mxu1  ;;  %v4147_v7 = vld [vmem:[#allocation5 + $0x20] sm:$0xff] }
 0x45c   : > { %v5192_v32 = vadd.f32 %v3995_v42, %v3657_v9  ;;  %v3997_v53 = vpop.f32.mrb[37].mxu1 }
 0x45d   : > { %v4154_v46 = vadd.f32 %v8206_v40, %v8204_v41  ;;  %v5194_v57 = vadd.f32 %v3997_v53, %v3657_v9 }
 0x45e   : > { %v8210_v23 = vadd.f32 %v5192_v32, %v4108_v38 }
 0x45f   : > { %v8212_v27 = vadd.f32 %v5194_v57, %v4110_v6  ;;  %4155 = vadd.xlane.f32.xlu0 %v4154_v46  ;;  %v4001_v0 = vpop.f32.mrb[38].mxu1  ;;  %v4148_v46 = vld [vmem:[#allocation5 + $0x28] sm:$0xff] }
 0x460   : > { %v5196_v17 = vadd.f32 %v4001_v0, %v3662_v54  ;;  %v4003_v3 = vpop.f32.mrb[39].mxu1 }
 0x461   : > { %v4157_v58 = vadd.f32 %v8212_v27, %v8210_v23  ;;  %v5198_v36 = vadd.f32 %v4003_v3, %v3662_v54 }
 0x462   : > { %v8216_v24 = vadd.f32 %v5196_v17, %v4114_v63 }
 0x463   : > { %v8218_v44 = vadd.f32 %v5198_v36, %v4116_v26  ;;  %4158 = vadd.xlane.f32.xlu0 %v4157_v58  ;;  %v4007_v2 = vpop.f32.mrb[40].mxu1 }
 0x464   : > { %v5200_v43 = vadd.f32 %v4007_v2, %v3667_v55  ;;  %v4009_v30 = vpop.f32.mrb[41].mxu1 }
 0x465   : > { %v4160_v14 = vadd.f32 %v8218_v44, %v8216_v24  ;;  %v5202_v56 = vadd.f32 %v4009_v30, %v3667_v55  ;;  %v4149_v30 = vld [vmem:[#allocation5 + $0x30] sm:$0xff] }
 0x466   : > { %v8222_v12 = vadd.f32 %v5200_v43, %v4120_v34 }
 0x467   : > { %v8224_v60 = vadd.f32 %v5202_v56, %v4122_v35  ;;  %4161 = vadd.xlane.f32.xlu1 %v4160_v14  ;;  %v4013_v19 = vpop.f32.mrb[42].mxu1  ;;  %v4143_v35 = vld [vmem:[#allocation5] sm:$0xff] }
 0x468   : > { %v5204_v20 = vadd.f32 %v4013_v19, %v3672_v50  ;;  %v4015_v61 = vpop.f32.mrb[43].mxu1 }
 0x469   : > { %v4163_v49 = vadd.f32 %v8224_v60, %v8222_v12  ;;  %v5206_v37 = vadd.f32 %v4015_v61, %v3672_v50  ;;  %v4150_v50 = vld [vmem:[#allocation5 + $0x38] sm:$0xff] }
 0x46a   : > { %v8228_v21 = vadd.f32 %v5204_v20, %v4126_v28 }
 0x46b   : > { %v8230_v33 = vadd.f32 %v5206_v37, %v4128_v15  ;;  %4164 = vadd.xlane.f32.xlu0 %v4163_v49 }
 0x46d   : > { %v4166_v25 = vadd.f32 %v8230_v33, %v8228_v21 }
 0x46f   : > { %4167 = vadd.xlane.f32.xlu1 %v4166_v25 }
 0x493   : > { %v4132_v29 = vpop.f32.mrb[44].mxu1 }
 0x494   : > { %v8234_v11 = vadd.f32 %v4132_v29, %v3677_v51  ;;  %v4134_v59 = vpop.f32.mrb[45].mxu1 }
 0x495   : > { %v8236_v13 = vadd.f32 %v4134_v59, %v3677_v51  ;;  %v4224_v59 = vld [vmem:[%s8413_s6 + $0x8] sm:$0xff] }
 0x497   : > { %v4169_v5 = vadd.f32 %v8236_v13, %v8234_v11  ;;  %v4138_v38 = vpop.f32.mrb[46].mxu1 }
 0x498   : > { %v8240_v6 = vadd.f32 %v4138_v38, %v3682_v4  ;;  %v4140_v63 = vpop.f32.mrb[47].mxu1 }
 0x499   : > { %v8242_v26 = vadd.f32 %v4140_v63, %v3682_v4  ;;  %4170 = vadd.xlane.f32.xlu0 %v4169_v5  ;;  %v4223_v4 = vld [vmem:[%s8413_s6] sm:$0xff]  ;;  %v4225_v5 = vld [vmem:[%s8413_s6 + $0x10] sm:$0xff] }
 0x49b   : > { %v4172_v34 = vadd.f32 %v8242_v26, %v8240_v6 }
 0x49d   : > { %4173 = vadd.xlane.f32.xlu1 %v4172_v34  ;;  %v4226_v34 = vld [vmem:[%s8413_s6 + $0x18] sm:$0xff] }
 0x4e8   : > { %v4153_v28 = vpop.xlane.xlu1 %4152 }
 0x4e9   : > { %v4175_v15 = vadd.f32 %v4153_v28, %v4143_v35 }
 0x4eb   : > { %4183 = vst.msk [vmem:[#allocation5] sm:$0xff] %vm2666_vm4, %v4175_v15 }
 0x4ec   : > { %v4156_v10 = vpop.xlane.xlu0 %4155 }
 0x4ed   : > { %v4176_v52 = vadd.f32 %v4156_v10, %v4144_v31  ;;  %v4227_v31 = vld [vmem:[%s8413_s6 + $0x20] sm:$0xff] }
 0x4ef   : > { %4184 = vst.msk [vmem:[#allocation5 + $0x8] sm:$0xff] %vm2666_vm4, %v4176_v52 }
 0x4f0   : > { %v4159_v39 = vpop.xlane.xlu0 %4158 }
 0x4f1   : > { %v4177_v45 = vadd.f32 %v4159_v39, %v4145_v18  ;;  %v4228_v39 = vld [vmem:[%s8413_s6 + $0x28] sm:$0xff] }
 0x4f2   : > { %v4207_v47 = vld [vmem:[#allocation5] sm:$0xff] }
 0x4f3   : > { %4185 = vst.msk [vmem:[#allocation5 + $0x10] sm:$0xff] %vm2666_vm4, %v4177_v45  ;;  %v4215_v48 = vmul.f32 0.00390625, %v4207_v47 }
 0x4f4   : > { %v4162_v8 = vpop.xlane.xlu1 %4161 }
 0x4f5   : > { %v4178_v1 = vadd.f32 %v4162_v8, %v4146_v62  ;;  %4233 = vperm.xlu0 %5948, %v4215_v48  }
 0x4f6   : > { %v4208_v9 = vld [vmem:[#allocation5 + $0x8] sm:$0xff] }
 0x4f7   : > { %4186 = vst.msk [vmem:[#allocation5 + $0x18] sm:$0xff] %vm2666_vm4, %v4178_v1  ;;  %v4216_v42 = vmul.f32 0.00390625, %v4208_v9 }
 0x4f8   : > { %v4165_v32 = vpop.xlane.xlu0 %4164 }
 0x4f9   : > { %v4179_v53 = vadd.f32 %v4165_v32, %v4147_v7  ;;  %4238 = vperm.xlu1 %5949, %v4216_v42   ;;  %v4229_v42 = vld [vmem:[%s8413_s6 + $0x30] sm:$0xff] }
 0x4fa   : > { %v4209_v57 = vld [vmem:[#allocation5 + $0x10] sm:$0xff] }
 0x4fb   : > { %4187 = vst.msk [vmem:[#allocation5 + $0x20] sm:$0xff] %vm2666_vm4, %v4179_v53  ;;  %v4217_v54 = vmul.f32 0.00390625, %v4209_v57 }
 0x4fc   : > { %v4168_v0 = vpop.xlane.xlu1 %4167 }
 0x4fd   : > { %v4180_v17 = vadd.f32 %v4168_v0, %v4148_v46  ;;  %4243 = vperm.xlu1 %5949, %v4217_v54  }
 0x4fe   : > { %v4210_v3 = vld [vmem:[#allocation5 + $0x18] sm:$0xff] }
 0x4ff   : > { %4188 = vst.msk [vmem:[#allocation5 + $0x28] sm:$0xff] %vm2666_vm4, %v4180_v17  ;;  %v4218_v58 = vmul.f32 0.00390625, %v4210_v3  ;;  %v4230_v17 = vld [vmem:[%s8413_s6 + $0x38] sm:$0xff] }
 0x501   : > { %4248 = vperm.xlu0 %5948, %v4218_v58  }
 0x502   : > { %v4211_v36 = vld [vmem:[#allocation5 + $0x20] sm:$0xff] }
 0x503   : > { %v4219_v55 = vmul.f32 0.00390625, %v4211_v36 }
 0x505   : > { %4253 = vperm.xlu1 %5949, %v4219_v55  }
 0x506   : > { %v4212_v2 = vld [vmem:[#allocation5 + $0x28] sm:$0xff] }
 0x507   : > { %v4220_v43 = vmul.f32 0.00390625, %v4212_v2 }
 0x509   : > { %4258 = vperm.xlu0 %5948, %v4220_v43  }
 0x526   : > { %v4171_v14 = vpop.xlane.xlu0 %4170 }
 0x527   : > { %v4181_v56 = vadd.f32 %v4171_v14, %v4149_v30 }
 0x529   : > { %4189 = vst.msk [vmem:[#allocation5 + $0x30] sm:$0xff] %vm2666_vm4, %v4181_v56 }
 0x52a   : > { %v4174_v19 = vpop.xlane.xlu1 %4173 }
 0x52b   : > { %v4182_v20 = vadd.f32 %v4174_v19, %v4150_v50  ;;  %v4312_v50 = vlaneseq }
 0x52d   : > { %4190 = vst.msk [vmem:[#allocation5 + $0x38] sm:$0xff] %vm2666_vm4, %v4182_v20 }
 0x530   : > { %v4213_v61 = vld [vmem:[#allocation5 + $0x30] sm:$0xff] }
 0x531   : > { %v4221_v49 = vmul.f32 0.00390625, %v4213_v61  ;;  %v4313_v61 = vshrl.u32 %v4312_v50, 7 }
 0x533   : > { %4263 = vperm.xlu1 %5949, %v4221_v49  }
 0x534   : > { %v4214_v37 = vld [vmem:[#allocation5 + $0x38] sm:$0xff] }
 0x535   : > { %v4222_v25 = vmul.f32 0.00390625, %v4214_v37  ;;  %v4301_v37 = vld [vmem:[%s8414_s7] sm:$0x1] }
 0x537   : > { %4268 = vperm.xlu0 %5948, %v4222_v25  }
 0x574   : > { %v4234_v29 = vpop.permute.xlu0 %4233 }
 0x575   : > { %v4271_v28 = vmul.f32 %v4234_v29, %v4223_v4  ;;  %v4305_v4 = vld [vmem:[%s8415_s8 + $0x8] sm:$0xff] }
 0x577   : > { %v4280_v62 = vsel %vm4279_vm5, %v4271_v28, 0.0 }
 0x578   : > { %v4239_v51 = vpop.permute.xlu1 %4238 }
 0x579   : > { %v4272_v63 = vmul.f32 %v4239_v51, %v4224_v59  ;;  %v4314_v51 = vsub.s32 0, %v4313_v61 }
 0x57b   : > { %v4281_v52 = vsel %vm4279_vm5, %v4272_v63, 0.0  ;;  %v4306_v63 = vld [vmem:[%s8415_s8 + $0x10] sm:$0xff] }
 0x57c   : > { %v4244_v38 = vpop.permute.xlu1 %4243  ;;  %v4282_v8 = vadd.f32 %v4281_v52, %v4280_v62 }
 0x57d   : > { %v4273_v15 = vmul.f32 %v4244_v38, %v4225_v5  ;;  %v4304_v5 = vld [vmem:[%s8415_s8] sm:$0xff] }
 0x57f   : > { %v4283_v47 = vsel %vm4279_vm5, %v4273_v15, 0.0 }
 0x580   : > { %v4249_v35 = vpop.permute.xlu0 %4248  ;;  %v4284_v9 = vadd.f32 %v4283_v47, %v4282_v8  ;;  %v4310_v8 = vld [vmem:[%s8415_s8 + $0x30] sm:$0xff] }
 0x581   : > { %v4274_v18 = vmul.f32 %v4249_v35, %v4226_v34  ;;  %v4307_v34 = vld [vmem:[%s8415_s8 + $0x18] sm:$0xff] }
 0x583   : > { %v4285_v1 = vsel %vm4279_vm5, %v4274_v18, 0.0  ;;  %v4308_v18 = vld [vmem:[%s8415_s8 + $0x20] sm:$0xff] }
 0x584   : > { %v4254_v10 = vpop.permute.xlu1 %4253  ;;  %v4286_v53 = vadd.f32 %v4285_v1, %v4284_v9  ;;  %v4311_v1 = vld [vmem:[%s8415_s8 + $0x38] sm:$0xff] }
 0x585   : > { %v4275_v48 = vmul.f32 %v4254_v10, %v4227_v31 }
 0x587   : > { %v4287_v32 = vsel %vm4279_vm5, %v4275_v48, 0.0 }
 0x588   : > { %v4259_v45 = vpop.permute.xlu0 %4258  ;;  %v4288_v0 = vadd.f32 %v4287_v32, %v4286_v53 }
 0x589   : > { %v4276_v7 = vmul.f32 %v4259_v45, %v4228_v39  ;;  %v4309_v39 = vld [vmem:[%s8415_s8 + $0x28] sm:$0xff] }
 0x58b   : > { %v4289_v57 = vsel %vm4279_vm5, %v4276_v7, 0.0 }
 0x58c   : > { %v4290_v58 = vadd.f32 %v4289_v57, %v4288_v0  ;;  %v4349_v57 = vld [vmem:[%s8416_s9 + $0x8] sm:$0xff] }
 0x5b2   : > { %v4264_v46 = vpop.permute.xlu1 %4263 }
 0x5b3   : > { %v4277_v54 = vmul.f32 %v4264_v46, %v4229_v42 }
 0x5b5   : > { %v4291_v3 = vsel %vm4279_vm5, %v4277_v54, 0.0  ;;  %v4348_v54 = vld [vmem:[%s8416_s9] sm:$0xff] }
 0x5b6   : > { %v4269_v36 = vpop.permute.xlu0 %4268  ;;  %v4292_v2 = vadd.f32 %v4291_v3, %v4290_v58 }
 0x5b7   : > { %v4278_v55 = vmul.f32 %v4269_v36, %v4230_v17  ;;  %v4350_v36 = vld [vmem:[%s8416_s9 + $0x10] sm:$0xff] }
 0x5b9   : > { %v4293_v43 = vsel %vm4279_vm5, %v4278_v55, 0.0  ;;  %v4351_v55 = vld [vmem:[%s8416_s9 + $0x18] sm:$0xff] }
 0x5ba   : > { %v4294_v30 = vadd.f32 %v4293_v43, %v4292_v2 }
 0x5bc   : > { %v4295_v14 = vrot.slane %v4294_v30, 4 }
 0x5be   : > { %v4296_v56 = vadd.f32 %v4295_v14, %v4294_v30 }
 0x5c0   : > { %v4297_v19 = vrot.slane %v4296_v56, 2 }
 0x5c2   : > { %v4298_v20 = vadd.f32 %v4297_v19, %v4296_v56  ;;  %v4352_v19 = vld [vmem:[%s8416_s9 + $0x20] sm:$0xff] }
 0x5c4   : > { %v4299_v49 = vrot.slane %v4298_v20, 1 }
 0x5c6   : > { %v4300_v25 = vadd.f32 %v4299_v49, %v4298_v20  ;;  %v4353_v20 = vld [vmem:[%s8416_s9 + $0x28] sm:$0xff] }
 0x5c8   : > { %v4302_v29 = vadd.f32 %v4301_v37, %v4300_v25 }
 0x5ca   : > { %v4303_v59 = vmax.f32 %v4302_v29, 0.0 }
 0x5cc   : > { %v4315_v38 = vrot.slane %v4303_v59, %v4314_v51  ;;  %v4354_v59 = vld [vmem:[%s8416_s9 + $0x30] sm:$0xff] }
 0x5ce   : > { %v4317_v35 = vmul.f32 %v4315_v38, %v4305_v4  ;;  %v4316_v28 = vmul.f32 %v4315_v38, %v4304_v5  ;;  %v4318_v10 = vmul.f32 %v4315_v38, %v4306_v63  ;;  %v4319_v52 = vmul.f32 %v4315_v38, %v4307_v34  ;;  %v4355_v4 = vld [vmem:[%s8416_s9 + $0x38] sm:$0xff] }
 0x5cf   : > { %v4320_v47 = vmul.f32 %v4315_v38, %v4308_v18  ;;  %v4321_v48 = vmul.f32 %v4315_v38, %v4309_v39  ;;  %v4322_v42 = vmul.f32 %v4315_v38, %v4310_v8  ;;  %v4323_v32 = vmul.f32 %v4315_v38, %v4311_v1 }
 0x5d0   : > { %v4327_v15 = vsel %vm4279_vm5, %v4317_v35, 0.0  ;;  %v4324_v31 = vsel %vm4279_vm5, %v4316_v28, 0.0  ;;  %v4330_v45 = vsel %vm4279_vm5, %v4318_v10, 0.0  ;;  %v4333_v62 = vsel %vm4279_vm5, %v4319_v52, 0.0 }
 0x5d1   : > { %4328 = vadd.xlane.f32.xlu0 %v4327_v15  ;;  %4325 = vadd.xlane.f32.xlu1 %v4324_v31  ;;  %v4336_v7 = vsel %vm4279_vm5, %v4320_v47, 0.0  ;;  %v4339_v9 = vsel %vm4279_vm5, %v4321_v48, 0.0  ;;  %v4342_v53 = vsel %vm4279_vm5, %v4322_v42, 0.0  ;;  %v4345_v46 = vsel %vm4279_vm5, %v4323_v32, 0.0 }
 0x5d5   : > { %4331 = vadd.xlane.f32.xlu0 %v4330_v45  ;;  %4334 = vadd.xlane.f32.xlu1 %v4333_v62 }
 0x5d9   : > { %4337 = vadd.xlane.f32.xlu0 %v4336_v7  ;;  %4340 = vadd.xlane.f32.xlu1 %v4339_v9 }
 0x5dd   : > { %4343 = vadd.xlane.f32.xlu0 %v4342_v53  ;;  %4346 = vadd.xlane.f32.xlu1 %v4345_v46 }
 0x65e   : > { %v4329_v0 = vpop.xlane.xlu0 %4328  ;;  %v4326_v17 = vpop.xlane.xlu1 %4325 }
 0x65f   : > { %v4357_v3 = vadd.f32 %v4349_v57, %v4329_v0  ;;  %v4356_v58 = vadd.f32 %v4348_v54, %v4326_v17 }
 0x661   : > { %v4684_v2 = vmul.f32 -1.442695, %v4357_v3  ;;  %v4683_v43 = vmul.f32 -1.442695, %v4356_v58 }
 0x662   : > { %v4332_v30 = vpop.xlane.xlu0 %4331  ;;  %v4335_v14 = vpop.xlane.xlu1 %4334 }
 0x663   : > { %5950 = vpow2.f32 %v4684_v2  ;;  %v4358_v56 = vadd.f32 %v4350_v36, %v4332_v30  ;;  %v4359_v50 = vadd.f32 %v4351_v55, %v4335_v14  ;;  %v4430_v2 = vld [vmem:[%s8349_s17 + $0x10] sm:$0xff]  ;;  %v4428_v14 = vld [vmem:[%s8349_s17] sm:$0xff] }
 0x664   : > { %5952 = vpow2.f32 %v4683_v43  ;;  %v4431_v43 = vld [vmem:[%s8349_s17 + $0x18] sm:$0xff] }
 0x665   : > { %v4685_v61 = vmul.f32 -1.442695, %v4358_v56  ;;  %v4686_v49 = vmul.f32 -1.442695, %v4359_v50  ;;  %v4429_v56 = vld [vmem:[%s8349_s17 + $0x8] sm:$0xff] }
 0x666   : > { %v4338_v37 = vpop.xlane.xlu0 %4337  ;;  %v4341_v25 = vpop.xlane.xlu1 %4340 }
 0x667   : > { %5954 = vpow2.f32 %v4685_v61  ;;  %v4360_v51 = vadd.f32 %v4352_v19, %v4338_v37  ;;  %v4361_v29 = vadd.f32 %v4353_v20, %v4341_v25 }
 0x668   : > { %5956 = vpow2.f32 %v4686_v49 }
 0x669   : > { %v4687_v5 = vmul.f32 -1.442695, %v4360_v51  ;;  %v4688_v38 = vmul.f32 -1.442695, %v4361_v29 }
 0x66a   : > { %v4344_v63 = vpop.xlane.xlu0 %4343  ;;  %v4347_v34 = vpop.xlane.xlu1 %4346 }
 0x66b   : > { %5958 = vpow2.f32 %v4687_v5  ;;  %v4362_v35 = vadd.f32 %v4354_v59, %v4344_v63  ;;  %v4363_v28 = vadd.f32 %v4355_v4, %v4347_v34  ;;  %v4433_v59 = vld [vmem:[%s8349_s17 + $0x28] sm:$0xff]  ;;  %v4434_v4 = vld [vmem:[%s8349_s17 + $0x30] sm:$0xff]  ;;  %v4435_v5 = vld [vmem:[%s8349_s17 + $0x38] sm:$0xff] }
 0x66c   : > { %5960 = vpow2.f32 %v4688_v38 }
 0x66d   : > { %v5951_v15 = vpop.eup %5950  ;;  %v4689_v31 = vmul.f32 -1.442695, %v4362_v35  ;;  %v4690_v18 = vmul.f32 -1.442695, %v4363_v28 }
 0x66e   : > { %v5953_v10 = vpop.eup %5952  ;;  %v4389_v52 = vadd.f32 1.0, %v5951_v15 }
 0x66f   : > { %v4388_v39 = vadd.f32 1.0, %v5953_v10  ;;  %5962 = vpow2.f32 %v4689_v31  ;;  %v4436_v10 = vld [vmem:[%s8349_s17 + $0x40] sm:$0xff] }
 0x670   : > { %5964 = vrcp.f32 %v4389_v52  ;;  %v4437_v52 = vld [vmem:[%s8349_s17 + $0x48] sm:$0xff] }
 0x671   : > { %v5955_v45 = vpop.eup %5954  ;;  %5966 = vrcp.f32 %v4388_v39 }
 0x672   : > { %v5957_v62 = vpop.eup %5956  ;;  %v4390_v47 = vadd.f32 1.0, %v5955_v45  ;;  %5968 = vpow2.f32 %v4690_v18 }
 0x673   : > { %v4391_v48 = vadd.f32 1.0, %v5957_v62 }
 0x674   : > { %5970 = vrcp.f32 %v4390_v47 }
 0x675   : > { %v5959_v8 = vpop.eup %5958  ;;  %5972 = vrcp.f32 %v4391_v48 }
 0x676   : > { %v5961_v1 = vpop.eup %5960  ;;  %v4392_v7 = vadd.f32 1.0, %v5959_v8 }
 0x677   : > { %v4393_v9 = vadd.f32 1.0, %v5961_v1 }
 0x678   : > { %5974 = vrcp.f32 %v4392_v7  ;;  %v4440_v7 = vld [vmem:[%s8349_s17 + $0x60] sm:$0xff] }
 0x679   : > { %v5963_v42 = vpop.eup %5962  ;;  %5976 = vrcp.f32 %v4393_v9  ;;  %v4441_v9 = vld [vmem:[%s8349_s17 + $0x68] sm:$0xff] }
 0x67a   : > { %v5965_v32 = vpop.eup %5964  ;;  %v4394_v53 = vadd.f32 1.0, %v5963_v42  ;;  %v4443_v42 = vld [vmem:[%s8349_s17 + $0x78] sm:$0xff] }
 0x67b   : > { %v5967_v46 = vpop.eup %5966  ;;  %4451 = vperm.xlu1 %5949, %v5965_v32  }
 0x67c   : > { %v5969_v57 = vpop.eup %5968  ;;  %5978 = vrcp.f32 %v4394_v53  ;;  %4446 = vperm.xlu0 %5948, %v5967_v46  }
 0x67d   : > { %v4395_v54 = vadd.f32 1.0, %v5969_v57 }
 0x67e   : > { %v5971_v0 = vpop.eup %5970 }
 0x67f   : > { %v5973_v17 = vpop.eup %5972  ;;  %5980 = vrcp.f32 %v4395_v54  ;;  %4456 = vperm.xlu1 %5949, %v5971_v0  }
 0x680   : > { %4461 = vperm.xlu0 %5948, %v5973_v17  }
 0x682   : > { %v5975_v3 = vpop.eup %5974 }
 0x683   : > { %v5977_v58 = vpop.eup %5976  ;;  %4466 = vperm.xlu1 %5949, %v5975_v3  }
 0x684   : > { %4471 = vperm.xlu0 %5948, %v5977_v58  }
 0x686   : > { %v5979_v36 = vpop.eup %5978 }
 0x687   : > { %4476 = vperm.xlu1 %5949, %v5979_v36  }
 0x689   : > { %v5981_v55 = vpop.eup %5980 }
 0x68a   : > { %4481 = vperm.xlu0 %5948, %v5981_v55  }
 0x6fa   : > { %v4452_v30 = vpop.permute.xlu1 %4451 }
 0x6fb   : > { %v4447_v50 = vpop.permute.xlu0 %4446  ;;  %v4486_v19 = vmul.f32 %v8204_v41, %v4452_v30  ;;  %v4487_v20 = vmul.f32 %v8206_v40, %v4452_v30  ;;  %v4432_v41 = vld [vmem:[%s8349_s17 + $0x20] sm:$0xff] }
 0x6fc   : > { %v4484_v61 = vmul.f32 %v8198_v22, %v4447_v50  ;;  %v4485_v49 = vmul.f32 %v8200_v16, %v4447_v50 }
 0x6fd   : > { %v4502_v37 = vadd.f32 %v4486_v19, %v4430_v2  ;;  %v4503_v25 = vadd.f32 %v4487_v20, %v4431_v43 }
 0x6fe   : > { %v4500_v51 = vadd.f32 %v4484_v61, %v4428_v14  ;;  %v4501_v29 = vadd.f32 %v4485_v49, %v4429_v56  ;;  %v4457_v40 = vpop.permute.xlu1 %4456 }
 0x6ff   : > { %4518 = vst [vmem:[%s8360_s19 + $0x10] sm:$0xff] %v4502_v37  ;;  %4519 = vst [vmem:[%s8360_s19 + $0x18] sm:$0xff] %v4503_v25  ;;  %v4462_v22 = vpop.permute.xlu0 %4461  ;;  %v4488_v16 = vmul.f32 %v8210_v23, %v4457_v40  ;;  %v4489_v38 = vmul.f32 %v8212_v27, %v4457_v40  ;;  %v4438_v23 = vld [vmem:[%s8349_s17 + $0x50] sm:$0xff]  ;;  %v4439_v27 = vld [vmem:[%s8349_s17 + $0x58] sm:$0xff] }
 0x700   : > { %4516 = vst [vmem:[%s8360_s19] sm:$0xff] %v4500_v51  ;;  %4517 = vst [vmem:[%s8360_s19 + $0x8] sm:$0xff] %v4501_v29  ;;  %v4490_v63 = vmul.f32 %v8216_v24, %v4462_v22  ;;  %v4491_v34 = vmul.f32 %v8218_v44, %v4462_v22 }
 0x701   : > { %v4504_v35 = vadd.f32 %v4488_v16, %v4432_v41  ;;  %v4505_v28 = vadd.f32 %v4489_v38, %v4433_v59 }
 0x702   : > { %v4506_v15 = vadd.f32 %v4490_v63, %v4434_v4  ;;  %v4507_v31 = vadd.f32 %v4491_v34, %v4435_v5  ;;  %v4467_v18 = vpop.permute.xlu1 %4466 }
 0x703   : > { %4520 = vst [vmem:[%s8360_s19 + $0x20] sm:$0xff] %v4504_v35  ;;  %4521 = vst [vmem:[%s8360_s19 + $0x28] sm:$0xff] %v4505_v28  ;;  %v4472_v24 = vpop.permute.xlu0 %4471  ;;  %v4492_v39 = vmul.f32 %v8222_v12, %v4467_v18  ;;  %v4493_v44 = vmul.f32 %v8224_v60, %v4467_v18 }
 0x704   : > { %4522 = vst [vmem:[%s8360_s19 + $0x30] sm:$0xff] %v4506_v15  ;;  %4523 = vst [vmem:[%s8360_s19 + $0x38] sm:$0xff] %v4507_v31  ;;  %v4494_v45 = vmul.f32 %v8228_v21, %v4472_v24  ;;  %v4495_v62 = vmul.f32 %v8230_v33, %v4472_v24  ;;  %v4442_v33 = vld [vmem:[%s8349_s17 + $0x70] sm:$0xff] }
 0x705   : > { %v4508_v47 = vadd.f32 %v4492_v39, %v4436_v10  ;;  %v4509_v48 = vadd.f32 %v4493_v44, %v4437_v52 }
 0x706   : > { %v4510_v8 = vadd.f32 %v4494_v45, %v4438_v23  ;;  %v4511_v1 = vadd.f32 %v4495_v62, %v4439_v27  ;;  %v4477_v12 = vpop.permute.xlu1 %4476 }
 0x707   : > { %4524 = vst [vmem:[%s8360_s19 + $0x40] sm:$0xff] %v4508_v47  ;;  %4525 = vst [vmem:[%s8360_s19 + $0x48] sm:$0xff] %v4509_v48  ;;  %v4496_v60 = vmul.f32 %v8234_v11, %v4477_v12  ;;  %v4497_v21 = vmul.f32 %v8236_v13, %v4477_v12 }
 0x708   : > { %4526 = vst [vmem:[%s8360_s19 + $0x50] sm:$0xff] %v4510_v8  ;;  %4527 = vst [vmem:[%s8360_s19 + $0x58] sm:$0xff] %v4511_v1 }
 0x709   : > { %v4482_v32 = vpop.permute.xlu0 %4481  ;;  %v4512_v53 = vadd.f32 %v4496_v60, %v4440_v7  ;;  %v4513_v46 = vadd.f32 %v4497_v21, %v4441_v9 }
 0x70a   : > { %v4498_v57 = vmul.f32 %v8240_v6, %v4482_v32  ;;  %v4499_v54 = vmul.f32 %v8242_v26, %v4482_v32 }
 0x70b   : > { %4528 = vst [vmem:[%s8360_s19 + $0x60] sm:$0xff] %v4512_v53  ;;  %4529 = vst [vmem:[%s8360_s19 + $0x68] sm:$0xff] %v4513_v46 }
 0x70c   : > { %v4514_v0 = vadd.f32 %v4498_v57, %v4442_v33  ;;  %v4515_v17 = vadd.f32 %v4499_v54, %v4443_v42 }
 0x70e   : > { %4530 = vst [vmem:[%s8360_s19 + $0x70] sm:$0xff] %v4514_v0  ;;  %4531 = vst [vmem:[%s8360_s19 + $0x78] sm:$0xff] %v4515_v17 }
 0x70f PF: > { %s20_s13 = sadd.s32 1, %s5990_s13  }
 0x710   : > { %p17_p4 = scmp.ge.s32.totalorder %s20_s13, 4  }
 0x712   :  { %19 = sbr.rel (!%p17_p4) target bundleno = 1 (0x1), region = 99 }

</bundles_post_ra>
